<compile_context>
chip_gen: v7x
topology: tpu7x:2x2x1
jax: 0.10.0
libtpu: 0.0.40
codegen_flags: <defaults>
</compile_context>

<pallas_src>
import jax
import jax.numpy as jnp
import numpy as np
from jax import lax
from jax.experimental import pallas as pl
from jax.experimental.pallas import tpu as pltpu

NEG_SLOPE = 0.01  # nn.LeakyReLU default negative_slope


def _interp_matrix(out_size, in_size):
    """PyTorch bilinear (align_corners=False) 1-D interpolation matrix."""
    m = np.zeros((out_size, in_size), np.float32)
    if out_size == in_size:
        np.fill_diagonal(m, 1.0)
        return m
    scale = in_size / out_size
    for o in range(out_size):
        src = max((o + 0.5) * scale - 0.5, 0.0)
        i0 = min(int(np.floor(src)), in_size - 1)
        i1 = min(i0 + 1, in_size - 1)
        w1 = src - i0
        m[o, i0] += 1.0 - w1
        m[o, i1] += w1
    return m


def _unet_attention_kernel(x_ref,
                           w_in14_ref, b_in14_ref, w_in2_ref, b_in2_ref,
                           w14_ref, b14_ref, w2_ref, b2_ref,
                           uwT_ref, w_out14_ref, w_out2_ref, b_out_ref,
                           o_ref,
                           pad14, pad2, pool_a, pool_b):
    bt, H, W, C = x_ref.shape           # C = 64 * G (lane-dense packed channels)
    Hh, Wh = H // 2, W // 2
    C14 = w14_ref.shape[-1]             # 32 * G  (branch-1 | branch-4 packed)
    C2 = w2_ref.shape[-1]               # 16 * G  (branch-2 packed)
    M = bt * H * W

    def leaky(v):
        return jnp.where(v >= 0, v, NEG_SLOPE * v)

    def zero_border(pad_ref):
        btp, hp, wp, cin = pad_ref.shape
        pad_ref[:, 0:1, :, :] = jnp.zeros((btp, 1, wp, cin), jnp.float32)
        pad_ref[:, hp - 1:hp, :, :] = jnp.zeros((btp, 1, wp, cin), jnp.float32)
        pad_ref[:, :, 0:1, :] = jnp.zeros((btp, hp, 1, cin), jnp.float32)
        pad_ref[:, :, wp - 1:wp, :] = jnp.zeros((btp, hp, 1, cin), jnp.float32)

    def conv3x3(pad_ref, w9_ref, b_ref):
        # 3x3 "same" conv as 9 shifted (m, cin) x (cin, cout) f32 matmuls,
        # with taps read directly from the padded VMEM scratch.
        btp, hp, wp, cin = pad_ref.shape
        h, w = hp - 2, wp - 2
        m = btp * h * w
        cout = w9_ref.shape[-1]
        acc = jnp.zeros((m, cout), jnp.float32) + b_ref[...]
        for dh in range(3):
            for dw in range(3):
                tap = pad_ref[:, dh:dh + h, dw:dw + w, :].reshape(m, cin)
                acc = acc + jnp.dot(tap, w9_ref[dh * 3 + dw],
                                    preferred_element_type=jnp.float32)
        return acc

    x = x_ref[...]                      # (bt, H, W, C) f32
    xf = x.reshape(M, C)

    # fused 1x1 conv_in: one matmul feeding the two full-resolution branches
    # (y1|y4 packed into C14 lanes) and one feeding the pooled branch (y2).
    y14 = (jnp.dot(xf, w_in14_ref[...], preferred_element_type=jnp.float32)
           + b_in14_ref[...])
    y2 = (jnp.dot(xf, w_in2_ref[...], preferred_element_type=jnp.float32)
          + b_in2_ref[...])

    # ---- branches 1 & 4: fused 3x3 conv (block-diagonal weights) + LeakyReLU
    zero_border(pad14)
    pad14[:, 1:H + 1, 1:W + 1, :] = y14.reshape(bt, H, W, C14)
    y14c = leaky(conv3x3(pad14, w14_ref, b14_ref))                # (M, C14)

    # ---- branch 2: 2x2 max-pool -> 3x3 conv + LeakyReLU -> 2x bilinear up
    pool_a[...] = y2.reshape(bt, H, W, C2)
    pool_b[...] = jnp.maximum(pool_a[:, pl.ds(0, Hh, 2)],
                              pool_a[:, pl.ds(1, Hh, 2)])
    pooled = jnp.maximum(pool_b[:, :, pl.ds(0, Wh, 2), :],
                         pool_b[:, :, pl.ds(1, Wh, 2), :])        # (bt,Hh,Wh,C2)
    zero_border(pad2)
    pad2[:, 1:Hh + 1, 1:Wh + 1, :] = pooled
    z = leaky(conv3x3(pad2, w2_ref, b2_ref)).reshape(bt, Hh, Wh, C2)

    # 2x bilinear upsample, align_corners=False (PyTorch semantics), separable:
    #   H direction: fixed 2-tap stencil (0.75/0.25) with edge clamp; even/odd
    #   output rows interleaved via a leading-dims stack + reshape.
    zprev = jnp.concatenate([z[:, :1], z[:, :-1]], axis=1)
    znext = jnp.concatenate([z[:, 1:], z[:, -1:]], axis=1)
    zeven = (0.75 * z + 0.25 * zprev).reshape(bt * Hh, Wh, C2)
    zodd = (0.75 * z + 0.25 * znext).reshape(bt * Hh, Wh, C2)
    zh = jnp.stack([zeven, zodd], axis=1).reshape(bt * H, Wh, C2)
    #   W direction: move W into the lane dim (minor-dims transpose) and apply
    #   the tiny (Wh, W) interpolation matrix as one matmul.
    zt = jnp.swapaxes(zh, 1, 2).reshape(bt * H * C2, Wh)
    zu = jnp.dot(zt, uwT_ref[...], preferred_element_type=jnp.float32)
    y2u = jnp.swapaxes(zu.reshape(bt * H, C2, W), 1, 2).reshape(M, C2)

    # ---- fused 1x1 conv_out + sigmoid gate.  F.interpolate of y4 to its own
    # size (align_corners=False) is the identity, so branch 4 needs no resize.
    out = (jnp.dot(y14c, w_out14_ref[...], preferred_element_type=jnp.float32)
           + jnp.dot(y2u, w_out2_ref[...], preferred_element_type=jnp.float32)
           + b_out_ref[...])
    out = (1.0 / (1.0 + jnp.exp(-out))) * xf
    o_ref[...] = out.reshape(bt, H, W, C)


def _pack_params(torch_params, G, W):
    """Build packed / fused f32 kernel operands from PyTorch-layout params."""
    (w_in, b_in, w1, b1, w2, b2, w4, b4, w_out, b_out) = [
        np.asarray(p, np.float32) for p in torch_params]

    win_m = w_in[:, :, 0, 0].T           # (64, 48)  [cin, cout]; chunks y1|y2|y4
    wout_m = w_out[:, :, 0, 0].T         # (48, 64)  [cin, cout]; cat   y1|y2|y4

    def taps(wt):                        # (cout,cin,3,3) -> (9, cin, cout)
        return np.transpose(wt, (2, 3, 1, 0)).reshape(9, 16, 16)

    t1, t2, t4 = taps(w1), taps(w2), taps(w4)

    C14, C2, CI, CO = 32 * G, 16 * G, 64 * G, 64 * G
    w_in14 = np.zeros((CI, C14), np.float32)
    w_in2 = np.zeros((CI, C2), np.float32)
    b_in14 = np.zeros((C14,), np.float32)
    b_in2 = np.zeros((C2,), np.float32)
    w14tap = np.zeros((9, C14, C14), np.float32)
    w2tap = np.zeros((9, C2, C2), np.float32)
    b14 = np.zeros((C14,), np.float32)
    b2p = np.zeros((C2,), np.float32)
    w_out14 = np.zeros((C14, CO), np.float32)
    w_out2 = np.zeros((C2, CO), np.float32)
    b_outp = np.tile(b_out, G)

    for g in range(G):
        ci = slice(64 * g, 64 * (g + 1))        # packed in/out channels, image g
        s1 = slice(32 * g, 32 * g + 16)         # branch-1 block, image g
        s4 = slice(32 * g + 16, 32 * g + 32)    # branch-4 block, image g
        s2 = slice(16 * g, 16 * (g + 1))        # branch-2 block, image g
        w_in14[ci, s1] = win_m[:, 0:16]
        w_in14[ci, s4] = win_m[:, 32:48]
        w_in2[ci, s2] = win_m[:, 16:32]
        b_in14[s1] = b_in[0:16]
        b_in14[s4] = b_in[32:48]
        b_in2[s2] = b_in[16:32]
        for t in range(9):
            w14tap[t, s1, s1] = t1[t]
            w14tap[t, s4, s4] = t4[t]
            w2tap[t, s2, s2] = t2[t]
        b14[s1] = b1
        b14[s4] = b4
        b2p[s2] = b2
        w_out14[s1, ci] = wout_m[0:16, :]
        w_out14[s4, ci] = wout_m[32:48, :]
        w_out2[s2, ci] = wout_m[16:32, :]

    uwT = _interp_matrix(W, W // 2).T            # (Wh, W) 1-D bilinear interp

    f32 = lambda a: jnp.asarray(a, jnp.float32)
    frow = lambda a: jnp.asarray(a, jnp.float32).reshape(1, -1)
    return (f32(w_in14), frow(b_in14), f32(w_in2), frow(b_in2),
            f32(w14tap), frow(b14), f32(w2tap), frow(b2p),
            f32(uwT), f32(w_out14), f32(w_out2), frow(b_outp))


def unet_attention(x_nchw, torch_params):
    """Pallas forward of UNetAttention.  x_nchw: (B, 64, H, W) f32 -> same shape."""
    B, C, H, W = x_nchw.shape
    assert C == 64 and H % 2 == 0 and W % 2 == 0
    G = 2 if B % 2 == 0 else 1          # pack pairs of images along channels
    Bp = B // G
    Cp, C14, C2 = 64 * G, 32 * G, 16 * G
    Hh, Wh = H // 2, W // 2

    packed = _pack_params(torch_params, G, W)

    # NCHW -> lane-dense packed NHWC blocks (Bp, H, W, 64*G); layout plumbing
    # done by XLA outside the kernel.
    x = jnp.transpose(x_nchw, (0, 2, 3, 1))
    xp = (x.reshape(Bp, G, H, W, 64)
           .transpose(0, 2, 3, 1, 4)
           .reshape(Bp, H, W, Cp))

    def const_spec(a):
        nd = a.ndim
        return pl.BlockSpec(a.shape, lambda b, _n=nd: (0,) * _n)

    out_p = pl.pallas_call(
        _unet_attention_kernel,
        out_shape=jax.ShapeDtypeStruct((Bp, H, W, Cp), jnp.float32),
        grid_spec=pltpu.PrefetchScalarGridSpec(
            num_scalar_prefetch=0,
            grid=(Bp,),
            in_specs=[pl.BlockSpec((1, H, W, Cp), lambda b: (b, 0, 0, 0))]
                    + [const_spec(a) for a in packed],
            out_specs=pl.BlockSpec((1, H, W, Cp), lambda b: (b, 0, 0, 0)),
            scratch_shapes=[
                pltpu.VMEM((1, H + 2, W + 2, C14), jnp.float32),   # padded 1&4
                pltpu.VMEM((1, Hh + 2, Wh + 2, C2), jnp.float32),  # padded 2
                pltpu.VMEM((1, H, W, C2), jnp.float32),            # pool stage a
                pltpu.VMEM((1, Hh, W, C2), jnp.float32),           # pool stage b
            ]),
        compiler_params=pltpu.CompilerParams(
            dimension_semantics=("parallel",)),
    )(xp, *packed)

    out = (out_p.reshape(Bp, H, W, G, 64)
                .transpose(0, 3, 1, 2, 4)
                .reshape(B, H, W, 64))
    return jnp.transpose(out, (0, 3, 1, 2))


def reference_forward(x_nchw, torch_params):
    """Pure-JAX f32 (HIGHEST precision) reference of UNetAttention.forward."""
    (w_in, b_in, w1, b1, w2, b2, w4, b4, w_out, b_out) = torch_params
    x = jnp.transpose(x_nchw, (0, 2, 3, 1))              # NHWC
    B, H, W, C = x.shape
    Hh, Wh = H // 2, W // 2
    prec = lax.Precision.HIGHEST
    leaky = lambda v: jnp.where(v >= 0, v, NEG_SLOPE * v)

    def dot(a, b):
        return jnp.dot(a, b, precision=prec, preferred_element_type=jnp.float32)

    def conv1x1(v, wt, bias):            # wt: (cout, cin, 1, 1)
        return dot(v, jnp.transpose(wt[:, :, 0, 0])) + bias

    def conv3x3(v, wt, bias):            # v: (B,h,w,cin); wt: (cout,cin,3,3)
        h, w = v.shape[1], v.shape[2]
        pad = jnp.pad(v, ((0, 0), (1, 1), (1, 1), (0, 0)))
        acc = jnp.zeros(v.shape[:3] + (wt.shape[0],), jnp.float32) + bias
        for dh in range(3):
            for dw in range(3):
                acc = acc + dot(pad[:, dh:dh + h, dw:dw + w, :],
                                jnp.transpose(wt[:, :, dh, dw]))
        return acc

    y = conv1x1(x, w_in, b_in)                           # (B,H,W,48)
    y1, y2_, y4 = y[..., 0:16], y[..., 16:32], y[..., 32:48]

    y1 = leaky(conv3x3(y1, w1, b1))
    y4 = leaky(conv3x3(y4, w4, b4))      # interpolate to its own size == identity

    y2p = jnp.max(y2_.reshape(B, Hh, 2, Wh, 2, 16), axis=(2, 4))
    y2c = leaky(conv3x3(y2p, w2, b2))
    # bilinear 2x upsample (align_corners=False): H stencil + W interp matrix
    zprev = jnp.concatenate([y2c[:, :1], y2c[:, :-1]], axis=1)
    znext = jnp.concatenate([y2c[:, 1:], y2c[:, -1:]], axis=1)
    zh = jnp.stack([0.75 * y2c + 0.25 * zprev,
                    0.75 * y2c + 0.25 * znext], axis=2).reshape(B, H, Wh, 16)
    uwT = jnp.asarray(_interp_matrix(W, Wh).T)
    y2u = jnp.einsum('bhkc,kw->bhwc', zh, uwT, precision=prec,
                     preferred_element_type=jnp.float32)

    cat = jnp.concatenate([y1, y2u, y4], axis=-1)        # (B,H,W,48)
    out = conv1x1(cat, w_out, b_out)
    out = (1.0 / (1.0 + jnp.exp(-out))) * x
    return jnp.transpose(out, (0, 3, 1, 2))


if __name__ == "__main__":
    B, H, W = 4, 16, 16
    key = jax.random.PRNGKey(0)
    ks = jax.random.split(key, 11)

    def nrm(k, shape, scale=0.05):
        return jax.random.normal(k, shape, jnp.float32) * scale

    # Parameters in PyTorch conv layout (cout, cin, kh, kw) / (cout,).
    torch_params = (
        nrm(ks[0], (48, 64, 1, 1)), nrm(ks[1], (48,)),   # conv_in
        nrm(ks[2], (16, 16, 3, 3)), nrm(ks[3], (16,)),   # conv_1x1
        nrm(ks[4], (16, 16, 3, 3)), nrm(ks[5], (16,)),   # conv_2x2
        nrm(ks[6], (16, 16, 3, 3)), nrm(ks[7], (16,)),   # conv_4x4
        nrm(ks[8], (64, 48, 1, 1)), nrm(ks[9], (64,)),   # conv_out
    )
    x = jax.random.normal(ks[10], (B, 64, H, W), jnp.float32)    # NCHW like torch

    out = unet_attention(x, torch_params)
    out = jax.block_until_ready(out)

    # Check against the full-f32 (HIGHEST precision) reference; slack covers
    # the MXU's default-precision f32 matmul passes.
    ref_f32 = jax.block_until_ready(reference_forward(x, torch_params))
    err = float(jnp.max(jnp.abs(out - ref_f32)))
    assert np.isfinite(err) and err < 2e-2, f"max abs err {err}"

    print("KERNEL_OK")
</pallas_src>

<mosaic_0001>
module attributes {stable_mosaic.version = 11 : i64} {
  func.func @_unet_attention_kernel(%arg0: i32, %arg1: memref<1x16x16x128xf32, #tpu.memory_space<vmem>>, %arg2: memref<128x64xf32, #tpu.memory_space<vmem>>, %arg3: memref<1x64xf32, #tpu.memory_space<vmem>>, %arg4: memref<128x32xf32, #tpu.memory_space<vmem>>, %arg5: memref<1x32xf32, #tpu.memory_space<vmem>>, %arg6: memref<9x64x64xf32, #tpu.memory_space<vmem>>, %arg7: memref<1x64xf32, #tpu.memory_space<vmem>>, %arg8: memref<9x32x32xf32, #tpu.memory_space<vmem>>, %arg9: memref<1x32xf32, #tpu.memory_space<vmem>>, %arg10: memref<8x16xf32, #tpu.memory_space<vmem>>, %arg11: memref<64x128xf32, #tpu.memory_space<vmem>>, %arg12: memref<32x128xf32, #tpu.memory_space<vmem>>, %arg13: memref<1x128xf32, #tpu.memory_space<vmem>>, %arg14: memref<1x16x16x128xf32, #tpu.memory_space<vmem>>, %arg15: memref<1x18x18x64xf32, #tpu.memory_space<vmem>>, %arg16: memref<1x10x10x32xf32, #tpu.memory_space<vmem>>, %arg17: memref<1x16x16x32xf32, #tpu.memory_space<vmem>>, %arg18: memref<1x8x16x32xf32, #tpu.memory_space<vmem>>) attributes {dimension_semantics = [#tpu.dimension_semantics<parallel>], iteration_bounds = array<i64: 2>, scalar_prefetch = 0 : i64, scratch_operands = 4 : i64, tpu.core_type = #tpu.core_type<tc>, window_params = [{transform_indices = @transform_0, window_bounds = array<i64: 1, 16, 16, 128>}, {pipeline_mode = #tpu.pipeline_mode<synchronous>, transform_indices = @transform_1, window_bounds = array<i64: 128, 64>}, {pipeline_mode = #tpu.pipeline_mode<synchronous>, transform_indices = @transform_2, window_bounds = array<i64: 1, 64>}, {pipeline_mode = #tpu.pipeline_mode<synchronous>, transform_indices = @transform_3, window_bounds = array<i64: 128, 32>}, {pipeline_mode = #tpu.pipeline_mode<synchronous>, transform_indices = @transform_4, window_bounds = array<i64: 1, 32>}, {pipeline_mode = #tpu.pipeline_mode<synchronous>, transform_indices = @transform_5, window_bounds = array<i64: 9, 64, 64>}, {pipeline_mode = #tpu.pipeline_mode<synchronous>, transform_indices = @transform_6, window_bounds = array<i64: 1, 64>}, {pipeline_mode = #tpu.pipeline_mode<synchronous>, transform_indices = @transform_7, window_bounds = array<i64: 9, 32, 32>}, {pipeline_mode = #tpu.pipeline_mode<synchronous>, transform_indices = @transform_8, window_bounds = array<i64: 1, 32>}, {pipeline_mode = #tpu.pipeline_mode<synchronous>, transform_indices = @transform_9, window_bounds = array<i64: 8, 16>}, {pipeline_mode = #tpu.pipeline_mode<synchronous>, transform_indices = @transform_10, window_bounds = array<i64: 64, 128>}, {pipeline_mode = #tpu.pipeline_mode<synchronous>, transform_indices = @transform_11, window_bounds = array<i64: 32, 128>}, {pipeline_mode = #tpu.pipeline_mode<synchronous>, transform_indices = @transform_12, window_bounds = array<i64: 1, 128>}, {transform_indices = @transform_13, window_bounds = array<i64: 1, 16, 16, 128>}]} {
    %c0 = arith.constant 0 : index
    %c0_0 = arith.constant 0 : index
    %c0_1 = arith.constant 0 : index
    %c0_2 = arith.constant 0 : index
    %0 = vector.load %arg1[%c0, %c0_0, %c0_1, %c0_2] : memref<1x16x16x128xf32, #tpu.memory_space<vmem>>, vector<1x16x16x128xf32>
    %1 = vector.shape_cast %0 : vector<1x16x16x128xf32> to vector<256x128xf32>
    %c0_3 = arith.constant 0 : index
    %c0_4 = arith.constant 0 : index
    %2 = vector.load %arg2[%c0_3, %c0_4] : memref<128x64xf32, #tpu.memory_space<vmem>>, vector<128x64xf32>
    %cst = arith.constant dense<0.000000e+00> : vector<256x64xf32>
    %3 = tpu.matmul %1, %2, %cst {dimension_numbers = #tpu.dot_dimension_numbers<[1], [0], [0], [1], [0, 0, 1, 1], [], []>} : vector<256x128xf32>, vector<128x64xf32>, vector<256x64xf32> -> vector<256x64xf32>
    %c0_5 = arith.constant 0 : index
    %c0_6 = arith.constant 0 : index
    %4 = vector.load %arg3[%c0_5, %c0_6] : memref<1x64xf32, #tpu.memory_space<vmem>>, vector<1x64xf32>
    %5 = vector.broadcast %4 : vector<1x64xf32> to vector<256x64xf32>
    %6 = arith.addf %3, %5 : vector<256x64xf32>
    %c0_7 = arith.constant 0 : index
    %c0_8 = arith.constant 0 : index
    %7 = vector.load %arg4[%c0_7, %c0_8] : memref<128x32xf32, #tpu.memory_space<vmem>>, vector<128x32xf32>
    %cst_9 = arith.constant dense<0.000000e+00> : vector<256x32xf32>
    %8 = tpu.matmul %1, %7, %cst_9 {dimension_numbers = #tpu.dot_dimension_numbers<[1], [0], [0], [1], [0, 0, 1, 1], [], []>} : vector<256x128xf32>, vector<128x32xf32>, vector<256x32xf32> -> vector<256x32xf32>
    %c0_10 = arith.constant 0 : index
    %c0_11 = arith.constant 0 : index
    %9 = vector.load %arg5[%c0_10, %c0_11] : memref<1x32xf32, #tpu.memory_space<vmem>>, vector<1x32xf32>
    %10 = vector.broadcast %9 : vector<1x32xf32> to vector<256x32xf32>
    %11 = arith.addf %8, %10 : vector<256x32xf32>
    %cst_12 = arith.constant 0.000000e+00 : f32
    %12 = vector.broadcast %cst_12 : f32 to vector<1x1x18x64xf32>
    %c0_13 = arith.constant 0 : index
    %c0_14 = arith.constant 0 : index
    %c0_15 = arith.constant 0 : index
    %c0_16 = arith.constant 0 : index
    %13 = vector.load %arg15[%c0_13, %c0_14, %c0_15, %c0_16] : memref<1x18x18x64xf32, #tpu.memory_space<vmem>>, vector<1x1x18x64xf32>
    tpu.vector_store %arg15[%c0_13, %c0_14, %c0_15, %c0_16], %12 {strides = array<i32>} : memref<1x18x18x64xf32, #tpu.memory_space<vmem>>, vector<1x1x18x64xf32>,
    %cst_17 = arith.constant 0.000000e+00 : f32
    %14 = vector.broadcast %cst_17 : f32 to vector<1x1x18x64xf32>
    %c0_18 = arith.constant 0 : index
    %c17 = arith.constant 17 : index
    %c0_19 = arith.constant 0 : index
    %c0_20 = arith.constant 0 : index
    %15 = vector.load %arg15[%c0_18, %c17, %c0_19, %c0_20] : memref<1x18x18x64xf32, #tpu.memory_space<vmem>>, vector<1x1x18x64xf32>
    tpu.vector_store %arg15[%c0_18, %c17, %c0_19, %c0_20], %14 {strides = array<i32>} : memref<1x18x18x64xf32, #tpu.memory_space<vmem>>, vector<1x1x18x64xf32>,
    %cst_21 = arith.constant 0.000000e+00 : f32
    %16 = vector.broadcast %cst_21 : f32 to vector<1x18x1x64xf32>
    %c0_22 = arith.constant 0 : index
    %c0_23 = arith.constant 0 : index
    %c0_24 = arith.constant 0 : index
    %c0_25 = arith.constant 0 : index
    %17 = vector.load %arg15[%c0_22, %c0_23, %c0_24, %c0_25] : memref<1x18x18x64xf32, #tpu.memory_space<vmem>>, vector<1x18x1x64xf32>
    tpu.vector_store %arg15[%c0_22, %c0_23, %c0_24, %c0_25], %16 {strides = array<i32>} : memref<1x18x18x64xf32, #tpu.memory_space<vmem>>, vector<1x18x1x64xf32>,
    %cst_26 = arith.constant 0.000000e+00 : f32
    %18 = vector.broadcast %cst_26 : f32 to vector<1x18x1x64xf32>
    %c0_27 = arith.constant 0 : index
    %c0_28 = arith.constant 0 : index
    %c17_29 = arith.constant 17 : index
    %c0_30 = arith.constant 0 : index
    %19 = vector.load %arg15[%c0_27, %c0_28, %c17_29, %c0_30] : memref<1x18x18x64xf32, #tpu.memory_space<vmem>>, vector<1x18x1x64xf32>
    tpu.vector_store %arg15[%c0_27, %c0_28, %c17_29, %c0_30], %18 {strides = array<i32>} : memref<1x18x18x64xf32, #tpu.memory_space<vmem>>, vector<1x18x1x64xf32>,
    %20 = vector.shape_cast %6 : vector<256x64xf32> to vector<1x16x16x64xf32>
    %c0_31 = arith.constant 0 : index
    %c1 = arith.constant 1 : index
    %c1_32 = arith.constant 1 : index
    %c0_33 = arith.constant 0 : index
    %21 = vector.load %arg15[%c0_31, %c1, %c1_32, %c0_33] : memref<1x18x18x64xf32, #tpu.memory_space<vmem>>, vector<1x16x16x64xf32>
    tpu.vector_store %arg15[%c0_31, %c1, %c1_32, %c0_33], %20 {strides = array<i32>} : memref<1x18x18x64xf32, #tpu.memory_space<vmem>>, vector<1x16x16x64xf32>,
    %cst_34 = arith.constant 0.000000e+00 : f32
    %22 = vector.broadcast %cst_34 : f32 to vector<256x64xf32>
    %c0_35 = arith.constant 0 : index
    %c0_36 = arith.constant 0 : index
    %23 = vector.load %arg7[%c0_35, %c0_36] : memref<1x64xf32, #tpu.memory_space<vmem>>, vector<1x64xf32>
    %24 = vector.broadcast %23 : vector<1x64xf32> to vector<256x64xf32>
    %25 = arith.addf %22, %24 : vector<256x64xf32>
    %c0_37 = arith.constant 0 : index
    %c0_38 = arith.constant 0 : index
    %c0_39 = arith.constant 0 : index
    %c0_40 = arith.constant 0 : index
    %26 = vector.load %arg15[%c0_37, %c0_38, %c0_39, %c0_40] : memref<1x18x18x64xf32, #tpu.memory_space<vmem>>, vector<1x16x16x64xf32>
    %27 = vector.shape_cast %26 : vector<1x16x16x64xf32> to vector<256x64xf32>
    %c0_41 = arith.constant 0 : index
    %c0_42 = arith.constant 0 : index
    %c0_43 = arith.constant 0 : index
    %28 = vector.load %arg6[%c0_41, %c0_42, %c0_43] : memref<9x64x64xf32, #tpu.memory_space<vmem>>, vector<1x64x64xf32>
    %29 = vector.shape_cast %28 : vector<1x64x64xf32> to vector<64x64xf32>
    %cst_44 = arith.constant dense<0.000000e+00> : vector<256x64xf32>
    %30 = tpu.matmul %27, %29, %cst_44 {dimension_numbers = #tpu.dot_dimension_numbers<[1], [0], [0], [1], [0, 0, 1, 1], [], []>} : vector<256x64xf32>, vector<64x64xf32>, vector<256x64xf32> -> vector<256x64xf32>
    %31 = arith.addf %25, %30 : vector<256x64xf32>
    %c0_45 = arith.constant 0 : index
    %c0_46 = arith.constant 0 : index
    %c1_47 = arith.constant 1 : index
    %c0_48 = arith.constant 0 : index
    %32 = vector.load %arg15[%c0_45, %c0_46, %c1_47, %c0_48] : memref<1x18x18x64xf32, #tpu.memory_space<vmem>>, vector<1x16x16x64xf32>
    %33 = vector.shape_cast %32 : vector<1x16x16x64xf32> to vector<256x64xf32>
    %c1_49 = arith.constant 1 : index
    %c0_50 = arith.constant 0 : index
    %c0_51 = arith.constant 0 : index
    %34 = vector.load %arg6[%c1_49, %c0_50, %c0_51] : memref<9x64x64xf32, #tpu.memory_space<vmem>>, vector<1x64x64xf32>
    %35 = vector.shape_cast %34 : vector<1x64x64xf32> to vector<64x64xf32>
    %cst_52 = arith.constant dense<0.000000e+00> : vector<256x64xf32>
    %36 = tpu.matmul %33, %35, %cst_52 {dimension_numbers = #tpu.dot_dimension_numbers<[1], [0], [0], [1], [0, 0, 1, 1], [], []>} : vector<256x64xf32>, vector<64x64xf32>, vector<256x64xf32> -> vector<256x64xf32>
    %37 = arith.addf %31, %36 : vector<256x64xf32>
    %c0_53 = arith.constant 0 : index
    %c0_54 = arith.constant 0 : index
    %c2 = arith.constant 2 : index
    %c0_55 = arith.constant 0 : index
    %38 = vector.load %arg15[%c0_53, %c0_54, %c2, %c0_55] : memref<1x18x18x64xf32, #tpu.memory_space<vmem>>, vector<1x16x16x64xf32>
    %39 = vector.shape_cast %38 : vector<1x16x16x64xf32> to vector<256x64xf32>
    %c2_56 = arith.constant 2 : index
    %c0_57 = arith.constant 0 : index
    %c0_58 = arith.constant 0 : index
    %40 = vector.load %arg6[%c2_56, %c0_57, %c0_58] : memref<9x64x64xf32, #tpu.memory_space<vmem>>, vector<1x64x64xf32>
    %41 = vector.shape_cast %40 : vector<1x64x64xf32> to vector<64x64xf32>
    %cst_59 = arith.constant dense<0.000000e+00> : vector<256x64xf32>
    %42 = tpu.matmul %39, %41, %cst_59 {dimension_numbers = #tpu.dot_dimension_numbers<[1], [0], [0], [1], [0, 0, 1, 1], [], []>} : vector<256x64xf32>, vector<64x64xf32>, vector<256x64xf32> -> vector<256x64xf32>
    %43 = arith.addf %37, %42 : vector<256x64xf32>
    %c0_60 = arith.constant 0 : index
    %c1_61 = arith.constant 1 : index
    %c0_62 = arith.constant 0 : index
    %c0_63 = arith.constant 0 : index
    %44 = vector.load %arg15[%c0_60, %c1_61, %c0_62, %c0_63] : memref<1x18x18x64xf32, #tpu.memory_space<vmem>>, vector<1x16x16x64xf32>
    %45 = vector.shape_cast %44 : vector<1x16x16x64xf32> to vector<256x64xf32>
    %c3 = arith.constant 3 : index
    %c0_64 = arith.constant 0 : index
    %c0_65 = arith.constant 0 : index
    %46 = vector.load %arg6[%c3, %c0_64, %c0_65] : memref<9x64x64xf32, #tpu.memory_space<vmem>>, vector<1x64x64xf32>
    %47 = vector.shape_cast %46 : vector<1x64x64xf32> to vector<64x64xf32>
    %cst_66 = arith.constant dense<0.000000e+00> : vector<256x64xf32>
    %48 = tpu.matmul %45, %47, %cst_66 {dimension_numbers = #tpu.dot_dimension_numbers<[1], [0], [0], [1], [0, 0, 1, 1], [], []>} : vector<256x64xf32>, vector<64x64xf32>, vector<256x64xf32> -> vector<256x64xf32>
    %49 = arith.addf %43, %48 : vector<256x64xf32>
    %c0_67 = arith.constant 0 : index
    %c1_68 = arith.constant 1 : index
    %c1_69 = arith.constant 1 : index
    %c0_70 = arith.constant 0 : index
    %50 = vector.load %arg15[%c0_67, %c1_68, %c1_69, %c0_70] : memref<1x18x18x64xf32, #tpu.memory_space<vmem>>, vector<1x16x16x64xf32>
    %51 = vector.shape_cast %50 : vector<1x16x16x64xf32> to vector<256x64xf32>
    %c4 = arith.constant 4 : index
    %c0_71 = arith.constant 0 : index
    %c0_72 = arith.constant 0 : index
    %52 = vector.load %arg6[%c4, %c0_71, %c0_72] : memref<9x64x64xf32, #tpu.memory_space<vmem>>, vector<1x64x64xf32>
    %53 = vector.shape_cast %52 : vector<1x64x64xf32> to vector<64x64xf32>
    %cst_73 = arith.constant dense<0.000000e+00> : vector<256x64xf32>
    %54 = tpu.matmul %51, %53, %cst_73 {dimension_numbers = #tpu.dot_dimension_numbers<[1], [0], [0], [1], [0, 0, 1, 1], [], []>} : vector<256x64xf32>, vector<64x64xf32>, vector<256x64xf32> -> vector<256x64xf32>
    %55 = arith.addf %49, %54 : vector<256x64xf32>
    %c0_74 = arith.constant 0 : index
    %c1_75 = arith.constant 1 : index
    %c2_76 = arith.constant 2 : index
    %c0_77 = arith.constant 0 : index
    %56 = vector.load %arg15[%c0_74, %c1_75, %c2_76, %c0_77] : memref<1x18x18x64xf32, #tpu.memory_space<vmem>>, vector<1x16x16x64xf32>
    %57 = vector.shape_cast %56 : vector<1x16x16x64xf32> to vector<256x64xf32>
    %c5 = arith.constant 5 : index
    %c0_78 = arith.constant 0 : index
    %c0_79 = arith.constant 0 : index
    %58 = vector.load %arg6[%c5, %c0_78, %c0_79] : memref<9x64x64xf32, #tpu.memory_space<vmem>>, vector<1x64x64xf32>
    %59 = vector.shape_cast %58 : vector<1x64x64xf32> to vector<64x64xf32>
    %cst_80 = arith.constant dense<0.000000e+00> : vector<256x64xf32>
    %60 = tpu.matmul %57, %59, %cst_80 {dimension_numbers = #tpu.dot_dimension_numbers<[1], [0], [0], [1], [0, 0, 1, 1], [], []>} : vector<256x64xf32>, vector<64x64xf32>, vector<256x64xf32> -> vector<256x64xf32>
    %61 = arith.addf %55, %60 : vector<256x64xf32>
    %c0_81 = arith.constant 0 : index
    %c2_82 = arith.constant 2 : index
    %c0_83 = arith.constant 0 : index
    %c0_84 = arith.constant 0 : index
    %62 = vector.load %arg15[%c0_81, %c2_82, %c0_83, %c0_84] : memref<1x18x18x64xf32, #tpu.memory_space<vmem>>, vector<1x16x16x64xf32>
    %63 = vector.shape_cast %62 : vector<1x16x16x64xf32> to vector<256x64xf32>
    %c6 = arith.constant 6 : index
    %c0_85 = arith.constant 0 : index
    %c0_86 = arith.constant 0 : index
    %64 = vector.load %arg6[%c6, %c0_85, %c0_86] : memref<9x64x64xf32, #tpu.memory_space<vmem>>, vector<1x64x64xf32>
    %65 = vector.shape_cast %64 : vector<1x64x64xf32> to vector<64x64xf32>
    %cst_87 = arith.constant dense<0.000000e+00> : vector<256x64xf32>
    %66 = tpu.matmul %63, %65, %cst_87 {dimension_numbers = #tpu.dot_dimension_numbers<[1], [0], [0], [1], [0, 0, 1, 1], [], []>} : vector<256x64xf32>, vector<64x64xf32>, vector<256x64xf32> -> vector<256x64xf32>
    %67 = arith.addf %61, %66 : vector<256x64xf32>
    %c0_88 = arith.constant 0 : index
    %c2_89 = arith.constant 2 : index
    %c1_90 = arith.constant 1 : index
    %c0_91 = arith.constant 0 : index
    %68 = vector.load %arg15[%c0_88, %c2_89, %c1_90, %c0_91] : memref<1x18x18x64xf32, #tpu.memory_space<vmem>>, vector<1x16x16x64xf32>
    %69 = vector.shape_cast %68 : vector<1x16x16x64xf32> to vector<256x64xf32>
    %c7 = arith.constant 7 : index
    %c0_92 = arith.constant 0 : index
    %c0_93 = arith.constant 0 : index
    %70 = vector.load %arg6[%c7, %c0_92, %c0_93] : memref<9x64x64xf32, #tpu.memory_space<vmem>>, vector<1x64x64xf32>
    %71 = vector.shape_cast %70 : vector<1x64x64xf32> to vector<64x64xf32>
    %cst_94 = arith.constant dense<0.000000e+00> : vector<256x64xf32>
    %72 = tpu.matmul %69, %71, %cst_94 {dimension_numbers = #tpu.dot_dimension_numbers<[1], [0], [0], [1], [0, 0, 1, 1], [], []>} : vector<256x64xf32>, vector<64x64xf32>, vector<256x64xf32> -> vector<256x64xf32>
    %73 = arith.addf %67, %72 : vector<256x64xf32>
    %c0_95 = arith.constant 0 : index
    %c2_96 = arith.constant 2 : index
    %c2_97 = arith.constant 2 : index
    %c0_98 = arith.constant 0 : index
    %74 = vector.load %arg15[%c0_95, %c2_96, %c2_97, %c0_98] : memref<1x18x18x64xf32, #tpu.memory_space<vmem>>, vector<1x16x16x64xf32>
    %75 = vector.shape_cast %74 : vector<1x16x16x64xf32> to vector<256x64xf32>
    %c8 = arith.constant 8 : index
    %c0_99 = arith.constant 0 : index
    %c0_100 = arith.constant 0 : index
    %76 = vector.load %arg6[%c8, %c0_99, %c0_100] : memref<9x64x64xf32, #tpu.memory_space<vmem>>, vector<1x64x64xf32>
    %77 = vector.shape_cast %76 : vector<1x64x64xf32> to vector<64x64xf32>
    %cst_101 = arith.constant dense<0.000000e+00> : vector<256x64xf32>
    %78 = tpu.matmul %75, %77, %cst_101 {dimension_numbers = #tpu.dot_dimension_numbers<[1], [0], [0], [1], [0, 0, 1, 1], [], []>} : vector<256x64xf32>, vector<64x64xf32>, vector<256x64xf32> -> vector<256x64xf32>
    %79 = arith.addf %73, %78 : vector<256x64xf32>
    %cst_102 = arith.constant 0.000000e+00 : f32
    %80 = vector.broadcast %cst_102 : f32 to vector<256x64xf32>
    %81 = arith.cmpf oge, %79, %80 : vector<256x64xf32>
    %cst_103 = arith.constant 0.00999999977 : f32
    %82 = vector.broadcast %cst_103 : f32 to vector<256x64xf32>
    %83 = arith.mulf %82, %79 : vector<256x64xf32>
    %84 = arith.select %81, %79, %83 : vector<256x64xi1>, vector<256x64xf32>
    %85 = vector.shape_cast %11 : vector<256x32xf32> to vector<1x16x16x32xf32>
    %c0_104 = arith.constant 0 : index
    %c0_105 = arith.constant 0 : index
    %c0_106 = arith.constant 0 : index
    %c0_107 = arith.constant 0 : index
    %86 = vector.load %arg17[%c0_104, %c0_105, %c0_106, %c0_107] : memref<1x16x16x32xf32, #tpu.memory_space<vmem>>, vector<1x16x16x32xf32>
    tpu.vector_store %arg17[%c0_104, %c0_105, %c0_106, %c0_107], %85 {strides = array<i32>} : memref<1x16x16x32xf32, #tpu.memory_space<vmem>>, vector<1x16x16x32xf32>,
    %c0_108 = arith.constant 0 : index
    %c0_109 = arith.constant 0 : index
    %c0_110 = arith.constant 0 : index
    %c0_111 = arith.constant 0 : index
    %87 = tpu.strided_load %arg17[%c0_108, %c0_109, %c0_110, %c0_111] {strides = array<i32: 1, 2, 1, 1>} : memref<1x16x16x32xf32, #tpu.memory_space<vmem>>, vector<1x8x16x32xf32>
    %c0_112 = arith.constant 0 : index
    %c1_113 = arith.constant 1 : index
    %c0_114 = arith.constant 0 : index
    %c0_115 = arith.constant 0 : index
    %88 = tpu.strided_load %arg17[%c0_112, %c1_113, %c0_114, %c0_115] {strides = array<i32: 1, 2, 1, 1>} : memref<1x16x16x32xf32, #tpu.memory_space<vmem>>, vector<1x8x16x32xf32>
    %89 = arith.maximumf %87, %88 : vector<1x8x16x32xf32>
    %c0_116 = arith.constant 0 : index
    %c0_117 = arith.constant 0 : index
    %c0_118 = arith.constant 0 : index
    %c0_119 = arith.constant 0 : index
    %90 = vector.load %arg18[%c0_116, %c0_117, %c0_118, %c0_119] : memref<1x8x16x32xf32, #tpu.memory_space<vmem>>, vector<1x8x16x32xf32>
    tpu.vector_store %arg18[%c0_116, %c0_117, %c0_118, %c0_119], %89 {strides = array<i32>} : memref<1x8x16x32xf32, #tpu.memory_space<vmem>>, vector<1x8x16x32xf32>,
    %c0_120 = arith.constant 0 : index
    %c0_121 = arith.constant 0 : index
    %c0_122 = arith.constant 0 : index
    %c0_123 = arith.constant 0 : index
    %91 = tpu.strided_load %arg18[%c0_120, %c0_121, %c0_122, %c0_123] {strides = array<i32: 1, 1, 2, 1>} : memref<1x8x16x32xf32, #tpu.memory_space<vmem>>, vector<1x8x8x32xf32>
    %c0_124 = arith.constant 0 : index
    %c0_125 = arith.constant 0 : index
    %c1_126 = arith.constant 1 : index
    %c0_127 = arith.constant 0 : index
    %92 = tpu.strided_load %arg18[%c0_124, %c0_125, %c1_126, %c0_127] {strides = array<i32: 1, 1, 2, 1>} : memref<1x8x16x32xf32, #tpu.memory_space<vmem>>, vector<1x8x8x32xf32>
    %93 = arith.maximumf %91, %92 : vector<1x8x8x32xf32>
    %cst_128 = arith.constant 0.000000e+00 : f32
    %94 = vector.broadcast %cst_128 : f32 to vector<1x1x10x32xf32>
    %c0_129 = arith.constant 0 : index
    %c0_130 = arith.constant 0 : index
    %c0_131 = arith.constant 0 : index
    %c0_132 = arith.constant 0 : index
    %95 = vector.load %arg16[%c0_129, %c0_130, %c0_131, %c0_132] : memref<1x10x10x32xf32, #tpu.memory_space<vmem>>, vector<1x1x10x32xf32>
    tpu.vector_store %arg16[%c0_129, %c0_130, %c0_131, %c0_132], %94 {strides = array<i32>} : memref<1x10x10x32xf32, #tpu.memory_space<vmem>>, vector<1x1x10x32xf32>,
    %cst_133 = arith.constant 0.000000e+00 : f32
    %96 = vector.broadcast %cst_133 : f32 to vector<1x1x10x32xf32>
    %c0_134 = arith.constant 0 : index
    %c9 = arith.constant 9 : index
    %c0_135 = arith.constant 0 : index
    %c0_136 = arith.constant 0 : index
    %97 = vector.load %arg16[%c0_134, %c9, %c0_135, %c0_136] : memref<1x10x10x32xf32, #tpu.memory_space<vmem>>, vector<1x1x10x32xf32>
    tpu.vector_store %arg16[%c0_134, %c9, %c0_135, %c0_136], %96 {strides = array<i32>} : memref<1x10x10x32xf32, #tpu.memory_space<vmem>>, vector<1x1x10x32xf32>,
    %cst_137 = arith.constant 0.000000e+00 : f32
    %98 = vector.broadcast %cst_137 : f32 to vector<1x10x1x32xf32>
    %c0_138 = arith.constant 0 : index
    %c0_139 = arith.constant 0 : index
    %c0_140 = arith.constant 0 : index
    %c0_141 = arith.constant 0 : index
    %99 = vector.load %arg16[%c0_138, %c0_139, %c0_140, %c0_141] : memref<1x10x10x32xf32, #tpu.memory_space<vmem>>, vector<1x10x1x32xf32>
    tpu.vector_store %arg16[%c0_138, %c0_139, %c0_140, %c0_141], %98 {strides = array<i32>} : memref<1x10x10x32xf32, #tpu.memory_space<vmem>>, vector<1x10x1x32xf32>,
    %cst_142 = arith.constant 0.000000e+00 : f32
    %100 = vector.broadcast %cst_142 : f32 to vector<1x10x1x32xf32>
    %c0_143 = arith.constant 0 : index
    %c0_144 = arith.constant 0 : index
    %c9_145 = arith.constant 9 : index
    %c0_146 = arith.constant 0 : index
    %101 = vector.load %arg16[%c0_143, %c0_144, %c9_145, %c0_146] : memref<1x10x10x32xf32, #tpu.memory_space<vmem>>, vector<1x10x1x32xf32>
    tpu.vector_store %arg16[%c0_143, %c0_144, %c9_145, %c0_146], %100 {strides = array<i32>} : memref<1x10x10x32xf32, #tpu.memory_space<vmem>>, vector<1x10x1x32xf32>,
    %c0_147 = arith.constant 0 : index
    %c1_148 = arith.constant 1 : index
    %c1_149 = arith.constant 1 : index
    %c0_150 = arith.constant 0 : index
    %102 = vector.load %arg16[%c0_147, %c1_148, %c1_149, %c0_150] : memref<1x10x10x32xf32, #tpu.memory_space<vmem>>, vector<1x8x8x32xf32>
    tpu.vector_store %arg16[%c0_147, %c1_148, %c1_149, %c0_150], %93 {strides = array<i32>} : memref<1x10x10x32xf32, #tpu.memory_space<vmem>>, vector<1x8x8x32xf32>,
    %cst_151 = arith.constant 0.000000e+00 : f32
    %103 = vector.broadcast %cst_151 : f32 to vector<64x32xf32>
    %c0_152 = arith.constant 0 : index
    %c0_153 = arith.constant 0 : index
    %104 = vector.load %arg9[%c0_152, %c0_153] : memref<1x32xf32, #tpu.memory_space<vmem>>, vector<1x32xf32>
    %105 = vector.broadcast %104 : vector<1x32xf32> to vector<64x32xf32>
    %106 = arith.addf %103, %105 : vector<64x32xf32>
    %c0_154 = arith.constant 0 : index
    %c0_155 = arith.constant 0 : index
    %c0_156 = arith.constant 0 : index
    %c0_157 = arith.constant 0 : index
    %107 = vector.load %arg16[%c0_154, %c0_155, %c0_156, %c0_157] : memref<1x10x10x32xf32, #tpu.memory_space<vmem>>, vector<1x8x8x32xf32>
    %108 = vector.shape_cast %107 : vector<1x8x8x32xf32> to vector<64x32xf32>
    %c0_158 = arith.constant 0 : index
    %c0_159 = arith.constant 0 : index
    %c0_160 = arith.constant 0 : index
    %109 = vector.load %arg8[%c0_158, %c0_159, %c0_160] : memref<9x32x32xf32, #tpu.memory_space<vmem>>, vector<1x32x32xf32>
    %110 = vector.shape_cast %109 : vector<1x32x32xf32> to vector<32x32xf32>
    %cst_161 = arith.constant dense<0.000000e+00> : vector<64x32xf32>
    %111 = tpu.matmul %108, %110, %cst_161 {dimension_numbers = #tpu.dot_dimension_numbers<[1], [0], [0], [1], [0, 0, 1, 1], [], []>} : vector<64x32xf32>, vector<32x32xf32>, vector<64x32xf32> -> vector<64x32xf32>
    %112 = arith.addf %106, %111 : vector<64x32xf32>
    %c0_162 = arith.constant 0 : index
    %c0_163 = arith.constant 0 : index
    %c1_164 = arith.constant 1 : index
    %c0_165 = arith.constant 0 : index
    %113 = vector.load %arg16[%c0_162, %c0_163, %c1_164, %c0_165] : memref<1x10x10x32xf32, #tpu.memory_space<vmem>>, vector<1x8x8x32xf32>
    %114 = vector.shape_cast %113 : vector<1x8x8x32xf32> to vector<64x32xf32>
    %c1_166 = arith.constant 1 : index
    %c0_167 = arith.constant 0 : index
    %c0_168 = arith.constant 0 : index
    %115 = vector.load %arg8[%c1_166, %c0_167, %c0_168] : memref<9x32x32xf32, #tpu.memory_space<vmem>>, vector<1x32x32xf32>
    %116 = vector.shape_cast %115 : vector<1x32x32xf32> to vector<32x32xf32>
    %cst_169 = arith.constant dense<0.000000e+00> : vector<64x32xf32>
    %117 = tpu.matmul %114, %116, %cst_169 {dimension_numbers = #tpu.dot_dimension_numbers<[1], [0], [0], [1], [0, 0, 1, 1], [], []>} : vector<64x32xf32>, vector<32x32xf32>, vector<64x32xf32> -> vector<64x32xf32>
    %118 = arith.addf %112, %117 : vector<64x32xf32>
    %c0_170 = arith.constant 0 : index
    %c0_171 = arith.constant 0 : index
    %c2_172 = arith.constant 2 : index
    %c0_173 = arith.constant 0 : index
    %119 = vector.load %arg16[%c0_170, %c0_171, %c2_172, %c0_173] : memref<1x10x10x32xf32, #tpu.memory_space<vmem>>, vector<1x8x8x32xf32>
    %120 = vector.shape_cast %119 : vector<1x8x8x32xf32> to vector<64x32xf32>
    %c2_174 = arith.constant 2 : index
    %c0_175 = arith.constant 0 : index
    %c0_176 = arith.constant 0 : index
    %121 = vector.load %arg8[%c2_174, %c0_175, %c0_176] : memref<9x32x32xf32, #tpu.memory_space<vmem>>, vector<1x32x32xf32>
    %122 = vector.shape_cast %121 : vector<1x32x32xf32> to vector<32x32xf32>
    %cst_177 = arith.constant dense<0.000000e+00> : vector<64x32xf32>
    %123 = tpu.matmul %120, %122, %cst_177 {dimension_numbers = #tpu.dot_dimension_numbers<[1], [0], [0], [1], [0, 0, 1, 1], [], []>} : vector<64x32xf32>, vector<32x32xf32>, vector<64x32xf32> -> vector<64x32xf32>
    %124 = arith.addf %118, %123 : vector<64x32xf32>
    %c0_178 = arith.constant 0 : index
    %c1_179 = arith.constant 1 : index
    %c0_180 = arith.constant 0 : index
    %c0_181 = arith.constant 0 : index
    %125 = vector.load %arg16[%c0_178, %c1_179, %c0_180, %c0_181] : memref<1x10x10x32xf32, #tpu.memory_space<vmem>>, vector<1x8x8x32xf32>
    %126 = vector.shape_cast %125 : vector<1x8x8x32xf32> to vector<64x32xf32>
    %c3_182 = arith.constant 3 : index
    %c0_183 = arith.constant 0 : index
    %c0_184 = arith.constant 0 : index
    %127 = vector.load %arg8[%c3_182, %c0_183, %c0_184] : memref<9x32x32xf32, #tpu.memory_space<vmem>>, vector<1x32x32xf32>
    %128 = vector.shape_cast %127 : vector<1x32x32xf32> to vector<32x32xf32>
    %cst_185 = arith.constant dense<0.000000e+00> : vector<64x32xf32>
    %129 = tpu.matmul %126, %128, %cst_185 {dimension_numbers = #tpu.dot_dimension_numbers<[1], [0], [0], [1], [0, 0, 1, 1], [], []>} : vector<64x32xf32>, vector<32x32xf32>, vector<64x32xf32> -> vector<64x32xf32>
    %130 = arith.addf %124, %129 : vector<64x32xf32>
    %c0_186 = arith.constant 0 : index
    %c1_187 = arith.constant 1 : index
    %c1_188 = arith.constant 1 : index
    %c0_189 = arith.constant 0 : index
    %131 = vector.load %arg16[%c0_186, %c1_187, %c1_188, %c0_189] : memref<1x10x10x32xf32, #tpu.memory_space<vmem>>, vector<1x8x8x32xf32>
    %132 = vector.shape_cast %131 : vector<1x8x8x32xf32> to vector<64x32xf32>
    %c4_190 = arith.constant 4 : index
    %c0_191 = arith.constant 0 : index
    %c0_192 = arith.constant 0 : index
    %133 = vector.load %arg8[%c4_190, %c0_191, %c0_192] : memref<9x32x32xf32, #tpu.memory_space<vmem>>, vector<1x32x32xf32>
    %134 = vector.shape_cast %133 : vector<1x32x32xf32> to vector<32x32xf32>
    %cst_193 = arith.constant dense<0.000000e+00> : vector<64x32xf32>
    %135 = tpu.matmul %132, %134, %cst_193 {dimension_numbers = #tpu.dot_dimension_numbers<[1], [0], [0], [1], [0, 0, 1, 1], [], []>} : vector<64x32xf32>, vector<32x32xf32>, vector<64x32xf32> -> vector<64x32xf32>
    %136 = arith.addf %130, %135 : vector<64x32xf32>
    %c0_194 = arith.constant 0 : index
    %c1_195 = arith.constant 1 : index
    %c2_196 = arith.constant 2 : index
    %c0_197 = arith.constant 0 : index
    %137 = vector.load %arg16[%c0_194, %c1_195, %c2_196, %c0_197] : memref<1x10x10x32xf32, #tpu.memory_space<vmem>>, vector<1x8x8x32xf32>
    %138 = vector.shape_cast %137 : vector<1x8x8x32xf32> to vector<64x32xf32>
    %c5_198 = arith.constant 5 : index
    %c0_199 = arith.constant 0 : index
    %c0_200 = arith.constant 0 : index
    %139 = vector.load %arg8[%c5_198, %c0_199, %c0_200] : memref<9x32x32xf32, #tpu.memory_space<vmem>>, vector<1x32x32xf32>
    %140 = vector.shape_cast %139 : vector<1x32x32xf32> to vector<32x32xf32>
    %cst_201 = arith.constant dense<0.000000e+00> : vector<64x32xf32>
    %141 = tpu.matmul %138, %140, %cst_201 {dimension_numbers = #tpu.dot_dimension_numbers<[1], [0], [0], [1], [0, 0, 1, 1], [], []>} : vector<64x32xf32>, vector<32x32xf32>, vector<64x32xf32> -> vector<64x32xf32>
    %142 = arith.addf %136, %141 : vector<64x32xf32>
    %c0_202 = arith.constant 0 : index
    %c2_203 = arith.constant 2 : index
    %c0_204 = arith.constant 0 : index
    %c0_205 = arith.constant 0 : index
    %143 = vector.load %arg16[%c0_202, %c2_203, %c0_204, %c0_205] : memref<1x10x10x32xf32, #tpu.memory_space<vmem>>, vector<1x8x8x32xf32>
    %144 = vector.shape_cast %143 : vector<1x8x8x32xf32> to vector<64x32xf32>
    %c6_206 = arith.constant 6 : index
    %c0_207 = arith.constant 0 : index
    %c0_208 = arith.constant 0 : index
    %145 = vector.load %arg8[%c6_206, %c0_207, %c0_208] : memref<9x32x32xf32, #tpu.memory_space<vmem>>, vector<1x32x32xf32>
    %146 = vector.shape_cast %145 : vector<1x32x32xf32> to vector<32x32xf32>
    %cst_209 = arith.constant dense<0.000000e+00> : vector<64x32xf32>
    %147 = tpu.matmul %144, %146, %cst_209 {dimension_numbers = #tpu.dot_dimension_numbers<[1], [0], [0], [1], [0, 0, 1, 1], [], []>} : vector<64x32xf32>, vector<32x32xf32>, vector<64x32xf32> -> vector<64x32xf32>
    %148 = arith.addf %142, %147 : vector<64x32xf32>
    %c0_210 = arith.constant 0 : index
    %c2_211 = arith.constant 2 : index
    %c1_212 = arith.constant 1 : index
    %c0_213 = arith.constant 0 : index
    %149 = vector.load %arg16[%c0_210, %c2_211, %c1_212, %c0_213] : memref<1x10x10x32xf32, #tpu.memory_space<vmem>>, vector<1x8x8x32xf32>
    %150 = vector.shape_cast %149 : vector<1x8x8x32xf32> to vector<64x32xf32>
    %c7_214 = arith.constant 7 : index
    %c0_215 = arith.constant 0 : index
    %c0_216 = arith.constant 0 : index
    %151 = vector.load %arg8[%c7_214, %c0_215, %c0_216] : memref<9x32x32xf32, #tpu.memory_space<vmem>>, vector<1x32x32xf32>
    %152 = vector.shape_cast %151 : vector<1x32x32xf32> to vector<32x32xf32>
    %cst_217 = arith.constant dense<0.000000e+00> : vector<64x32xf32>
    %153 = tpu.matmul %150, %152, %cst_217 {dimension_numbers = #tpu.dot_dimension_numbers<[1], [0], [0], [1], [0, 0, 1, 1], [], []>} : vector<64x32xf32>, vector<32x32xf32>, vector<64x32xf32> -> vector<64x32xf32>
    %154 = arith.addf %148, %153 : vector<64x32xf32>
    %c0_218 = arith.constant 0 : index
    %c2_219 = arith.constant 2 : index
    %c2_220 = arith.constant 2 : index
    %c0_221 = arith.constant 0 : index
    %155 = vector.load %arg16[%c0_218, %c2_219, %c2_220, %c0_221] : memref<1x10x10x32xf32, #tpu.memory_space<vmem>>, vector<1x8x8x32xf32>
    %156 = vector.shape_cast %155 : vector<1x8x8x32xf32> to vector<64x32xf32>
    %c8_222 = arith.constant 8 : index
    %c0_223 = arith.constant 0 : index
    %c0_224 = arith.constant 0 : index
    %157 = vector.load %arg8[%c8_222, %c0_223, %c0_224] : memref<9x32x32xf32, #tpu.memory_space<vmem>>, vector<1x32x32xf32>
    %158 = vector.shape_cast %157 : vector<1x32x32xf32> to vector<32x32xf32>
    %cst_225 = arith.constant dense<0.000000e+00> : vector<64x32xf32>
    %159 = tpu.matmul %156, %158, %cst_225 {dimension_numbers = #tpu.dot_dimension_numbers<[1], [0], [0], [1], [0, 0, 1, 1], [], []>} : vector<64x32xf32>, vector<32x32xf32>, vector<64x32xf32> -> vector<64x32xf32>
    %160 = arith.addf %154, %159 : vector<64x32xf32>
    %cst_226 = arith.constant 0.000000e+00 : f32
    %161 = vector.broadcast %cst_226 : f32 to vector<64x32xf32>
    %162 = arith.cmpf oge, %160, %161 : vector<64x32xf32>
    %cst_227 = arith.constant 0.00999999977 : f32
    %163 = vector.broadcast %cst_227 : f32 to vector<64x32xf32>
    %164 = arith.mulf %163, %160 : vector<64x32xf32>
    %165 = arith.select %162, %160, %164 : vector<64x32xi1>, vector<64x32xf32>
    %166 = vector.shape_cast %165 : vector<64x32xf32> to vector<1x8x8x32xf32>
    %167 = vector.extract_strided_slice %166 {offsets = [0, 0, 0, 0], sizes = [1, 1, 8, 32], strides = [1, 1, 1, 1]} : vector<1x8x8x32xf32> to vector<1x1x8x32xf32>
    %168 = vector.extract_strided_slice %166 {offsets = [0, 0, 0, 0], sizes = [1, 7, 8, 32], strides = [1, 1, 1, 1]} : vector<1x8x8x32xf32> to vector<1x7x8x32xf32>
    %169 = tpu.concatenate %167, %168 in 1 : vector<1x1x8x32xf32>, vector<1x7x8x32xf32> -> vector<1x8x8x32xf32>
    %170 = vector.extract_strided_slice %166 {offsets = [0, 1, 0, 0], sizes = [1, 7, 8, 32], strides = [1, 1, 1, 1]} : vector<1x8x8x32xf32> to vector<1x7x8x32xf32>
    %171 = vector.extract_strided_slice %166 {offsets = [0, 7, 0, 0], sizes = [1, 1, 8, 32], strides = [1, 1, 1, 1]} : vector<1x8x8x32xf32> to vector<1x1x8x32xf32>
    %172 = tpu.concatenate %170, %171 in 1 : vector<1x7x8x32xf32>, vector<1x1x8x32xf32> -> vector<1x8x8x32xf32>
    %cst_228 = arith.constant 7.500000e-01 : f32
    %173 = vector.broadcast %cst_228 : f32 to vector<1x8x8x32xf32>
    %174 = arith.mulf %173, %166 : vector<1x8x8x32xf32>
    %cst_229 = arith.constant 2.500000e-01 : f32
    %175 = vector.broadcast %cst_229 : f32 to vector<1x8x8x32xf32>
    %176 = arith.mulf %175, %169 : vector<1x8x8x32xf32>
    %177 = arith.addf %174, %176 : vector<1x8x8x32xf32>
    %178 = vector.shape_cast %177 : vector<1x8x8x32xf32> to vector<8x8x32xf32>
    %cst_230 = arith.constant 7.500000e-01 : f32
    %179 = vector.broadcast %cst_230 : f32 to vector<1x8x8x32xf32>
    %180 = arith.mulf %179, %166 : vector<1x8x8x32xf32>
    %cst_231 = arith.constant 2.500000e-01 : f32
    %181 = vector.broadcast %cst_231 : f32 to vector<1x8x8x32xf32>
    %182 = arith.mulf %181, %172 : vector<1x8x8x32xf32>
    %183 = arith.addf %180, %182 : vector<1x8x8x32xf32>
    %184 = vector.shape_cast %183 : vector<1x8x8x32xf32> to vector<8x8x32xf32>
    %185 = vector.shape_cast %178 : vector<8x8x32xf32> to vector<8x1x8x32xf32>
    %186 = vector.shape_cast %184 : vector<8x8x32xf32> to vector<8x1x8x32xf32>
    %187 = tpu.concatenate %185, %186 in 1 : vector<8x1x8x32xf32>, vector<8x1x8x32xf32> -> vector<8x2x8x32xf32>
    %188 = vector.shape_cast %187 : vector<8x2x8x32xf32> to vector<16x8x32xf32>
    %189 = tpu.transpose %188, [0, 2, 1] : vector<16x8x32xf32> -> vector<16x32x8xf32>
    %190 = vector.shape_cast %189 : vector<16x32x8xf32> to vector<512x8xf32>
    %c0_232 = arith.constant 0 : index
    %c0_233 = arith.constant 0 : index
    %191 = vector.load %arg10[%c0_232, %c0_233] : memref<8x16xf32, #tpu.memory_space<vmem>>, vector<8x16xf32>
    %cst_234 = arith.constant dense<0.000000e+00> : vector<512x16xf32>
    %192 = tpu.matmul %190, %191, %cst_234 {dimension_numbers = #tpu.dot_dimension_numbers<[1], [0], [0], [1], [0, 0, 1, 1], [], []>} : vector<512x8xf32>, vector<8x16xf32>, vector<512x16xf32> -> vector<512x16xf32>
    %193 = vector.shape_cast %192 : vector<512x16xf32> to vector<16x32x16xf32>
    %194 = tpu.transpose %193, [0, 2, 1] : vector<16x32x16xf32> -> vector<16x16x32xf32>
    %195 = vector.shape_cast %194 : vector<16x16x32xf32> to vector<256x32xf32>
    %c0_235 = arith.constant 0 : index
    %c0_236 = arith.constant 0 : index
    %196 = vector.load %arg11[%c0_235, %c0_236] : memref<64x128xf32, #tpu.memory_space<vmem>>, vector<64x128xf32>
    %cst_237 = arith.constant dense<0.000000e+00> : vector<256x128xf32>
    %197 = tpu.matmul %84, %196, %cst_237 {dimension_numbers = #tpu.dot_dimension_numbers<[1], [0], [0], [1], [0, 0, 1, 1], [], []>} : vector<256x64xf32>, vector<64x128xf32>, vector<256x128xf32> -> vector<256x128xf32>
    %c0_238 = arith.constant 0 : index
    %c0_239 = arith.constant 0 : index
    %198 = vector.load %arg12[%c0_238, %c0_239] : memref<32x128xf32, #tpu.memory_space<vmem>>, vector<32x128xf32>
    %cst_240 = arith.constant dense<0.000000e+00> : vector<256x128xf32>
    %199 = tpu.matmul %195, %198, %cst_240 {dimension_numbers = #tpu.dot_dimension_numbers<[1], [0], [0], [1], [0, 0, 1, 1], [], []>} : vector<256x32xf32>, vector<32x128xf32>, vector<256x128xf32> -> vector<256x128xf32>
    %200 = arith.addf %197, %199 : vector<256x128xf32>
    %c0_241 = arith.constant 0 : index
    %c0_242 = arith.constant 0 : index
    %201 = vector.load %arg13[%c0_241, %c0_242] : memref<1x128xf32, #tpu.memory_space<vmem>>, vector<1x128xf32>
    %202 = vector.broadcast %201 : vector<1x128xf32> to vector<256x128xf32>
    %203 = arith.addf %200, %202 : vector<256x128xf32>
    %cst_243 = arith.constant 0.000000e+00 : f32
    %204 = vector.broadcast %cst_243 : f32 to vector<256x128xf32>
    %205 = arith.subf %204, %203 : vector<256x128xf32>
    %206 = math.exp %205 : vector<256x128xf32>
    %cst_244 = arith.constant 1.000000e+00 : f32
    %207 = vector.broadcast %cst_244 : f32 to vector<256x128xf32>
    %208 = arith.addf %207, %206 : vector<256x128xf32>
    %cst_245 = arith.constant 1.000000e+00 : f32
    %209 = vector.broadcast %cst_245 : f32 to vector<256x128xf32>
    %210 = arith.divf %209, %208 : vector<256x128xf32>
    %211 = arith.mulf %210, %1 : vector<256x128xf32>
    %212 = vector.shape_cast %211 : vector<256x128xf32> to vector<1x16x16x128xf32>
    %c0_246 = arith.constant 0 : index
    %c0_247 = arith.constant 0 : index
    %c0_248 = arith.constant 0 : index
    %c0_249 = arith.constant 0 : index
    %213 = vector.load %arg14[%c0_246, %c0_247, %c0_248, %c0_249] : memref<1x16x16x128xf32, #tpu.memory_space<vmem>>, vector<1x16x16x128xf32>
    tpu.vector_store %arg14[%c0_246, %c0_247, %c0_248, %c0_249], %212 {strides = array<i32>} : memref<1x16x16x128xf32, #tpu.memory_space<vmem>>, vector<1x16x16x128xf32>,
    return
  }
  func.func @transform_0(%arg0: i32) -> (i32, i32, i32, i32) {
    %c0_i32 = arith.constant 0 : i32
    %c0_i32_0 = arith.constant 0 : i32
    %c0_i32_1 = arith.constant 0 : i32
    %c0_i32_2 = arith.constant 0 : i32
    return %arg0, %c0_i32, %c0_i32_0, %c0_i32_1 : i32, i32, i32, i32
  }
  func.func @transform_1(%arg0: i32) -> (i32, i32) {
    %c0_i32 = arith.constant 0 : i32
    %c0_i32_0 = arith.constant 0 : i32
    %c0_i32_1 = arith.constant 0 : i32
    return %c0_i32, %c0_i32_0 : i32, i32
  }
  func.func @transform_2(%arg0: i32) -> (i32, i32) {
    %c0_i32 = arith.constant 0 : i32
    %c0_i32_0 = arith.constant 0 : i32
    %c0_i32_1 = arith.constant 0 : i32
    return %c0_i32, %c0_i32_0 : i32, i32
  }
  func.func @transform_3(%arg0: i32) -> (i32, i32) {
    %c0_i32 = arith.constant 0 : i32
    %c0_i32_0 = arith.constant 0 : i32
    %c0_i32_1 = arith.constant 0 : i32
    return %c0_i32, %c0_i32_0 : i32, i32
  }
  func.func @transform_4(%arg0: i32) -> (i32, i32) {
    %c0_i32 = arith.constant 0 : i32
    %c0_i32_0 = arith.constant 0 : i32
    %c0_i32_1 = arith.constant 0 : i32
    return %c0_i32, %c0_i32_0 : i32, i32
  }
  func.func @transform_5(%arg0: i32) -> (i32, i32, i32) {
    %c0_i32 = arith.constant 0 : i32
    %c0_i32_0 = arith.constant 0 : i32
    %c0_i32_1 = arith.constant 0 : i32
    %c0_i32_2 = arith.constant 0 : i32
    return %c0_i32, %c0_i32_0, %c0_i32_1 : i32, i32, i32
  }
  func.func @transform_6(%arg0: i32) -> (i32, i32) {
    %c0_i32 = arith.constant 0 : i32
    %c0_i32_0 = arith.constant 0 : i32
    %c0_i32_1 = arith.constant 0 : i32
    return %c0_i32, %c0_i32_0 : i32, i32
  }
  func.func @transform_7(%arg0: i32) -> (i32, i32, i32) {
    %c0_i32 = arith.constant 0 : i32
    %c0_i32_0 = arith.constant 0 : i32
    %c0_i32_1 = arith.constant 0 : i32
    %c0_i32_2 = arith.constant 0 : i32
    return %c0_i32, %c0_i32_0, %c0_i32_1 : i32, i32, i32
  }
  func.func @transform_8(%arg0: i32) -> (i32, i32) {
    %c0_i32 = arith.constant 0 : i32
    %c0_i32_0 = arith.constant 0 : i32
    %c0_i32_1 = arith.constant 0 : i32
    return %c0_i32, %c0_i32_0 : i32, i32
  }
  func.func @transform_9(%arg0: i32) -> (i32, i32) {
    %c0_i32 = arith.constant 0 : i32
    %c0_i32_0 = arith.constant 0 : i32
    %c0_i32_1 = arith.constant 0 : i32
    return %c0_i32, %c0_i32_0 : i32, i32
  }
  func.func @transform_10(%arg0: i32) -> (i32, i32) {
    %c0_i32 = arith.constant 0 : i32
    %c0_i32_0 = arith.constant 0 : i32
    %c0_i32_1 = arith.constant 0 : i32
    return %c0_i32, %c0_i32_0 : i32, i32
  }
  func.func @transform_11(%arg0: i32) -> (i32, i32) {
    %c0_i32 = arith.constant 0 : i32
    %c0_i32_0 = arith.constant 0 : i32
    %c0_i32_1 = arith.constant 0 : i32
    return %c0_i32, %c0_i32_0 : i32, i32
  }
  func.func @transform_12(%arg0: i32) -> (i32, i32) {
    %c0_i32 = arith.constant 0 : i32
    %c0_i32_0 = arith.constant 0 : i32
    %c0_i32_1 = arith.constant 0 : i32
    return %c0_i32, %c0_i32_0 : i32, i32
  }
  func.func @transform_13(%arg0: i32) -> (i32, i32, i32, i32) {
    %c0_i32 = arith.constant 0 : i32
    %c0_i32_0 = arith.constant 0 : i32
    %c0_i32_1 = arith.constant 0 : i32
    %c0_i32_2 = arith.constant 0 : i32
    return %arg0, %c0_i32, %c0_i32_0, %c0_i32_1 : i32, i32, i32, i32
  }
}

</mosaic_0001>

<bundles_post_ra>
// kernel: tpu_custom_call.1
= control target key start
LH: loop header
LB: loop body
LE: loop exit
PB: predicated region body
PF: predicated region fallthrough
CT: control target
= control target key end

     0   :  { %s14793_s0 = inlined_call_operand.hbm [shape: f32[2,16,16,128], index: 0, kind: input, shape index: {}]   ;;  %s14794_s1 = inlined_call_operand.vmem [shape: f32[128,64], index: 1, kind: input, shape index: {}]   ;;  %s14795_s2 = inlined_call_operand.vmem [shape: f32[1,64], index: 2, kind: input, shape index: {}]   ;;  %s14796_s3 = inlined_call_operand.vmem [shape: f32[128,32], index: 3, kind: input, shape index: {}]   ;;  %s14797_s4 = inlined_call_operand.vmem [shape: f32[1,32], index: 4, kind: input, shape index: {}]   ;;  %s14798_s5 = inlined_call_operand.hbm [shape: f32[9,64,64], index: 5, kind: input, shape index: {}]   ;;  %s14799_s6 = inlined_call_operand.vmem [shape: f32[1,64], index: 6, kind: input, shape index: {}]   ;;  %s14800_s7 = inlined_call_operand.vmem [shape: f32[9,32,32], index: 7, kind: input, shape index: {}]   ;;  %s14801_s8 = inlined_call_operand.vmem [shape: f32[1,32], index: 8, kind: input, shape index: {}]   ;;  %s14802_s9 = inlined_call_operand.hbm [shape: f32[8,16], index: 9, kind: input, shape index: {}]   ;;  %s14803_s10 = inlined_call_operand.vmem [shape: f32[64,128], index: 10, kind: input, shape index: {}]   ;;  %s14804_s11 = inlined_call_operand.vmem [shape: f32[32,128], index: 11, kind: input, shape index: {}]   ;;  %s14805_s12 = inlined_call_operand.vmem [shape: f32[1,128], index: 12, kind: input, shape index: {}]   ;;  %s14806_s13 = inlined_call_operand.hbm [shape: f32[2,16,16,128], index: 13, kind: output, shape index: {}]  }
   0x1   :  { %14848 = sst [smem:[#allocation58_spill]] %s14803_s10 }
   0x2   :  { %14849 = sst [smem:[#allocation59_spill]] %s14805_s12 }
   0x3   :  { %14850 = sst [smem:[#allocation60_spill]] %s14806_s13 }
   0x4   :  { %18 = vsyncpa [#allocation7], 0 }
   0x5   :  { %20 = vsyncpa [#allocation7 + $0x1], 0 }
   0x6   :  { %21 = vsyncpa [#allocation10], 0 }
   0x7   :  { %22 = vsyncpa [#allocation8], 0 }
   0x8   :  { %24 = vsyncpa [#allocation8 + $0x1], 0  ;;  %s12545_s25 = smov 0   ;;  %s12547_s26 = smov 0  }
   0x9   :  { %s12549_s27 = smov 0   ;;  %s12551_s28 = smov 0  }
   0xa LB: > { %14851 = sst [smem:[#allocation16_spill]] %s12452_s25  ;;  %s12566_s29 = sadd.s32 4294967295, %s12464_s28   ;;  %s12464_s28 = sphi %s12551_s28, %s14956_s28   ;;  %s12460_s27 = sphi %s12549_s27, %s14955_s27   ;;  %s12456_s26 = sphi %s12547_s26, %s14954_s26   ;;  %s12452_s25 = sphi %s12545_s25, %s14953_s25  }
   0xb   : > { %s8988_s30 = sadd.s32 4294967294, %s12464_s28   ;;  %p50_p0 = scmp.ne.s32.totalorder %s12456_s26, %s12452_s25 }
   0xc   : > { %p14809_p1 = scmp.eq.s32.totalorder %s12566_s29, 0  ;;  %p332_p3 = scmp.eq.s32.totalorder %s8988_s30, 1 }
   0xd   : > { %p8989_p5 = scmp.ge.s32.totalorder %s12464_s28, 1  ;;  %p339_p7 = scmp.lt.s32.totalorder %s12464_s28, 3 }
   0xe   : > { %p12575_p4 = por %p14809_p1, %p50_p0  ;;  %p12580_p6 = por %p332_p3, %p50_p0 }
   0xf   : > { %p12585_p8 = pnand %p8989_p5, %p339_p7  ;;  %s12466_s17 = smov [#allocation9]  }
  0x10   : > { %s14852_s14 = scalar_select %p12575_p4, 1, 0 }
  0x11   : > { %s14853_s15 = scalar_select %p12580_p6, 1, 0 }
  0x12   : > { %s363_s18 = sshll.u32 %s12466_s17, 4  ;;  %p12088_p9 = pneg %p12585_p8  ;;  %s12589_s18 = int_to_ptr.vmem [resolvable:$true] %s363_s18 }
  0x13   : > { %14854 = sst [smem:[#allocation17_spill]] %s14853_s15  ;;  %s12467_s20 = smov [#allocation11]  }
  0x14   : > { %p12596_p11 = pnand %p12088_p9, %p14809_p1  ;;  %s386_s21 = sshll.u32 %s12467_s20, 4  ;;  %s12600_s21 = int_to_ptr.vmem [resolvable:$true] %s386_s21 }
  0x15   : > { %s12308_s24 = scalar_lea.hbm %s14798_s5, 9216 }
  0x16   : > { %p12309_p12 = scmp.ne.s32.totalorder %s14798_s5, %s12308_s24  ;;  %p12310_p13 = pneg %p12596_p11 }
  0x17   : > { %p12315_p5 = scmp.lt.u32.totalorder %s12308_s24, %s14798_s5 }
  0x18   : > { %p12311_p0 = pnand %p12310_p13, %p12309_p12 }
  0x1a   : > { %p12312_p3 = pneg %p12311_p0 }
  0x1c   : > { %p12317_p7 = pnand %p12315_p5, %p12312_p3 }
  0x1e   : > { %12320 = shalt.err (!%p12317_p7)
}
  0x1f   : > { %s12321_s20 = scalar_lea.vmem %s12589_s18, 9216  ;;  %p12329_p2 = scmp.lt.s32.totalorder %s12589_s18, %s12589_s18 }
  0x20   : > { %p12322_p9 = scmp.ne.s32.totalorder %s12589_s18, %s12321_s20  ;;  %p12330_p12 = scmp.lt.s32.totalorder %s12321_s20, %s12321_s20 }
  0x22   : > { %p12324_p10 = pnand %p12322_p9, %p12310_p13  ;;  %p12331_p0 = por %p12330_p12, %p12329_p2 }
  0x24   : > { %p12325_p1 = pneg %p12324_p10 }
  0x26   : > { %p12332_p6 = pnand %p12331_p0, %p12325_p1 }
  0x28   : > { %12335 = shalt.err (!%p12332_p6)
}
  0x29   : > { %s14812_s25 = smov 128   ;;  %s14813_s15 = smov 8  }
  0x2a   : > { %12091 = dma.hbm_to_vmem [thread:$0]  (!%p12596_p11), %s14798_s5, 9216, %s12589_s18, [#allocation10], %s14812_s25, %s14812_s25, %s14813_s15  }
  0x2b   : > { %s12336_s17 = scalar_lea.hbm %s14802_s9, 128 }
  0x2c   : > { %p12337_p1 = scmp.ne.s32.totalorder %s14802_s9, %s12336_s17  ;;  %p12343_p10 = scmp.lt.u32.totalorder %s12336_s17, %s14802_s9 }
  0x2e   : > { %p12339_p2 = pnand %p12337_p1, %p12310_p13 }
  0x30   : > { %p12340_p6 = pneg %p12339_p2 }
  0x32   : > { %p12345_p3 = pnand %p12343_p10, %p12340_p6 }
  0x34   : > { %12348 = shalt.err (!%p12345_p3)
}
  0x35   : > { %s12349_s18 = scalar_lea.vmem %s12600_s21, 128  ;;  %p12357_p12 = scmp.lt.s32.totalorder %s12600_s21, %s12600_s21 }
  0x36   : > { %p12350_p5 = scmp.ne.s32.totalorder %s12600_s21, %s12349_s18  ;;  %p12358_p0 = scmp.lt.s32.totalorder %s12349_s18, %s12349_s18 }
  0x38   : > { %p12352_p7 = pnand %p12350_p5, %p12310_p13  ;;  %p12359_p1 = por %p12358_p0, %p12357_p12 }
  0x3a   : > { %p12353_p9 = pneg %p12352_p7 }
  0x3c   : > { %p12360_p2 = pnand %p12359_p1, %p12353_p9 }
  0x3e   : > { %12363 = shalt.err (!%p12360_p2)
}
  0x3f   : > { %12094 = dma.hbm_to_vmem [thread:$0]  (!%p12596_p11), %s14802_s9, 128, %s12600_s21, [#allocation10]  }
  0x40   : > { %s12658_s13 = sadd.s32 1, %s12464_s28   ;;  %s37_s19 = sadd.s32 1, %s12460_s27 }
  0x41   : > { %s34_s22 = ssub.s32 %s12464_s28, %s12658_s13  ;;  %p44_p13 = scmp.ne.s32.totalorder %s12460_s27, %s12456_s26 }
  0x42   : > { %p35_p6 = scmp.eq.s32.totalorder %s34_s22, 0  ;;  %p45_p10 = scmp.eq.s32.totalorder %s12464_s28, 0 }
  0x43   : > { %p14857_p3 = scmp.eq.s32.totalorder %s12566_s29, 1  ;;  %p12105_p7 = scmp.lt.s32.totalorder %s12464_s28, 2 }
  0x44   : > { %s12674_s24 = scalar_select %p35_p6, %s12460_s27, %s37_s19  }
  0x45   : > { %p12668_p5 = por %p14857_p3, %p44_p13  ;;  %p46_p9 = por %p45_p10, %p44_p13 }
  0x46   : > { %s406_s30 = sand.u32 1, %s12460_s27   ;;  %s9531_s21 = sshll.u32 %s12464_s28, 12 }
  0x47   : > { %s14858_s23 = scalar_select %p12668_p5, 1, 0 }
  0x48   : > { %s8993_s17 = sshll.u32 %s406_s30, 8  ;;  %s12681_s10 = scalar_lea.hbm %s14793_s0, %s9531_s21 }
  0x49   : > { %s410_s12 = scalar_lea.vmem [#allocation6], %s8993_s17  ;;  %p12685_p11 = pnand %p12105_p7, %p46_p9 }
  0x4a   : > { %s417_s22 = sshll.u32 %s410_s12, 4  ;;  %s12689_s25 = scalar_lea.sflag [#allocation7], %s406_s30  ;;  %s12683_s22 = int_to_ptr.vmem [resolvable:$true] %s417_s22 }
  0x4b   : > { %s12364_s15 = scalar_lea.hbm %s12681_s10, 4096  ;;  %p12366_p0 = pneg %p12685_p11 }
  0x4c   : > { %p12365_p12 = scmp.ne.s32.totalorder %s12681_s10, %s12364_s15  ;;  %s12369_s20 = scalar_lea.hbm %s14793_s0, 8192 }
  0x4d   : > { %p12370_p13 = scmp.lt.u32.totalorder %s12681_s10, %s14793_s0  ;;  %p12371_p6 = scmp.lt.u32.totalorder %s12369_s20, %s12364_s15 }
  0x4e   : > { %p12367_p1 = pnand %p12366_p0, %p12365_p12  ;;  %p12373_p3 = scmp.lt.u32.totalorder %s12364_s15, %s12681_s10 }
  0x4f   : > { %p12372_p10 = por %p12371_p6, %p12370_p13 }
  0x50   : > { %p12368_p2 = pneg %p12367_p1 }
  0x51   : > { %p12374_p7 = por %p12373_p3, %p12372_p10 }
  0x53   : > { %p12375_p9 = pnand %p12374_p7, %p12368_p2 }
  0x55   : > { %12378 = shalt.err (!%p12375_p9)
}
  0x56   : > { %s12379_s30 = scalar_lea.vmem %s12683_s22, 4096  ;;  %s12470_s17 = smov [#allocation6]  }
  0x57   : > { %p12380_p12 = scmp.ne.s32.totalorder %s12683_s22, %s12379_s30  ;;  %s12384_s21 = sshll.u32 %s12470_s17, 4  ;;  %s12385_s21 = int_to_ptr.vmem [resolvable:$false] %s12384_s21 }
  0x58   : > { %s12386_s18 = scalar_lea.vmem %s12385_s21, 8192  ;;  %p12387_p4 = scmp.lt.s32.totalorder %s12683_s22, %s12385_s21 }
  0x59   : > { %p12382_p1 = pnand %p12380_p12, %p12366_p0  ;;  %p12388_p13 = scmp.lt.s32.totalorder %s12386_s18, %s12379_s30 }
  0x5b   : > { %p12383_p5 = pneg %p12382_p1  ;;  %p12389_p6 = por %p12388_p13, %p12387_p4 }
  0x5d   : > { %p12390_p10 = pnand %p12389_p6, %p12383_p5 }
  0x5f   : > { %12393 = shalt.err (!%p12390_p10)
}
  0x60   : > { %s14860_s15 = smov 8   ;;  %s14861_s20 = smov 128  }
  0x61   : > { %12098 = dma.hbm_to_vmem [thread:$0]  (!%p12685_p11), %s12681_s10, 4096, %s12683_s22, %s12689_s25, %s14861_s20, %s14861_s20, %s14860_s15  }
  0x62   : > { %429 = sbr.rel (%p12585_p8) target bundleno = 1782 (0x6f6), region = 72 }
  0x69   : > { %s12723_s12 = sand.u32 1, %s12456_s26   ;;  %p14862_p4 = scmp.ne.s32.totalorder %s14852_s14, 0 }
  0x6a   : > { %s8997_s30 = sshll.u32 %s12723_s12, 8  ;;  %s432_s17 = scalar_lea.sflag [#allocation7], %s12723_s12 }
  0x6b   : > { %s12729_s19 = scalar_lea.vmem [#allocation6], %s8997_s30 }
  0x6c   : > { %12439 = dma.done.wait (%p14862_p4), %s432_s17, 4096  }
  0x6d   : > { %12441 = vsyncadd (%p14862_p4), %s432_s17, 4294963200  ;;  %p14863_p5 = scmp.eq.s32.totalorder %s12566_s29, 0 }
  0x6f   : > { %12443 = dma.done.wait (%p14863_p5), [#allocation10], 9344   ;;  %p14864_p8 = pmov %p14863_p5 }
  0x70   : > { %v518_v0 = vld [vmem:[%s14794_s1] sm:$0xff]  ;;  %v519_v1 = vld [vmem:[%s14794_s1 + $0x8] sm:$0xff]  ;;  %v520_v2 = vld [vmem:[%s14794_s1 + $0x10] sm:$0xff]  ;;  %vm1014_vm0 = vcmask 523264   ;;  %vm1023_vm1 = vcmask 516096   ;;  %vm1017_vm2 = vcmask 517120  }
  0x71   : > { %12445 = vsyncadd (%p14864_p8), [#allocation10], 4294957952  ;;  %v11372_v3 = vpack.c.bf16 %v519_v1, %v518_v0  ;;  %v521_v4 = vld [vmem:[%s14794_s1 + $0x18] sm:$0xff]  ;;  %v522_v6 = vld [vmem:[%s14794_s1 + $0x20] sm:$0xff]  ;;  %vm4743_vm3 = vcmask 261120   ;;  %vm4886_vm4 = vcmask 253952  }
  0x72   : > { %v11376_v5 = vpack.c.bf16 %v521_v4, %v520_v2  ;;  %v523_v7 = vld [vmem:[%s14794_s1 + $0x28] sm:$0xff]  ;;  %v12758_v9 = vld [vmem:[%s12729_s19] sm:$0xff]  ;;  %v525_v11 = vld [vmem:[%s14794_s1 + $0x38] sm:$0xff]  ;;  %vm4881_vm5 = vcmask 254976   ;;  %vm6843_vm14 = vcmask 64512   ;;  %s14945_s21 = sld [smem:[#allocation58_spill]] }
  0x73   : > { %11373 = vmatprep.subr.bf16.mxu1 %v11372_v3  ;;  %v11380_v8 = vpack.c.bf16 %v523_v7, %v522_v6  ;;  %v524_v10 = vld [vmem:[%s14794_s1 + $0x30] sm:$0xff]  ;;  %10270 = vmatprep.mubr.f32.mxu1 %v12758_v9  ;;  %v526_v13 = vld [vmem:[%s14794_s1 + $0x40] sm:$0xff]  ;;  %v527_v14 = vld [vmem:[%s14794_s1 + $0x48] sm:$0xff]  ;;  %s14946_s10 = sld [smem:[#allocation59_spill]]  ;;  %s14662_s22 = scalar_lea.vmem [#allocation12], %s8997_s30 }
  0x74   : > { %11375 = vmatpush3.bf16.msra.mxu1 %v11372_v3  ;;  %v11384_v12 = vpack.c.bf16 %v525_v11, %v524_v10  ;;  %v11388_v15 = vpack.c.bf16 %v527_v14, %v526_v13  ;;  %v528_v16 = vld [vmem:[%s14794_s1 + $0x50] sm:$0xff]  ;;  %v529_v17 = vld [vmem:[%s14794_s1 + $0x58] sm:$0xff]  ;;  %v530_v19 = vld [vmem:[%s14794_s1 + $0x60] sm:$0xff]  ;;  %s9532_s30 = sshll.u32 %s12566_s29, 12  ;;  %s8896_s18 = sshll.u32 %s14662_s22, 4  ;;  %s14747_s18 = int_to_ptr.vmem [resolvable:$true] %s8896_s18 }
  0x75   : > { %11377 = vmatprep.subr.bf16.mxu1 %v11376_v5  ;;  %v11392_v18 = vpack.c.bf16 %v529_v17, %v528_v16  ;;  %v531_v20 = vld [vmem:[%s14794_s1 + $0x68] sm:$0xff]  ;;  %v532_v22 = vld [vmem:[%s14794_s1 + $0x70] sm:$0xff]  ;;  %v533_v23 = vld [vmem:[%s14794_s1 + $0x78] sm:$0xff]  ;;  %s14947_s20 = sld [smem:[#allocation60_spill]]  ;;  %s8883_s29 = scalar_lea.sflag [#allocation8], %s12723_s12 }
  0x76   : > { %v11396_v21 = vpack.c.bf16 %v531_v20, %v530_v19  ;;  %v11400_v24 = vpack.c.bf16 %v533_v23, %v532_v22  ;;  %v766_v25 = vld [vmem:[%s14796_s3] sm:$0xff]  ;;  %v767_v26 = vld [vmem:[%s14796_s3 + $0x8] sm:$0xff]  ;;  %v768_v28 = vld [vmem:[%s14796_s3 + $0x10] sm:$0xff]  ;;  %s12394_s16 = scalar_lea.vmem %s14747_s18, 4096  ;;  %p14948_p0 = scmp.ne.s32.totalorder %s14858_s23, 0 }
  0x77   : > { %v11404_v27 = vpack.c.bf16 %v767_v26, %v766_v25  ;;  %v769_v29 = vld [vmem:[%s14796_s3 + $0x18] sm:$0xff]  ;;  %v1133_v30 = vld [vmem:[#allocation9] sm:$0xff]  ;;  %v1135_v32 = vld [vmem:[#allocation9 + $0x10] sm:$0xff]  ;;  %v12471_v25 = vmov 0.0   ;;  %p12395_p11 = scmp.ne.s32.totalorder %s14747_s18, %s12394_s16  ;;  %s12472_s25 = smov [#allocation12]  }
  0x78   : > { %11379 = vmatpush3.bf16.msra.mxu1 %v11376_v5  ;;  %v1134_v31 = vld [vmem:[#allocation9 + $0x8] sm:$0xff]  ;;  %v1136_v35 = vld [vmem:[#allocation9 + $0x18] sm:$0xff]  ;;  %v12809_v36 = vld [vmem:[%s12729_s19 + $0x10] sm:$0xff]  ;;  %v11408_v37 = vpack.c.bf16 %v769_v29, %v768_v28  ;;  %1015 = vst.msk [vmem:[#allocation2] sm:$0xff] %vm1014_vm0, %v12471_v25 }
  0x79   : > { %11381 = vmatprep.subr.bf16.mxu1 %v11380_v8  ;;  %v12804_v33 = vld [vmem:[%s12729_s19 + $0x8] sm:$0xff]  ;;  %v12806_v34 = vpack.c.bf16 %v1134_v31, %v1133_v30  ;;  %v12811_v38 = vpack.c.bf16 %v1136_v35, %v1135_v32  ;;  %v770_v39 = vld [vmem:[%s14796_s3 + $0x20] sm:$0xff]  ;;  %v771_v40 = vld [vmem:[%s14796_s3 + $0x28] sm:$0xff]  ;;  %1016 = vst.msk [vmem:[#allocation2 + $0x8] sm:$0xff] %vm1014_vm0, %v12471_v25  ;;  %p12396_p2 = pnand %p12395_p11, %p14948_p0 }
  0x7a   : > { %v12824_v41 = vld [vmem:[%s12729_s19 + $0x18] sm:$0xff]  ;;  %v12827_v42 = vld [vmem:[%s12729_s19 + $0x20] sm:$0xff]  ;;  %v11412_v43 = vpack.c.bf16 %v771_v40, %v770_v39  ;;  %v773_v45 = vld [vmem:[%s14796_s3 + $0x38] sm:$0xff]  ;;  %1020 = vst.msk [vmem:[#allocation2 + $0x198] sm:$0xff] %vm1014_vm0, %v12471_v25 }
  0x7b   : > { %11437 = vmatprep.subr.bf16.mxu0 %v12806_v34  ;;  %v772_v44 = vld [vmem:[%s14796_s3 + $0x30] sm:$0xff]  ;;  %v12840_v46 = vld [vmem:[%s12729_s19 + $0x28] sm:$0xff]  ;;  %v12843_v47 = vld [vmem:[%s12729_s19 + $0x30] sm:$0xff]  ;;  %1021 = vst.msk [vmem:[#allocation2 + $0x1a0] sm:$0xff] %vm1014_vm0, %v12471_v25  ;;  %s14745_s17 = scalar_lea.hbm %s14947_s20, %s9532_s30  ;;  %p12397_p3 = pneg %p12396_p2 }
  0x7c   : > { %11383 = vmatpush3.bf16.msra.mxu1 %v11380_v8  ;;  %11439 = vmatpush3.bf16.msra.mxu0 %v12806_v34  ;;  %v11416_v48 = vpack.c.bf16 %v773_v45, %v772_v44  ;;  %v774_v49 = vld [vmem:[%s14796_s3 + $0x40] sm:$0xff]  ;;  %v775_v50 = vld [vmem:[%s14796_s3 + $0x48] sm:$0xff]  ;;  %v12857_v52 = vld [vmem:[%s12729_s19 + $0x40] sm:$0xff]  ;;  %1024 = vst.msk [vmem:[#allocation2] sm:$0x1] %vm1023_vm1, %v12471_v25 }
  0x7d   : > { %11385 = vmatprep.subr.bf16.mxu1 %v11384_v12  ;;  %11441 = vmatprep.subr.bf16.mxu0 %v12811_v38  ;;  %v12854_v51 = vld [vmem:[%s12729_s19 + $0x38] sm:$0xff]  ;;  %v11420_v53 = vpack.c.bf16 %v775_v50, %v774_v49  ;;  %v776_v54 = vld [vmem:[%s14796_s3 + $0x50] sm:$0xff]  ;;  %v777_v55 = vld [vmem:[%s14796_s3 + $0x58] sm:$0xff]  ;;  %1025 = vst.msk [vmem:[#allocation2 + $0x18] sm:$0x1] %vm1023_vm1, %v12471_v25 }
  0x7e   : > { %v12868_v56 = vld [vmem:[%s12729_s19 + $0x48] sm:$0xff]  ;;  %v12871_v57 = vld [vmem:[%s12729_s19 + $0x50] sm:$0xff]  ;;  %v11424_v58 = vpack.c.bf16 %v777_v55, %v776_v54  ;;  %v779_v60 = vld [vmem:[%s14796_s3 + $0x68] sm:$0xff]  ;;  %1026 = vst.msk [vmem:[#allocation2 + $0x30] sm:$0x1] %vm1023_vm1, %v12471_v25 }
  0x7f   : > { %v778_v59 = vld [vmem:[%s14796_s3 + $0x60] sm:$0xff]  ;;  %v12882_v61 = vld [vmem:[%s12729_s19 + $0x58] sm:$0xff]  ;;  %v12885_v62 = vld [vmem:[%s12729_s19 + $0x60] sm:$0xff]  ;;  %1027 = vst.msk [vmem:[#allocation2 + $0x48] sm:$0x1] %vm1023_vm1, %v12471_v25 }
  0x80   : > { %11387 = vmatpush3.bf16.msra.mxu1 %v11384_v12  ;;  %11443 = vmatpush3.bf16.msra.mxu0 %v12811_v38  ;;  %v11428_v63 = vpack.c.bf16 %v779_v60, %v778_v59  ;;  %v780_v0 = vld [vmem:[%s14796_s3 + $0x70] sm:$0xff]  ;;  %v781_v1 = vld [vmem:[%s14796_s3 + $0x78] sm:$0xff]  ;;  %v12899_v3 = vld [vmem:[%s12729_s19 + $0x70] sm:$0xff]  ;;  %1028 = vst.msk [vmem:[#allocation2 + $0x60] sm:$0x1] %vm1023_vm1, %v12471_v25 }
  0x81   : > { %11389 = vmatprep.subr.bf16.mxu1 %v11388_v15  ;;  %v12896_v2 = vld [vmem:[%s12729_s19 + $0x68] sm:$0xff]  ;;  %v11432_v4 = vpack.c.bf16 %v781_v1, %v780_v0  ;;  %v12904_v5 = vld [vmem:[%s12729_s19 + $0x78] sm:$0xff]  ;;  %v12907_v6 = vld [vmem:[%s12729_s19 + $0x80] sm:$0xff]  ;;  %1029 = vst.msk [vmem:[#allocation2 + $0x78] sm:$0x1] %vm1023_vm1, %v12471_v25 }
  0x82   : > { %v12912_v7 = vld [vmem:[%s12729_s19 + $0x88] sm:$0xff]  ;;  %v12915_v8 = vld [vmem:[%s12729_s19 + $0x90] sm:$0xff]  ;;  %v12921_v10 = vld [vmem:[%s12729_s19 + $0x98] sm:$0xff]  ;;  %1030 = vst.msk [vmem:[#allocation2 + $0x90] sm:$0x1] %vm1023_vm1, %v12471_v25 }
  0x83   : > { %v12924_v11 = vld [vmem:[%s12729_s19 + $0xa0] sm:$0xff]  ;;  %v12929_v12 = vld [vmem:[%s12729_s19 + $0xa8] sm:$0xff]  ;;  %v12932_v13 = vld [vmem:[%s12729_s19 + $0xb0] sm:$0xff]  ;;  %1031 = vst.msk [vmem:[#allocation2 + $0xa8] sm:$0x1] %vm1023_vm1, %v12471_v25 }
  0x84   : > { %11391 = vmatpush3.bf16.msra.mxu1 %v11388_v15  ;;  %v12937_v14 = vld [vmem:[%s12729_s19 + $0xb8] sm:$0xff]  ;;  %v12940_v15 = vld [vmem:[%s12729_s19 + $0xc0] sm:$0xff]  ;;  %v12945_v16 = vld [vmem:[%s12729_s19 + $0xc8] sm:$0xff]  ;;  %1032 = vst.msk [vmem:[#allocation2 + $0xc0] sm:$0x1] %vm1023_vm1, %v12471_v25 }
  0x85   : > { %11393 = vmatprep.subr.bf16.mxu1 %v11392_v18  ;;  %v12948_v17 = vld [vmem:[%s12729_s19 + $0xd0] sm:$0xff]  ;;  %v12956_v19 = vld [vmem:[%s12729_s19 + $0xe0] sm:$0xff]  ;;  %v12961_v20 = vld [vmem:[%s12729_s19 + $0xe8] sm:$0xff]  ;;  %1033 = vst.msk [vmem:[#allocation2 + $0xd8] sm:$0x1] %vm1023_vm1, %v12471_v25 }
  0x86   : > { %v12969_v22 = vld [vmem:[%s12729_s19 + $0xf8] sm:$0xff]  ;;  %v1138_v23 = vld [vmem:[#allocation9 + $0x28] sm:$0xff]  ;;  %1034 = vst.msk [vmem:[#allocation2 + $0xf0] sm:$0x1] %vm1023_vm1, %v12471_v25  ;;  %1035 = vst.msk [vmem:[#allocation2 + $0x108] sm:$0x1] %vm1023_vm1, %v12471_v25 }
  0x87   : > { %1036 = vst.msk [vmem:[#allocation2 + $0x120] sm:$0x1] %vm1023_vm1, %v12471_v25  ;;  %1037 = vst.msk [vmem:[#allocation2 + $0x138] sm:$0x1] %vm1023_vm1, %v12471_v25  ;;  %v1139_v26 = vld [vmem:[#allocation9 + $0x30] sm:$0xff]  ;;  %v1102_v30 = vld [vmem:[#allocation2 + $0x8] sm:$0xff] }
  0x88   : > { %11395 = vmatpush3.bf16.msra.mxu1 %v11392_v18  ;;  %v12953_v18 = vld [vmem:[%s12729_s19 + $0xd8] sm:$0xff]  ;;  %1038 = vst.msk [vmem:[#allocation2 + $0x150] sm:$0x1] %vm1023_vm1, %v12471_v25  ;;  %1039 = vst.msk [vmem:[#allocation2 + $0x168] sm:$0x1] %vm1023_vm1, %v12471_v25  ;;  %v1101_v29 = vld [vmem:[#allocation2] sm:$0xff] }
  0x89   : > { %11397 = vmatprep.subr.bf16.mxu1 %v11396_v21  ;;  %1040 = vst.msk [vmem:[#allocation2 + $0x180] sm:$0x1] %vm1023_vm1, %v12471_v25  ;;  %1043 = vst.msk [vmem:[#allocation2 + $0x29] sm:$0x1] %vm1023_vm1, %v12471_v25  ;;  %10414 = vmatprep.mubr.msk.f32.mxu0 %vm1014_vm0, %v1101_v29  ;;  %v1527_v31 = vld [vmem:[#allocation9 + $0x40] sm:$0xff]  ;;  %v1528_v32 = vld [vmem:[#allocation9 + $0x48] sm:$0xff] }
  0x8a   : > { %1044 = vst.msk [vmem:[#allocation2 + $0x41] sm:$0x1] %vm1023_vm1, %v12471_v25  ;;  %1045 = vst.msk [vmem:[#allocation2 + $0x59] sm:$0x1] %vm1023_vm1, %v12471_v25  ;;  %v1530_v35 = vld [vmem:[#allocation9 + $0x58] sm:$0xff]  ;;  %v1533_v40 = vld [vmem:[#allocation9 + $0x70] sm:$0xff] }
  0x8b   : > { %1046 = vst.msk [vmem:[#allocation2 + $0x71] sm:$0x1] %vm1023_vm1, %v12471_v25  ;;  %1047 = vst.msk [vmem:[#allocation2 + $0x89] sm:$0x1] %vm1023_vm1, %v12471_v25  ;;  %v4933_v44 = vld [vmem:[%s14800_s7 + $0x8] sm:$0xff] }
  0x8c   : > { %11399 = vmatpush3.bf16.msra.mxu1 %v11396_v21  ;;  %v12964_v21 = vld [vmem:[%s12729_s19 + $0xf0] sm:$0xff]  ;;  %1048 = vst.msk [vmem:[#allocation2 + $0xa1] sm:$0x1] %vm1023_vm1, %v12471_v25  ;;  %1049 = vst.msk [vmem:[#allocation2 + $0xb9] sm:$0x1] %vm1023_vm1, %v12471_v25 }
  0x8d   : > { %11401 = vmatprep.subr.bf16.mxu1 %v11400_v24  ;;  %1050 = vst.msk [vmem:[#allocation2 + $0xd1] sm:$0x1] %vm1023_vm1, %v12471_v25  ;;  %1051 = vst.msk [vmem:[#allocation2 + $0xe9] sm:$0x1] %vm1023_vm1, %v12471_v25  ;;  %v13146_v49 = vld [vmem:[%s14795_s2] ss:$0 sm:$0xff] }
  0x8e   : > { %1052 = vst.msk [vmem:[#allocation2 + $0x101] sm:$0x1] %vm1023_vm1, %v12471_v25  ;;  %1053 = vst.msk [vmem:[#allocation2 + $0x119] sm:$0x1] %vm1023_vm1, %v12471_v25 }
  0x8f   : > { %1054 = vst.msk [vmem:[#allocation2 + $0x131] sm:$0x1] %vm1023_vm1, %v12471_v25  ;;  %1055 = vst.msk [vmem:[#allocation2 + $0x149] sm:$0x1] %vm1023_vm1, %v12471_v25 }
  0x90   : > { %11403 = vmatpush3.bf16.msra.mxu1 %v11400_v24  ;;  %1056 = vst.msk [vmem:[#allocation2 + $0x161] sm:$0x1] %vm1023_vm1, %v12471_v25  ;;  %1057 = vst.msk [vmem:[#allocation2 + $0x179] sm:$0x1] %vm1023_vm1, %v12471_v25 }
  0x91   : > { %11405 = vmatprep.subr.bf16.mxu1 %v11404_v27  ;;  %1058 = vst.msk [vmem:[#allocation2 + $0x191] sm:$0x1] %vm1023_vm1, %v12471_v25  ;;  %1041 = vst.msk [vmem:[#allocation2 + $0x198] sm:$0x1] %vm1023_vm1, %v12471_v25 }
  0x92   : > { %1018 = vst.msk [vmem:[#allocation2 + $0x10] sm:$0x3] %vm1017_vm2, %v12471_v25  ;;  %1022 = vst.msk [vmem:[#allocation2 + $0x1a8] sm:$0x3] %vm1017_vm2, %v12471_v25 }
  0x93   : > { %10271 = vmatmul.mubr.f32.vlgmr.msra.gmra.mrb[0].mxu1 %v12804_v33  ;;  %1042 = vst.msk [vmem:[#allocation2 + $0x11] sm:$0x1] %vm1023_vm1, %v12471_v25  ;;  %1059 = vst.msk [vmem:[#allocation2 + $0x1a9] sm:$0x1] %vm1023_vm1, %v12471_v25 }
  0x94   : > { %11407 = vmatpush3.bf16.msra.mxu1 %v11404_v27  ;;  %10273 = vmatprep.mubr.f32.mxu1 %v12809_v36  ;;  %v1140_v27 = vld [vmem:[#allocation9 + $0x38] sm:$0xff]  ;;  %4880 = vst.msk [vmem:[#allocation3] sm:$0xff] %vm4743_vm3, %v12471_v25  ;;  %4884 = vst.msk [vmem:[#allocation3 + $0x90] sm:$0xff] %vm4743_vm3, %v12471_v25 }
  0x95   : > { %11409 = vmatprep.subr.bf16.mxu1 %v11408_v37  ;;  %v11448_v28 = vpack.c.bf16 %v1140_v27, %v1139_v26  ;;  %4887 = vst.msk [vmem:[#allocation3] sm:$0x1] %vm4886_vm4, %v12471_v25  ;;  %4888 = vst.msk [vmem:[#allocation3 + $0x10] sm:$0x1] %vm4886_vm4, %v12471_v25 }
  0x96   : > { %4889 = vst.msk [vmem:[#allocation3 + $0x20] sm:$0x1] %vm4886_vm4, %v12471_v25  ;;  %4890 = vst.msk [vmem:[#allocation3 + $0x30] sm:$0x1] %vm4886_vm4, %v12471_v25 }
  0x97   : > { %10274 = vmatmul.mubr.f32.gmra.mrb[2].mxu1 %v12824_v41  ;;  %4891 = vst.msk [vmem:[#allocation3 + $0x40] sm:$0x1] %vm4886_vm4, %v12471_v25  ;;  %4892 = vst.msk [vmem:[#allocation3 + $0x50] sm:$0x1] %vm4886_vm4, %v12471_v25 }
  0x98   : > { %10276 = vmatprep.mubr.f32.mxu1 %v12827_v42  ;;  %11411 = vmatpush3.bf16.msra.mxu1 %v11408_v37  ;;  %v1531_v37 = vld [vmem:[#allocation9 + $0x60] sm:$0xff]  ;;  %4893 = vst.msk [vmem:[#allocation3 + $0x60] sm:$0x1] %vm4886_vm4, %v12471_v25  ;;  %4894 = vst.msk [vmem:[#allocation3 + $0x70] sm:$0x1] %vm4886_vm4, %v12471_v25 }
  0x99   : > { %11413 = vmatprep.subr.bf16.mxu1 %v11412_v43  ;;  %4895 = vst.msk [vmem:[#allocation3 + $0x80] sm:$0x1] %vm4886_vm4, %v12471_v25  ;;  %4896 = vst.msk [vmem:[#allocation3 + $0x90] sm:$0x1] %vm4886_vm4, %v12471_v25 }
  0x9a   : > { %4898 = vst.msk [vmem:[#allocation3 + $0x19] sm:$0x1] %vm4886_vm4, %v12471_v25  ;;  %4899 = vst.msk [vmem:[#allocation3 + $0x29] sm:$0x1] %vm4886_vm4, %v12471_v25 }
  0x9b   : > { %10277 = vmatmul.mubr.f32.gmra.mrb[4].mxu1 %v12840_v46  ;;  %4900 = vst.msk [vmem:[#allocation3 + $0x39] sm:$0x1] %vm4886_vm4, %v12471_v25  ;;  %4901 = vst.msk [vmem:[#allocation3 + $0x49] sm:$0x1] %vm4886_vm4, %v12471_v25 }
  0x9c   : > { %10279 = vmatprep.mubr.f32.mxu1 %v12843_v47  ;;  %11415 = vmatpush3.bf16.msra.mxu1 %v11412_v43  ;;  %v4932_v43 = vld [vmem:[%s14800_s7] sm:$0xff]  ;;  %4902 = vst.msk [vmem:[#allocation3 + $0x59] sm:$0x1] %vm4886_vm4, %v12471_v25  ;;  %4903 = vst.msk [vmem:[#allocation3 + $0x69] sm:$0x1] %vm4886_vm4, %v12471_v25 }
  0x9d   : > { %11417 = vmatprep.subr.bf16.mxu1 %v11416_v48  ;;  %v13101_v45 = vpack.c.bf16 %v4933_v44, %v4932_v43  ;;  %4904 = vst.msk [vmem:[#allocation3 + $0x79] sm:$0x1] %vm4886_vm4, %v12471_v25  ;;  %4905 = vst.msk [vmem:[#allocation3 + $0x89] sm:$0x1] %vm4886_vm4, %v12471_v25 }
  0x9e   : > { %4882 = vst.msk [vmem:[#allocation3 + $0x8] sm:$0x3] %vm4881_vm5, %v12471_v25  ;;  %4885 = vst.msk [vmem:[#allocation3 + $0x98] sm:$0x3] %vm4881_vm5, %v12471_v25 }
  0x9f   : > { %10280 = vmatmul.mubr.f32.gmra.mrb[6].mxu1 %v12854_v51  ;;  %4897 = vst.msk [vmem:[#allocation3 + $0x9] sm:$0x1] %vm4886_vm4, %v12471_v25  ;;  %4906 = vst.msk [vmem:[#allocation3 + $0x99] sm:$0x1] %vm4886_vm4, %v12471_v25 }
  0xa0   : > { %10282 = vmatprep.mubr.f32.mxu1 %v12857_v52  ;;  %11419 = vmatpush3.bf16.msra.mxu1 %v11416_v48 }
  0xa1   : > { %11421 = vmatprep.subr.bf16.mxu1 %v11420_v53 }
  0xa3   : > { %10283 = vmatmul.mubr.f32.gmra.mrb[8].mxu1 %v12868_v56 }
  0xa4   : > { %10285 = vmatprep.mubr.f32.mxu1 %v12871_v57  ;;  %11423 = vmatpush3.bf16.msra.mxu1 %v11420_v53 }
  0xa5   : > { %11425 = vmatprep.subr.bf16.mxu1 %v11424_v58 }
  0xa7   : > { %10286 = vmatmul.mubr.f32.gmra.mrb[10].mxu1 %v12882_v61 }
  0xa8   : > { %10288 = vmatprep.mubr.f32.mxu1 %v12885_v62  ;;  %11427 = vmatpush3.bf16.msra.mxu1 %v11424_v58 }
  0xa9   : > { %11429 = vmatprep.subr.bf16.mxu1 %v11428_v63 }
  0xab   : > { %10289 = vmatmul.mubr.f32.gmra.mrb[12].mxu1 %v12896_v2 }
  0xac   : > { %10291 = vmatprep.mubr.f32.mxu1 %v12899_v3  ;;  %11431 = vmatpush3.bf16.msra.mxu1 %v11428_v63 }
  0xad   : > { %11433 = vmatprep.subr.bf16.mxu1 %v11432_v4 }
  0xaf   : > { %10292 = vmatmul.mubr.f32.gmra.mrb[14].mxu1 %v12904_v5 }
  0xb0   : > { %10294 = vmatprep.mubr.f32.mxu1 %v12907_v6  ;;  %11435 = vmatpush3.bf16.msra.mxu1 %v11432_v4 }
  0xb1   : > { %11676 = vmatprep.subr.bf16.mxu1 %v12806_v34 }
  0xb3   : > { %10295 = vmatmul.mubr.f32.gmra.mrb[16].mxu1 %v12912_v7 }
  0xb4   : > { %10297 = vmatprep.mubr.f32.mxu1 %v12915_v8 }
  0xb7   : > { %10298 = vmatmul.mubr.f32.gmra.mrb[18].mxu1 %v12921_v10 }
  0xb8   : > { %10300 = vmatprep.mubr.f32.mxu1 %v12924_v11 }
  0xbb   : > { %10301 = vmatmul.mubr.f32.gmra.mrb[20].mxu1 %v12929_v12 }
  0xbc   : > { %10303 = vmatprep.mubr.f32.mxu1 %v12932_v13 }
  0xbf   : > { %10304 = vmatmul.mubr.f32.gmra.mrb[22].mxu1 %v12937_v14 }
  0xc0   : > { %10306 = vmatprep.mubr.f32.mxu1 %v12940_v15 }
  0xc3   : > { %10307 = vmatmul.mubr.f32.gmra.mrb[24].mxu1 %v12945_v16 }
  0xc4   : > { %10309 = vmatprep.mubr.f32.mxu1 %v12948_v17 }
  0xc7   : > { %10310 = vmatmul.mubr.f32.gmra.mrb[26].mxu1 %v12953_v18 }
  0xc8   : > { %10312 = vmatprep.mubr.f32.mxu1 %v12956_v19 }
  0xcb   : > { %10313 = vmatmul.mubr.f32.gmra.mrb[28].mxu1 %v12961_v20 }
  0xcc   : > { %10315 = vmatprep.mubr.f32.mxu1 %v12964_v21 }
  0xcf   : > { %10316 = vmatmul.mubr.f32.gmra.mrb[30].mxu1 %v12969_v22 }
  0xd0   : > { %10350 = vmatprep.mubr.f32.mxu1 %v12758_v9  ;;  %v1137_v9 = vld [vmem:[#allocation9 + $0x20] sm:$0xff] }
  0xd1   : > { %v11444_v24 = vpack.c.bf16 %v1138_v23, %v1137_v9 }
  0xd3   : > { %10351 = vmatmul.mubr.f32.vlgmr.msra.gmra.mrb[32].mxu1 %v12804_v33  ;;  %11445 = vmatprep.subr.bf16.mxu0 %v11444_v24  ;;  %v11452_v33 = vpack.c.bf16 %v1528_v32, %v1527_v31 }
  0xd4   : > { %10353 = vmatprep.mubr.f32.mxu1 %v12809_v36  ;;  %11680 = vmatpush3.bf16.msra.mxu1 %v12806_v34  ;;  %v1529_v34 = vld [vmem:[#allocation9 + $0x50] sm:$0xff] }
  0xd5   : > { %11677 = vmatprep.subr.bf16.mxu1 %v12811_v38  ;;  %11447 = vmatpush3.bf16.msra.mxu0 %v11444_v24  ;;  %v11456_v36 = vpack.c.bf16 %v1530_v35, %v1529_v34 }
  0xd6   : > { %11449 = vmatprep.subr.bf16.mxu0 %v11448_v28 }
  0xd7   : > { %10354 = vmatmul.mubr.f32.gmra.mrb[34].mxu1 %v12824_v41  ;;  %v1534_v41 = vld [vmem:[#allocation9 + $0x78] sm:$0xff] }
  0xd8   : > { %10356 = vmatprep.mubr.f32.mxu1 %v12827_v42  ;;  %11681 = vmatpush3.bf16.msra.mxu1 %v12811_v38  ;;  %v1532_v38 = vld [vmem:[#allocation9 + $0x68] sm:$0xff]  ;;  %v11464_v42 = vpack.c.bf16 %v1534_v41, %v1533_v40 }
  0xd9   : > { %11678 = vmatprep.subr.bf16.mxu1 %v11444_v24  ;;  %11451 = vmatpush3.bf16.msra.mxu0 %v11448_v28  ;;  %v11460_v39 = vpack.c.bf16 %v1532_v38, %v1531_v37 }
  0xda   : > { %11453 = vmatprep.subr.bf16.mxu0 %v11452_v33 }
  0xdb   : > { %10357 = vmatmul.mubr.f32.gmra.mrb[36].mxu1 %v12840_v46  ;;  %v1921_v46 = vld [vmem:[#allocation9 + $0x80] sm:$0xff] }
  0xdc   : > { %10359 = vmatprep.mubr.f32.mxu1 %v12843_v47  ;;  %11682 = vmatpush3.bf16.msra.mxu1 %v11444_v24  ;;  %v1922_v47 = vld [vmem:[#allocation9 + $0x88] sm:$0xff] }
  0xdd   : > { %11679 = vmatprep.subr.bf16.mxu1 %v11448_v28  ;;  %10415 = vmatmul.mubr.msk.f32.vlgmr.msra.gmra.mrb[0].mxu0 %vm1014_vm0, %v1102_v30  ;;  %v13140_v48 = vpack.c.bf16 %v1922_v47, %v1921_v46 }
  0xde   : > { %11455 = vmatpush3.bf16.msra.mxu0 %v11452_v33 }
  0xdf   : > { %10360 = vmatmul.mubr.f32.gmra.mrb[38].mxu1 %v12854_v51  ;;  %11457 = vmatprep.subr.bf16.mxu0 %v11456_v36 }
  0xe0   : > { %10362 = vmatprep.mubr.f32.mxu1 %v12857_v52  ;;  %11683 = vmatpush3.bf16.msra.mxu1 %v11448_v28 }
  0xe1   : > { %11581 = vmatprep.subr.bf16.mxu1 %v13101_v45 }
  0xe2   : > { %11459 = vmatpush3.bf16.msra.mxu0 %v11456_v36 }
  0xe3   : > { %10363 = vmatmul.mubr.f32.gmra.mrb[40].mxu1 %v12868_v56  ;;  %11461 = vmatprep.subr.bf16.mxu0 %v11460_v39 }
  0xe4   : > { %10365 = vmatprep.mubr.f32.mxu1 %v12871_v57 }
  0xe6   : > { %11463 = vmatpush3.bf16.msra.mxu0 %v11460_v39 }
  0xe7   : > { %10366 = vmatmul.mubr.f32.gmra.mrb[42].mxu1 %v12882_v61  ;;  %11465 = vmatprep.subr.bf16.mxu0 %v11464_v42 }
  0xe8   : > { %10368 = vmatprep.mubr.f32.mxu1 %v12885_v62 }
  0xea   : > { %11467 = vmatpush3.bf16.msra.mxu0 %v11464_v42 }
  0xeb   : > { %10369 = vmatmul.mubr.f32.gmra.mrb[44].mxu1 %v12896_v2  ;;  %11469 = vmatprep.subr.bf16.mxu0 %v13140_v48 }
  0xec   : > { %10371 = vmatprep.mubr.f32.mxu1 %v12899_v3 }
  0xef   : > { %10372 = vmatmul.mubr.f32.gmra.mrb[46].mxu1 %v12904_v5 }
  0xf0   : > { %10374 = vmatprep.mubr.f32.mxu1 %v12907_v6 }
  0xf3   : > { %10375 = vmatmul.mubr.f32.gmra.mrb[48].mxu1 %v12912_v7 }
  0xf4   : > { %10377 = vmatprep.mubr.f32.mxu1 %v12915_v8 }
  0xf7   : > { %10378 = vmatmul.mubr.f32.gmra.mrb[50].mxu1 %v12921_v10 }
  0xf8   : > { %10380 = vmatprep.mubr.f32.mxu1 %v12924_v11 }
  0xfb   : > { %10381 = vmatmul.mubr.f32.gmra.mrb[52].mxu1 %v12929_v12 }
  0xfc   : > { %10383 = vmatprep.mubr.f32.mxu1 %v12932_v13 }
  0xff   : > { %10384 = vmatmul.mubr.f32.gmra.mrb[54].mxu1 %v12937_v14 }
 0x100   : > { %10386 = vmatprep.mubr.f32.mxu1 %v12940_v15 }
 0x103   : > { %10387 = vmatmul.mubr.f32.gmra.mrb[56].mxu1 %v12945_v16 }
 0x104   : > { %10389 = vmatprep.mubr.f32.mxu1 %v12948_v17 }
 0x107   : > { %10390 = vmatmul.mubr.f32.gmra.mrb[58].mxu1 %v12953_v18 }
 0x108   : > { %10392 = vmatprep.mubr.f32.mxu1 %v12956_v19 }
 0x10b   : > { %10393 = vmatmul.mubr.f32.gmra.mrb[60].mxu1 %v12961_v20 }
 0x10c   : > { %10395 = vmatprep.mubr.f32.mxu1 %v12964_v21 }
 0x10f   : > { %10396 = vmatmul.mubr.f32.gmra.mrb[62].mxu1 %v12969_v22 }
 0x166   : > { %v10272_v50 = vpop.f32.mrb[0].mxu1 }
 0x167   : > { %v613_v51 = vadd.f32 %v10272_v50, %v13146_v49  ;;  %v607_v52 = vpop.f32.mrb[1].mxu1 }
 0x168   : > { %v608_v53 = vadd.f32 %v13146_v49, %v607_v52 }
 0x169   : > { %1062 = vst.msk [vmem:[#allocation2 + $0x21] sm:$0xff] %vm1014_vm0, %v613_v51 }
 0x16a   : > { %1061 = vst.msk [vmem:[#allocation2 + $0x19] sm:$0xff] %vm1014_vm0, %v608_v53  ;;  %v10275_v54 = vpop.f32.mrb[2].mxu1 }
 0x16b   : > { %v623_v55 = vadd.f32 %v10275_v54, %v13146_v49  ;;  %v617_v56 = vpop.f32.mrb[3].mxu1 }
 0x16c   : > { %v618_v57 = vadd.f32 %v13146_v49, %v617_v56 }
 0x16d   : > { %1064 = vst.msk [vmem:[#allocation2 + $0x39] sm:$0xff] %vm1014_vm0, %v623_v55 }
 0x16e   : > { %1063 = vst.msk [vmem:[#allocation2 + $0x31] sm:$0xff] %vm1014_vm0, %v618_v57  ;;  %v10278_v58 = vpop.f32.mrb[4].mxu1 }
 0x16f   : > { %v633_v59 = vadd.f32 %v10278_v58, %v13146_v49  ;;  %v627_v60 = vpop.f32.mrb[5].mxu1 }
 0x170   : > { %v628_v61 = vadd.f32 %v13146_v49, %v627_v60 }
 0x171   : > { %1066 = vst.msk [vmem:[#allocation2 + $0x51] sm:$0xff] %vm1014_vm0, %v633_v59  ;;  %v1103_v62 = vld [vmem:[#allocation2 + $0x18] sm:$0xff]  ;;  %v1104_v63 = vld [vmem:[#allocation2 + $0x20] sm:$0xff] }
 0x172   : > { %1065 = vst.msk [vmem:[#allocation2 + $0x49] sm:$0xff] %vm1014_vm0, %v628_v61  ;;  %v10281_v0 = vpop.f32.mrb[6].mxu1  ;;  %10417 = vmatprep.mubr.msk.f32.mxu0 %vm1014_vm0, %v1103_v62 }
 0x173   : > { %v643_v1 = vadd.f32 %v10281_v0, %v13146_v49  ;;  %v637_v2 = vpop.f32.mrb[7].mxu1  ;;  %10418 = vmatmul.mubr.msk.f32.gmra.mrb[2].mxu0 %vm1014_vm0, %v1104_v63  ;;  %v1494_v63 = vld [vmem:[#allocation2 + $0x1] sm:$0xff] }
 0x174   : > { %v638_v3 = vadd.f32 %v13146_v49, %v637_v2  ;;  %v4935_v2 = vld [vmem:[%s14800_s7 + $0x18] sm:$0xff] }
 0x175   : > { %1068 = vst.msk [vmem:[#allocation2 + $0x69] sm:$0xff] %vm1014_vm0, %v643_v1  ;;  %v1105_v4 = vld [vmem:[#allocation2 + $0x30] sm:$0xff]  ;;  %v1106_v5 = vld [vmem:[#allocation2 + $0x38] sm:$0xff] }
 0x176   : > { %1067 = vst.msk [vmem:[#allocation2 + $0x61] sm:$0xff] %vm1014_vm0, %v638_v3  ;;  %v10284_v6 = vpop.f32.mrb[8].mxu1  ;;  %10420 = vmatprep.mubr.msk.f32.mxu0 %vm1014_vm0, %v1105_v4  ;;  %v4934_v1 = vld [vmem:[%s14800_s7 + $0x10] sm:$0xff] }
 0x177   : > { %v653_v7 = vadd.f32 %v10284_v6, %v13146_v49  ;;  %v647_v8 = vpop.f32.mrb[9].mxu1  ;;  %10421 = vmatmul.mubr.msk.f32.gmra.mrb[4].mxu0 %vm1014_vm0, %v1106_v5  ;;  %v1923_v5 = vld [vmem:[#allocation9 + $0x90] sm:$0xff]  ;;  %v1924_v6 = vld [vmem:[#allocation9 + $0x98] sm:$0xff] }
 0x178   : > { %v648_v10 = vadd.f32 %v13146_v49, %v647_v8  ;;  %v1495_v8 = vld [vmem:[#allocation2 + $0x9] sm:$0xff] }
 0x179   : > { %1070 = vst.msk [vmem:[#allocation2 + $0x81] sm:$0xff] %vm1014_vm0, %v653_v7  ;;  %v1107_v11 = vld [vmem:[#allocation2 + $0x48] sm:$0xff]  ;;  %v1108_v12 = vld [vmem:[#allocation2 + $0x50] sm:$0xff] }
 0x17a   : > { %1069 = vst.msk [vmem:[#allocation2 + $0x79] sm:$0xff] %vm1014_vm0, %v648_v10  ;;  %v10287_v13 = vpop.f32.mrb[10].mxu1  ;;  %10423 = vmatprep.mubr.msk.f32.mxu0 %vm1014_vm0, %v1107_v11 }
 0x17b   : > { %v663_v14 = vadd.f32 %v10287_v13, %v13146_v49  ;;  %v657_v15 = vpop.f32.mrb[11].mxu1  ;;  %10424 = vmatmul.mubr.msk.f32.gmra.mrb[6].mxu0 %vm1014_vm0, %v1108_v12  ;;  %v11584_v12 = vpack.c.bf16 %v4935_v2, %v4934_v1 }
 0x17c   : > { %v658_v16 = vadd.f32 %v13146_v49, %v657_v15  ;;  %v9301_v15 = vld [vmem:[%s14800_s7 + $0x20] sm:$0xff] }
 0x17d   : > { %1072 = vst.msk [vmem:[#allocation2 + $0x99] sm:$0xff] %vm1014_vm0, %v663_v14  ;;  %v1109_v17 = vld [vmem:[#allocation2 + $0x60] sm:$0xff]  ;;  %v1110_v18 = vld [vmem:[#allocation2 + $0x68] sm:$0xff]  ;;  %v11472_v14 = vpack.c.bf16 %v1924_v6, %v1923_v5 }
 0x17e   : > { %1071 = vst.msk [vmem:[#allocation2 + $0x91] sm:$0xff] %vm1014_vm0, %v658_v16  ;;  %v10290_v19 = vpop.f32.mrb[12].mxu1  ;;  %10426 = vmatprep.mubr.msk.f32.mxu0 %vm1014_vm0, %v1109_v17  ;;  %v9302_v16 = vld [vmem:[%s14800_s7 + $0x28] sm:$0xff] }
 0x17f   : > { %v673_v20 = vadd.f32 %v10290_v19, %v13146_v49  ;;  %v667_v21 = vpop.f32.mrb[13].mxu1  ;;  %10427 = vmatmul.mubr.msk.f32.gmra.mrb[8].mxu0 %vm1014_vm0, %v1110_v18  ;;  %v1496_v19 = vld [vmem:[#allocation2 + $0x19] sm:$0xff] }
 0x180   : > { %v668_v22 = vadd.f32 %v13146_v49, %v667_v21  ;;  %v1926_v21 = vld [vmem:[#allocation9 + $0xa8] sm:$0xff] }
 0x181   : > { %1074 = vst.msk [vmem:[#allocation2 + $0xb1] sm:$0xff] %vm1014_vm0, %v673_v20  ;;  %v1111_v9 = vld [vmem:[#allocation2 + $0x78] sm:$0xff]  ;;  %v1112_v23 = vld [vmem:[#allocation2 + $0x80] sm:$0xff]  ;;  %v1925_v20 = vld [vmem:[#allocation9 + $0xa0] sm:$0xff] }
 0x182   : > { %1073 = vst.msk [vmem:[#allocation2 + $0xa9] sm:$0xff] %vm1014_vm0, %v668_v22  ;;  %v10293_v24 = vpop.f32.mrb[14].mxu1  ;;  %10429 = vmatprep.mubr.msk.f32.mxu0 %vm1014_vm0, %v1111_v9 }
 0x183   : > { %v683_v25 = vadd.f32 %v10293_v24, %v13146_v49  ;;  %v677_v26 = vpop.f32.mrb[15].mxu1  ;;  %10430 = vmatmul.mubr.msk.f32.gmra.mrb[10].mxu0 %vm1014_vm0, %v1112_v23  ;;  %v13254_v24 = vpack.c.bf16 %v9302_v16, %v9301_v15 }
 0x184   : > { %v678_v27 = vadd.f32 %v13146_v49, %v677_v26  ;;  %v1497_v26 = vld [vmem:[#allocation2 + $0x21] sm:$0xff] }
 0x185   : > { %1076 = vst.msk [vmem:[#allocation2 + $0xc9] sm:$0xff] %vm1014_vm0, %v683_v25  ;;  %v1113_v28 = vld [vmem:[#allocation2 + $0x90] sm:$0xff]  ;;  %v1114_v29 = vld [vmem:[#allocation2 + $0x98] sm:$0xff] }
 0x186   : > { %1075 = vst.msk [vmem:[#allocation2 + $0xc1] sm:$0xff] %vm1014_vm0, %v678_v27  ;;  %v10296_v30 = vpop.f32.mrb[16].mxu1  ;;  %10432 = vmatprep.mubr.msk.f32.mxu0 %vm1014_vm0, %v1113_v28  ;;  %v11476_v27 = vpack.c.bf16 %v1926_v21, %v1925_v20  ;;  %v1506_v2 = vld [vmem:[#allocation2 + $0x91] sm:$0xff] }
 0x187   : > { %v693_v31 = vadd.f32 %v10296_v30, %v13146_v49  ;;  %v687_v32 = vpop.f32.mrb[17].mxu1  ;;  %10433 = vmatmul.mubr.msk.f32.gmra.mrb[12].mxu0 %vm1014_vm0, %v1114_v29  ;;  %v1498_v29 = vld [vmem:[#allocation2 + $0x31] sm:$0xff]  ;;  %v1927_v30 = vld [vmem:[#allocation9 + $0xb0] sm:$0xff] }
 0x188   : > { %v688_v33 = vadd.f32 %v13146_v49, %v687_v32  ;;  %v13266_v32 = vld [vmem:[%s14797_s4] ss:$0 sm:$0xff] }
 0x189   : > { %1078 = vst.msk [vmem:[#allocation2 + $0xe1] sm:$0xff] %vm1014_vm0, %v693_v31  ;;  %v1115_v34 = vld [vmem:[#allocation2 + $0xa8] sm:$0xff]  ;;  %v1116_v35 = vld [vmem:[#allocation2 + $0xb0] sm:$0xff] }
 0x18a   : > { %1077 = vst.msk [vmem:[#allocation2 + $0xd9] sm:$0xff] %vm1014_vm0, %v688_v33  ;;  %v10299_v36 = vpop.f32.mrb[18].mxu1  ;;  %10435 = vmatprep.mubr.msk.f32.mxu0 %vm1014_vm0, %v1115_v34  ;;  %v1508_v15 = vld [vmem:[#allocation2 + $0xa9] sm:$0xff] }
 0x18b   : > { %v703_v37 = vadd.f32 %v10299_v36, %v13146_v49  ;;  %v697_v38 = vpop.f32.mrb[19].mxu1  ;;  %10436 = vmatmul.mubr.msk.f32.gmra.mrb[14].mxu0 %vm1014_vm0, %v1116_v35 }
 0x18c   : > { %v698_v39 = vadd.f32 %v13146_v49, %v697_v38 }
 0x18d   : > { %1080 = vst.msk [vmem:[#allocation2 + $0xf9] sm:$0xff] %vm1014_vm0, %v703_v37  ;;  %v1117_v40 = vld [vmem:[#allocation2 + $0xc0] sm:$0xff]  ;;  %v1118_v41 = vld [vmem:[#allocation2 + $0xc8] sm:$0xff] }
 0x18e   : > { %1079 = vst.msk [vmem:[#allocation2 + $0xf1] sm:$0xff] %vm1014_vm0, %v698_v39  ;;  %v10302_v42 = vpop.f32.mrb[20].mxu1  ;;  %10438 = vmatprep.mubr.msk.f32.mxu0 %vm1014_vm0, %v1117_v40  ;;  %v1500_v39 = vld [vmem:[#allocation2 + $0x49] sm:$0xff]  ;;  %v1510_v21 = vld [vmem:[#allocation2 + $0xc1] sm:$0xff] }
 0x18f   : > { %v713_v43 = vadd.f32 %v10302_v42, %v13146_v49  ;;  %v707_v44 = vpop.f32.mrb[21].mxu1  ;;  %10439 = vmatmul.mubr.msk.f32.gmra.mrb[16].mxu0 %vm1014_vm0, %v1118_v41  ;;  %v2315_v40 = vld [vmem:[#allocation9 + $0xc0] sm:$0xff]  ;;  %v2316_v41 = vld [vmem:[#allocation9 + $0xc8] sm:$0xff] }
 0x190   : > { %v708_v46 = vadd.f32 %v13146_v49, %v707_v44 }
 0x191   : > { %1082 = vst.msk [vmem:[#allocation2 + $0x111] sm:$0xff] %vm1014_vm0, %v713_v43  ;;  %v1119_v47 = vld [vmem:[#allocation2 + $0xd8] sm:$0xff]  ;;  %v1120_v50 = vld [vmem:[#allocation2 + $0xe0] sm:$0xff] }
 0x192   : > { %1081 = vst.msk [vmem:[#allocation2 + $0x109] sm:$0xff] %vm1014_vm0, %v708_v46  ;;  %v10305_v51 = vpop.f32.mrb[22].mxu1  ;;  %10441 = vmatprep.mubr.msk.f32.mxu0 %vm1014_vm0, %v1119_v47  ;;  %v4924_v46 = vld [vmem:[#allocation3] sm:$0xff] }
 0x193   : > { %v723_v52 = vadd.f32 %v10305_v51, %v13146_v49  ;;  %v717_v53 = vpop.f32.mrb[23].mxu1  ;;  %10442 = vmatmul.mubr.msk.f32.gmra.mrb[18].mxu0 %vm1014_vm0, %v1120_v50  ;;  %v1501_v50 = vld [vmem:[#allocation2 + $0x51] sm:$0xff]  ;;  %v13280_v51 = vpack.c.bf16 %v2316_v41, %v2315_v40 }
 0x194   : > { %v718_v54 = vadd.f32 %v13146_v49, %v717_v53 }
 0x195   : > { %1084 = vst.msk [vmem:[#allocation2 + $0x129] sm:$0xff] %vm1014_vm0, %v723_v52  ;;  %v1121_v55 = vld [vmem:[#allocation2 + $0xf0] sm:$0xff]  ;;  %v1122_v56 = vld [vmem:[#allocation2 + $0xf8] sm:$0xff] }
 0x196   : > { %1083 = vst.msk [vmem:[#allocation2 + $0x121] sm:$0xff] %vm1014_vm0, %v718_v54  ;;  %v10308_v57 = vpop.f32.mrb[24].mxu1  ;;  %10444 = vmatprep.mubr.msk.f32.mxu0 %vm1014_vm0, %v1121_v55  ;;  %v1502_v54 = vld [vmem:[#allocation2 + $0x61] sm:$0xff]  ;;  %v1514_v40 = vld [vmem:[#allocation2 + $0xf1] sm:$0xff] }
 0x197   : > { %v733_v58 = vadd.f32 %v10308_v57, %v13146_v49  ;;  %v727_v59 = vpop.f32.mrb[25].mxu1  ;;  %10445 = vmatmul.mubr.msk.f32.gmra.mrb[20].mxu0 %vm1014_vm0, %v1122_v56  ;;  %v1503_v57 = vld [vmem:[#allocation2 + $0x69] sm:$0xff] }
 0x198   : > { %v728_v60 = vadd.f32 %v13146_v49, %v727_v59 }
 0x199   : > { %1086 = vst.msk [vmem:[#allocation2 + $0x141] sm:$0xff] %vm1014_vm0, %v733_v58  ;;  %v1123_v61 = vld [vmem:[#allocation2 + $0x108] sm:$0xff]  ;;  %v1124_v62 = vld [vmem:[#allocation2 + $0x110] sm:$0xff] }
 0x19a   : > { %1085 = vst.msk [vmem:[#allocation2 + $0x139] sm:$0xff] %vm1014_vm0, %v728_v60  ;;  %v10311_v0 = vpop.f32.mrb[26].mxu1  ;;  %10447 = vmatprep.mubr.msk.f32.mxu0 %vm1014_vm0, %v1123_v61  ;;  %v1504_v60 = vld [vmem:[#allocation2 + $0x79] sm:$0xff] }
 0x19b   : > { %v743_v3 = vadd.f32 %v10311_v0, %v13146_v49  ;;  %v737_v4 = vpop.f32.mrb[27].mxu1  ;;  %10448 = vmatmul.mubr.msk.f32.gmra.mrb[22].mxu0 %vm1014_vm0, %v1124_v62 }
 0x19c   : > { %v738_v7 = vadd.f32 %v13146_v49, %v737_v4  ;;  %10478 = vmatprep.mubr.msk.f32.mxu0 %vm1014_vm0, %v1494_v63  ;;  %v1505_v63 = vld [vmem:[#allocation2 + $0x81] sm:$0xff] }
 0x19d   : > { %1088 = vst.msk [vmem:[#allocation2 + $0x159] sm:$0xff] %vm1014_vm0, %v743_v3  ;;  %v1125_v10 = vld [vmem:[#allocation2 + $0x120] sm:$0xff]  ;;  %v1126_v11 = vld [vmem:[#allocation2 + $0x128] sm:$0xff] }
 0x19e   : > { %1087 = vst.msk [vmem:[#allocation2 + $0x151] sm:$0xff] %vm1014_vm0, %v738_v7  ;;  %v10314_v13 = vpop.f32.mrb[28].mxu1  ;;  %10450 = vmatprep.mubr.msk.f32.mxu1 %vm1014_vm0, %v1125_v10 }
 0x19f   : > { %v753_v17 = vadd.f32 %v10314_v13, %v13146_v49  ;;  %v747_v18 = vpop.f32.mrb[29].mxu1  ;;  %10451 = vmatmul.mubr.msk.f32.vlgmr.msra.gmra.mrb[64].mxu1 %vm1014_vm0, %v1126_v11  ;;  %10479 = vmatmul.mubr.msk.f32.vlgmr.msra.gmra.mrb[0].mxu0 %vm1014_vm0, %v1495_v8 }
 0x1a0   : > { %v748_v22 = vadd.f32 %v13146_v49, %v747_v18  ;;  %10481 = vmatprep.mubr.msk.f32.mxu0 %vm1014_vm0, %v1496_v19  ;;  %11583 = vmatpush3.bf16.msra.mxu1 %v13101_v45  ;;  %v1509_v18 = vld [vmem:[#allocation2 + $0xb1] sm:$0xff] }
 0x1a1   : > { %1090 = vst.msk [vmem:[#allocation2 + $0x171] sm:$0xff] %vm1014_vm0, %v753_v17  ;;  %v1127_v9 = vld [vmem:[#allocation2 + $0x138] sm:$0xff]  ;;  %v1128_v23 = vld [vmem:[#allocation2 + $0x140] sm:$0xff]  ;;  %11585 = vmatprep.subr.bf16.mxu1 %v11584_v12  ;;  %11471 = vmatpush3.bf16.msra.mxu0 %v13140_v48  ;;  %v1928_v48 = vld [vmem:[#allocation9 + $0xb8] sm:$0xff] }
 0x1a2   : > { %1089 = vst.msk [vmem:[#allocation2 + $0x169] sm:$0xff] %vm1014_vm0, %v748_v22  ;;  %v10317_v25 = vpop.f32.mrb[30].mxu1  ;;  %10453 = vmatprep.mubr.msk.f32.mxu1 %vm1014_vm0, %v1127_v9  ;;  %11473 = vmatprep.subr.bf16.mxu0 %v11472_v14  ;;  %v11480_v36 = vpack.c.bf16 %v1928_v48, %v1927_v30 }
 0x1a3   : > { %v763_v28 = vadd.f32 %v10317_v25, %v13146_v49  ;;  %v757_v45 = vpop.f32.mrb[31].mxu1  ;;  %10454 = vmatmul.mubr.msk.f32.gmra.mrb[66].mxu1 %vm1014_vm0, %v1128_v23  ;;  %10482 = vmatmul.mubr.msk.f32.gmra.mrb[2].mxu0 %vm1014_vm0, %v1497_v26 }
 0x1a4   : > { %v758_v31 = vadd.f32 %v13146_v49, %v757_v45  ;;  %10484 = vmatprep.mubr.msk.f32.mxu0 %vm1014_vm0, %v1498_v29  ;;  %11587 = vmatpush3.bf16.msra.mxu1 %v11584_v12  ;;  %v1499_v49 = vld [vmem:[#allocation2 + $0x39] sm:$0xff]  ;;  %v1511_v29 = vld [vmem:[#allocation2 + $0xc9] sm:$0xff] }
 0x1a5   : > { %1092 = vst.msk [vmem:[#allocation2 + $0x189] sm:$0xff] %vm1014_vm0, %v763_v28  ;;  %v1129_v33 = vld [vmem:[#allocation2 + $0x150] sm:$0xff]  ;;  %v1130_v34 = vld [vmem:[#allocation2 + $0x158] sm:$0xff]  ;;  %11475 = vmatpush3.bf16.msra.mxu0 %v11472_v14  ;;  %11589 = vmatprep.subr.bf16.mxu1 %v13254_v24 }
 0x1a6   : > { %1091 = vst.msk [vmem:[#allocation2 + $0x181] sm:$0xff] %vm1014_vm0, %v758_v31  ;;  %v10352_v35 = vpop.f32.mrb[32].mxu1  ;;  %10456 = vmatprep.mubr.msk.f32.mxu1 %vm1014_vm0, %v1129_v33  ;;  %11477 = vmatprep.subr.bf16.mxu0 %v11476_v27  ;;  %v1507_v12 = vld [vmem:[#allocation2 + $0x99] sm:$0xff] }
 0x1a7   : > { %v861_v37 = vadd.f32 %v10352_v35, %v13266_v32  ;;  %v855_v38 = vpop.f32.mrb[33].mxu1  ;;  %10457 = vmatmul.mubr.msk.f32.gmra.mrb[68].mxu1 %vm1014_vm0, %v1130_v34  ;;  %10485 = vmatmul.mubr.msk.f32.gmra.mrb[4].mxu0 %vm1014_vm0, %v1499_v49  ;;  %v1512_v31 = vld [vmem:[#allocation2 + $0xd9] sm:$0xff] }
 0x1a8   : > { %v856_v42 = vadd.f32 %v13266_v32, %v855_v38  ;;  %10487 = vmatprep.mubr.msk.f32.mxu0 %vm1014_vm0, %v1500_v39 }
 0x1a9   : > { %4745 = vst.msk [vmem:[#allocation4 + $0x8] sm:$0xff] %vm4743_vm3, %v861_v37  ;;  %v1131_v43 = vld [vmem:[#allocation2 + $0x168] sm:$0xff]  ;;  %v1132_v44 = vld [vmem:[#allocation2 + $0x170] sm:$0xff]  ;;  %11479 = vmatpush3.bf16.msra.mxu0 %v11476_v27 }
 0x1aa   : > { %4744 = vst.msk [vmem:[#allocation4] sm:$0xff] %vm4743_vm3, %v856_v42  ;;  %v10355_v47 = vpop.f32.mrb[34].mxu1  ;;  %10459 = vmatprep.mubr.msk.f32.mxu1 %vm1014_vm0, %v1131_v43  ;;  %11481 = vmatprep.subr.bf16.mxu0 %v11480_v36  ;;  %v1513_v37 = vld [vmem:[#allocation2 + $0xe1] sm:$0xff] }
 0x1ab   : > { %v871_v52 = vadd.f32 %v10355_v47, %v13266_v32  ;;  %v865_v53 = vpop.f32.mrb[35].mxu1  ;;  %10460 = vmatmul.mubr.msk.f32.gmra.mrb[70].mxu1 %vm1014_vm0, %v1132_v44  ;;  %10488 = vmatmul.mubr.msk.f32.gmra.mrb[6].mxu0 %vm1014_vm0, %v1501_v50  ;;  %v9303_v44 = vld [vmem:[%s14800_s7 + $0x30] sm:$0xff] }
 0x1ac   : > { %v866_v55 = vadd.f32 %v13266_v32, %v865_v53  ;;  %10490 = vmatprep.mubr.msk.f32.mxu0 %vm1014_vm0, %v1502_v54  ;;  %10982 = vmatprep.mubr.msk.f32.mxu1 %vm4743_vm3, %v4924_v46 }
 0x1ad   : > { %4747 = vst.msk [vmem:[#allocation4 + $0x18] sm:$0xff] %vm4743_vm3, %v871_v52  ;;  %11483 = vmatpush3.bf16.msra.mxu0 %v11480_v36  ;;  %v9304_v52 = vld [vmem:[%s14800_s7 + $0x38] sm:$0xff] }
 0x1ae   : > { %4746 = vst.msk [vmem:[#allocation4 + $0x10] sm:$0xff] %vm4743_vm3, %v866_v55  ;;  %v10358_v56 = vpop.f32.mrb[36].mxu1  ;;  %11485 = vmatprep.subr.bf16.mxu0 %v13280_v51  ;;  %v1515_v55 = vld [vmem:[#allocation2 + $0xf9] sm:$0xff] }
 0x1af   : > { %v881_v58 = vadd.f32 %v10358_v56, %v13266_v32  ;;  %v875_v59 = vpop.f32.mrb[37].mxu1  ;;  %10491 = vmatmul.mubr.msk.f32.gmra.mrb[8].mxu0 %vm1014_vm0, %v1503_v57 }
 0x1b0   : > { %v876_v61 = vadd.f32 %v13266_v32, %v875_v59  ;;  %10493 = vmatprep.mubr.msk.f32.mxu0 %vm1014_vm0, %v1504_v60  ;;  %v4777_v3 = vld [vmem:[#allocation4 + $0x8] sm:$0xff] }
 0x1b1   : > { %4749 = vst.msk [vmem:[#allocation4 + $0x28] sm:$0xff] %vm4743_vm3, %v881_v58  ;;  %v4776_v6 = vld [vmem:[#allocation4] sm:$0xff] }
 0x1b2   : > { %4748 = vst.msk [vmem:[#allocation4 + $0x20] sm:$0xff] %vm4743_vm3, %v876_v61  ;;  %v10361_v62 = vpop.f32.mrb[38].mxu1  ;;  %v1516_v58 = vld [vmem:[#allocation2 + $0x109] sm:$0xff] }
 0x1b3   : > { %v891_v0 = vadd.f32 %v10361_v62, %v13266_v32  ;;  %v885_v1 = vpop.f32.mrb[39].mxu1  ;;  %10494 = vmatmul.mubr.msk.f32.gmra.mrb[10].mxu0 %vm1014_vm0, %v1505_v63  ;;  %v11592_v63 = vpack.c.bf16 %v9304_v52, %v9303_v44  ;;  %v1525_v52 = vld [vmem:[#allocation2 + $0x171] sm:$0xff] }
 0x1b4   : > { %v4794_v4 = vld [vmem:[#allocation4 + $0x18] sm:$0xff]  ;;  %v886_v5 = vadd.f32 %v13266_v32, %v885_v1  ;;  %10496 = vmatprep.mubr.msk.f32.mxu0 %vm1014_vm0, %v1506_v2  ;;  %v9313_v1 = vld [vmem:[%s14800_s7 + $0x40] sm:$0xff] }
 0x1b5   : > { %v4810_v7 = vmax.f32 %v4777_v3, %v4794_v4  ;;  %v4793_v8 = vld [vmem:[#allocation4 + $0x10] sm:$0xff]  ;;  %4751 = vst.msk [vmem:[#allocation4 + $0x38] sm:$0xff] %vm4743_vm3, %v891_v0  ;;  %v9314_v2 = vld [vmem:[%s14800_s7 + $0x48] sm:$0xff]  ;;  %v1517_v4 = vld [vmem:[#allocation2 + $0x111] sm:$0xff] }
 0x1b6   : > { %v4809_v10 = vmax.f32 %v4776_v6, %v4793_v8  ;;  %4750 = vst.msk [vmem:[#allocation4 + $0x30] sm:$0xff] %vm4743_vm3, %v886_v5  ;;  %v10364_v11 = vpop.f32.mrb[40].mxu1 }
 0x1b7   : > { %4826 = vst.msk [vmem:[#allocation5 + $0x8] sm:$0xff] %vm4743_vm3, %v4810_v7  ;;  %v901_v13 = vadd.f32 %v10364_v11, %v13266_v32  ;;  %v895_v14 = vpop.f32.mrb[41].mxu1  ;;  %10497 = vmatmul.mubr.msk.f32.gmra.mrb[12].mxu0 %vm1014_vm0, %v1507_v12  ;;  %v1518_v7 = vld [vmem:[#allocation2 + $0x121] sm:$0xff]  ;;  %v13362_v12 = vpack.c.bf16 %v9314_v2, %v9313_v1 }
 0x1b8   : > { %4825 = vst.msk [vmem:[#allocation5] sm:$0xff] %vm4743_vm3, %v4809_v10  ;;  %v896_v16 = vadd.f32 %v13266_v32, %v895_v14  ;;  %10499 = vmatprep.mubr.msk.f32.mxu0 %vm1014_vm0, %v1508_v15  ;;  %v4779_v22 = vld [vmem:[#allocation4 + $0x28] sm:$0xff] }
 0x1b9   : > { %4753 = vst.msk [vmem:[#allocation4 + $0x48] sm:$0xff] %vm4743_vm3, %v901_v13  ;;  %v4778_v25 = vld [vmem:[#allocation4 + $0x20] sm:$0xff] }
 0x1ba   : > { %4752 = vst.msk [vmem:[#allocation4 + $0x40] sm:$0xff] %vm4743_vm3, %v896_v16  ;;  %v10367_v17 = vpop.f32.mrb[42].mxu1 }
 0x1bb   : > { %v911_v19 = vadd.f32 %v10367_v17, %v13266_v32  ;;  %v905_v20 = vpop.f32.mrb[43].mxu1  ;;  %10500 = vmatmul.mubr.msk.f32.gmra.mrb[14].mxu0 %vm1014_vm0, %v1509_v18  ;;  %v1519_v18 = vld [vmem:[#allocation2 + $0x129] sm:$0xff] }
 0x1bc   : > { %v4796_v9 = vld [vmem:[#allocation4 + $0x38] sm:$0xff]  ;;  %v906_v23 = vadd.f32 %v13266_v32, %v905_v20  ;;  %10502 = vmatprep.mubr.msk.f32.mxu0 %vm1014_vm0, %v1510_v21  ;;  %v1520_v20 = vld [vmem:[#allocation2 + $0x139] sm:$0xff] }
 0x1bd   : > { %v4812_v26 = vmax.f32 %v4779_v22, %v4796_v9  ;;  %v4795_v27 = vld [vmem:[#allocation4 + $0x30] sm:$0xff]  ;;  %4755 = vst.msk [vmem:[#allocation4 + $0x58] sm:$0xff] %vm4743_vm3, %v911_v19 }
 0x1be   : > { %v4811_v28 = vmax.f32 %v4778_v25, %v4795_v27  ;;  %4754 = vst.msk [vmem:[#allocation4 + $0x50] sm:$0xff] %vm4743_vm3, %v906_v23  ;;  %v10370_v45 = vpop.f32.mrb[44].mxu1  ;;  %v1521_v27 = vld [vmem:[#allocation2 + $0x141] sm:$0xff] }
 0x1bf   : > { %4828 = vst.msk [vmem:[#allocation5 + $0x18] sm:$0xff] %vm4743_vm3, %v4812_v26  ;;  %v921_v30 = vadd.f32 %v10370_v45, %v13266_v32  ;;  %v915_v48 = vpop.f32.mrb[45].mxu1  ;;  %10503 = vmatmul.mubr.msk.f32.gmra.mrb[16].mxu0 %vm1014_vm0, %v1511_v29  ;;  %v4841_v33 = vld [vmem:[#allocation5] ss:$2 sm:$0xff]  ;;  %v4857_v34 = vld [vmem:[#allocation5 + $0x1] ss:$2 sm:$0xff] }
 0x1c0   : > { %4827 = vst.msk [vmem:[#allocation5 + $0x10] sm:$0xff] %vm4743_vm3, %v4811_v28  ;;  %v916_v35 = vadd.f32 %v13266_v32, %v915_v48  ;;  %10505 = vmatprep.mubr.msk.f32.mxu0 %vm1014_vm0, %v1512_v31  ;;  %v4872_v49 = vmax.f32 %v4841_v33, %v4857_v34  ;;  %v4781_v41 = vld [vmem:[#allocation4 + $0x48] sm:$0xff] }
 0x1c1   : > { %4757 = vst.msk [vmem:[#allocation4 + $0x68] sm:$0xff] %vm4743_vm3, %v921_v30  ;;  %v4780_v46 = vld [vmem:[#allocation4 + $0x40] sm:$0xff] }
 0x1c2   : > { %4756 = vst.msk [vmem:[#allocation4 + $0x60] sm:$0xff] %vm4743_vm3, %v916_v35  ;;  %v10373_v36 = vpop.f32.mrb[46].mxu1  ;;  %4908 = vst.msk [vmem:[#allocation3 + $0x11] sm:$0xff] %vm4743_vm3, %v4872_v49  ;;  %v1522_v29 = vld [vmem:[#allocation2 + $0x151] sm:$0xff] }
 0x1c3   : > { %v931_v38 = vadd.f32 %v10373_v36, %v13266_v32  ;;  %v925_v39 = vpop.f32.mrb[47].mxu1  ;;  %10506 = vmatmul.mubr.msk.f32.gmra.mrb[18].mxu0 %vm1014_vm0, %v1513_v37  ;;  %v1523_v37 = vld [vmem:[#allocation2 + $0x159] sm:$0xff] }
 0x1c4   : > { %v4798_v42 = vld [vmem:[#allocation4 + $0x58] sm:$0xff]  ;;  %v926_v43 = vadd.f32 %v13266_v32, %v925_v39  ;;  %10508 = vmatprep.mubr.msk.f32.mxu0 %vm1014_vm0, %v1514_v40 }
 0x1c5   : > { %v4814_v47 = vmax.f32 %v4781_v41, %v4798_v42  ;;  %v4797_v50 = vld [vmem:[#allocation4 + $0x50] sm:$0xff]  ;;  %4759 = vst.msk [vmem:[#allocation4 + $0x78] sm:$0xff] %vm4743_vm3, %v931_v38  ;;  %v1524_v40 = vld [vmem:[#allocation2 + $0x169] sm:$0xff] }
 0x1c6   : > { %v4813_v53 = vmax.f32 %v4780_v46, %v4797_v50  ;;  %4758 = vst.msk [vmem:[#allocation4 + $0x70] sm:$0xff] %vm4743_vm3, %v926_v43  ;;  %v10376_v54 = vpop.f32.mrb[48].mxu1 }
 0x1c7   : > { %4830 = vst.msk [vmem:[#allocation5 + $0x28] sm:$0xff] %vm4743_vm3, %v4814_v47  ;;  %v941_v56 = vadd.f32 %v10376_v54, %v13266_v32  ;;  %v935_v57 = vpop.f32.mrb[49].mxu1  ;;  %10509 = vmatmul.mubr.msk.f32.gmra.mrb[20].mxu0 %vm1014_vm0, %v1515_v55  ;;  %v4843_v59 = vld [vmem:[#allocation5 + $0x10] ss:$2 sm:$0xff]  ;;  %v4859_v60 = vld [vmem:[#allocation5 + $0x11] ss:$2 sm:$0xff] }
 0x1c8   : > { %4829 = vst.msk [vmem:[#allocation5 + $0x20] sm:$0xff] %vm4743_vm3, %v4813_v53  ;;  %v936_v61 = vadd.f32 %v13266_v32, %v935_v57  ;;  %10511 = vmatprep.mubr.msk.f32.mxu0 %vm1014_vm0, %v1516_v58  ;;  %v4873_v62 = vmax.f32 %v4843_v59, %v4859_v60  ;;  %v4783_v8 = vld [vmem:[#allocation4 + $0x68] sm:$0xff]  ;;  %v1888_v47 = vld [vmem:[#allocation2 + $0x2] sm:$0xff]  ;;  %v1889_v60 = vld [vmem:[#allocation2 + $0xa] sm:$0xff] }
 0x1c9   : > { %4761 = vst.msk [vmem:[#allocation4 + $0x88] sm:$0xff] %vm4743_vm3, %v941_v56  ;;  %v13345_v0 = vld [vmem:[#allocation3 + $0x10] sm:$0xff]  ;;  %v4782_v13 = vld [vmem:[#allocation4 + $0x60] sm:$0xff]  ;;  %v2318_v54 = vld [vmem:[#allocation9 + $0xd8] sm:$0xff] }
 0x1ca   : > { %4760 = vst.msk [vmem:[#allocation4 + $0x80] sm:$0xff] %vm4743_vm3, %v936_v61  ;;  %v10379_v3 = vpop.f32.mrb[50].mxu1  ;;  %10983 = vmatmul.mubr.msk.f32.vlgmr.msra.gmra.mrb[72].mxu1 %vm4743_vm3, %v13345_v0  ;;  %4909 = vst.msk [vmem:[#allocation3 + $0x21] sm:$0xff] %vm4743_vm3, %v4873_v62  ;;  %v2317_v53 = vld [vmem:[#allocation9 + $0xd0] sm:$0xff] }
 0x1cb   : > { %v951_v5 = vadd.f32 %v10379_v3, %v13266_v32  ;;  %v945_v6 = vpop.f32.mrb[51].mxu1  ;;  %10512 = vmatmul.mubr.msk.f32.gmra.mrb[22].mxu0 %vm1014_vm0, %v1517_v4  ;;  %11591 = vmatpush3.bf16.msra.mxu1 %v13254_v24  ;;  %v11488_v1 = vpack.c.bf16 %v2318_v54, %v2317_v53  ;;  %v2319_v4 = vld [vmem:[#allocation9 + $0xe0] sm:$0xff] }
 0x1cc   : > { %v4800_v10 = vld [vmem:[#allocation4 + $0x78] sm:$0xff]  ;;  %v946_v11 = vadd.f32 %v13266_v32, %v945_v6  ;;  %10514 = vmatprep.mubr.msk.f32.mxu0 %vm1014_vm0, %v1518_v7  ;;  %11593 = vmatprep.subr.bf16.mxu1 %v11592_v63  ;;  %v1890_v6 = vld [vmem:[#allocation2 + $0x1a] sm:$0xff] }
 0x1cd   : > { %v4816_v14 = vmax.f32 %v4783_v8, %v4800_v10  ;;  %v4799_v15 = vld [vmem:[#allocation4 + $0x70] sm:$0xff]  ;;  %4763 = vst.msk [vmem:[#allocation4 + $0x98] sm:$0xff] %vm4743_vm3, %v951_v5  ;;  %v2320_v5 = vld [vmem:[#allocation9 + $0xe8] sm:$0xff] }
 0x1ce   : > { %v4815_v16 = vmax.f32 %v4782_v13, %v4799_v15  ;;  %4762 = vst.msk [vmem:[#allocation4 + $0x90] sm:$0xff] %vm4743_vm3, %v946_v11  ;;  %v10382_v17 = vpop.f32.mrb[52].mxu1 }
 0x1cf   : > { %4832 = vst.msk [vmem:[#allocation5 + $0x38] sm:$0xff] %vm4743_vm3, %v4816_v14  ;;  %v961_v24 = vadd.f32 %v10382_v17, %v13266_v32  ;;  %v955_v19 = vpop.f32.mrb[53].mxu1  ;;  %10515 = vmatmul.mubr.msk.f32.gmra.mrb[24].mxu0 %vm1014_vm0, %v1519_v18  ;;  %v4845_v21 = vld [vmem:[#allocation5 + $0x20] ss:$2 sm:$0xff]  ;;  %v4861_v22 = vld [vmem:[#allocation5 + $0x21] ss:$2 sm:$0xff]  ;;  %11595 = vmatpush3.bf16.msra.mxu1 %v11592_v63 }
 0x1d0   : > { %4831 = vst.msk [vmem:[#allocation5 + $0x30] sm:$0xff] %vm4743_vm3, %v4815_v16  ;;  %v956_v9 = vadd.f32 %v13266_v32, %v955_v19  ;;  %10517 = vmatprep.mubr.msk.f32.mxu0 %vm1014_vm0, %v1520_v20  ;;  %v4874_v23 = vmax.f32 %v4845_v21, %v4861_v22  ;;  %11597 = vmatprep.subr.bf16.mxu1 %v13362_v12  ;;  %v4785_v30 = vld [vmem:[#allocation4 + $0x88] sm:$0xff]  ;;  %v1891_v17 = vld [vmem:[#allocation2 + $0x22] sm:$0xff] }
 0x1d1   : > { %4765 = vst.msk [vmem:[#allocation4 + $0xa8] sm:$0xff] %vm4743_vm3, %v961_v24  ;;  %v13374_v25 = vld [vmem:[#allocation3 + $0x20] sm:$0xff]  ;;  %v11492_v16 = vpack.c.bf16 %v2320_v5, %v2319_v4  ;;  %v2321_v24 = vld [vmem:[#allocation9 + $0xf0] sm:$0xff]  ;;  %v2322_v19 = vld [vmem:[#allocation9 + $0xf8] sm:$0xff] }
 0x1d2   : > { %4764 = vst.msk [vmem:[#allocation4 + $0xa0] sm:$0xff] %vm4743_vm3, %v956_v9  ;;  %v10385_v26 = vpop.f32.mrb[54].mxu1  ;;  %10985 = vmatprep.mubr.msk.f32.mxu1 %vm4743_vm3, %v13374_v25  ;;  %4910 = vst.msk [vmem:[#allocation3 + $0x31] sm:$0xff] %vm4743_vm3, %v4874_v23  ;;  %v4784_v33 = vld [vmem:[#allocation4 + $0x80] sm:$0xff]  ;;  %v9316_v4 = vld [vmem:[%s14800_s7 + $0x58] sm:$0xff] }
 0x1d3   : > { %v971_v28 = vadd.f32 %v10385_v26, %v13266_v32  ;;  %v965_v45 = vpop.f32.mrb[55].mxu1  ;;  %10518 = vmatmul.mubr.msk.f32.gmra.mrb[26].mxu0 %vm1014_vm0, %v1521_v27  ;;  %v13485_v5 = vld [vmem:[#allocation2 + $0xc2] sm:$0xff] }
 0x1d4   : > { %v4802_v48 = vld [vmem:[#allocation4 + $0x98] sm:$0xff]  ;;  %v966_v31 = vadd.f32 %v13266_v32, %v965_v45  ;;  %10520 = vmatprep.mubr.msk.f32.mxu0 %vm1014_vm0, %v1522_v29  ;;  %v11496_v45 = vpack.c.bf16 %v2322_v19, %v2321_v24 }
 0x1d5   : > { %v4818_v34 = vmax.f32 %v4785_v30, %v4802_v48  ;;  %v4801_v35 = vld [vmem:[#allocation4 + $0x90] sm:$0xff]  ;;  %4767 = vst.msk [vmem:[#allocation4 + $0xb8] sm:$0xff] %vm4743_vm3, %v971_v28  ;;  %v2709_v48 = vld [vmem:[#allocation9 + $0x100] sm:$0xff] }
 0x1d6   : > { %v4817_v49 = vmax.f32 %v4784_v33, %v4801_v35  ;;  %4766 = vst.msk [vmem:[#allocation4 + $0xb0] sm:$0xff] %vm4743_vm3, %v966_v31  ;;  %v10388_v36 = vpop.f32.mrb[56].mxu1  ;;  %v1893_v30 = vld [vmem:[#allocation2 + $0x3a] sm:$0xff]  ;;  %v1894_v33 = vld [vmem:[#allocation2 + $0x4a] sm:$0xff] }
 0x1d7   : > { %4834 = vst.msk [vmem:[#allocation5 + $0x48] sm:$0xff] %vm4743_vm3, %v4818_v34  ;;  %v981_v38 = vadd.f32 %v10388_v36, %v13266_v32  ;;  %v975_v39 = vpop.f32.mrb[57].mxu1  ;;  %10521 = vmatmul.mubr.msk.f32.gmra.mrb[28].mxu0 %vm1014_vm0, %v1523_v37  ;;  %v4847_v41 = vld [vmem:[#allocation5 + $0x30] ss:$2 sm:$0xff]  ;;  %v4863_v42 = vld [vmem:[#allocation5 + $0x31] ss:$2 sm:$0xff] }
 0x1d8   : > { %4833 = vst.msk [vmem:[#allocation5 + $0x40] sm:$0xff] %vm4743_vm3, %v4817_v49  ;;  %v976_v43 = vadd.f32 %v13266_v32, %v975_v39  ;;  %10523 = vmatprep.mubr.msk.f32.mxu0 %vm1014_vm0, %v1524_v40  ;;  %v4875_v44 = vmax.f32 %v4847_v41, %v4863_v42  ;;  %v4787_v57 = vld [vmem:[#allocation4 + $0xa8] sm:$0xff]  ;;  %v1896_v39 = vld [vmem:[#allocation2 + $0x62] sm:$0xff] }
 0x1d9   : > { %4769 = vst.msk [vmem:[#allocation4 + $0xc8] sm:$0xff] %vm4743_vm3, %v981_v38  ;;  %v13393_v46 = vld [vmem:[#allocation3 + $0x30] sm:$0xff]  ;;  %v4786_v61 = vld [vmem:[#allocation4 + $0xa0] sm:$0xff]  ;;  %v2710_v31 = vld [vmem:[#allocation9 + $0x108] sm:$0xff] }
 0x1da   : > { %4768 = vst.msk [vmem:[#allocation4 + $0xc0] sm:$0xff] %vm4743_vm3, %v976_v43  ;;  %v10391_v50 = vpop.f32.mrb[58].mxu1  ;;  %10986 = vmatmul.mubr.msk.f32.gmra.mrb[74].mxu1 %vm4743_vm3, %v13393_v46  ;;  %4911 = vst.msk [vmem:[#allocation3 + $0x41] sm:$0xff] %vm4743_vm3, %v4875_v44  ;;  %v13431_v36 = vpack.c.bf16 %v2710_v31, %v2709_v48  ;;  %v1895_v37 = vld [vmem:[#allocation2 + $0x52] sm:$0xff]  ;;  %v13439_v44 = vld [vmem:[#allocation2 + $0x6a] sm:$0xff] }
 0x1db   : > { %v991_v55 = vadd.f32 %v10391_v50, %v13266_v32  ;;  %v985_v56 = vpop.f32.mrb[59].mxu1  ;;  %10524 = vmatmul.mubr.msk.f32.gmra.mrb[30].mxu0 %vm1014_vm0, %v1525_v52  ;;  %v13443_v50 = vld [vmem:[#allocation2 + $0x7a] sm:$0xff]  ;;  %v13570_v48 = vld [vmem:[#allocation3 + $0x22] sm:$0xff] }
 0x1dc   : > { %v4804_v58 = vld [vmem:[#allocation4 + $0xb8] sm:$0xff]  ;;  %v986_v59 = vadd.f32 %v13266_v32, %v985_v56  ;;  %10542 = vmatprep.mubr.msk.f32.mxu0 %vm1014_vm0, %v1888_v47  ;;  %v9337_v31 = vld [vmem:[%s14800_s7 + $0x80] sm:$0xff] }
 0x1dd   : > { %v4820_v62 = vmax.f32 %v4787_v57, %v4804_v58  ;;  %v4803_v63 = vld [vmem:[#allocation4 + $0xb0] sm:$0xff]  ;;  %4771 = vst.msk [vmem:[#allocation4 + $0xd8] sm:$0xff] %vm4743_vm3, %v991_v55  ;;  %v13458_v57 = vld [vmem:[#allocation2 + $0x92] sm:$0xff] }
 0x1de   : > { %v4819_v2 = vmax.f32 %v4786_v61, %v4803_v63  ;;  %4770 = vst.msk [vmem:[#allocation4 + $0xd0] sm:$0xff] %vm4743_vm3, %v986_v59  ;;  %v10394_v3 = vpop.f32.mrb[60].mxu1  ;;  %v13453_v56 = vld [vmem:[#allocation2 + $0x82] sm:$0xff]  ;;  %v13462_v58 = vld [vmem:[#allocation2 + $0x9a] sm:$0xff]  ;;  %v13466_v59 = vld [vmem:[#allocation2 + $0xaa] sm:$0xff] }
 0x1df   : > { %4836 = vst.msk [vmem:[#allocation5 + $0x58] sm:$0xff] %vm4743_vm3, %v4820_v62  ;;  %10543 = vmatmul.mubr.msk.f32.vlgmr.msra.gmra.mrb[0].mxu0 %vm1014_vm0, %v1889_v60  ;;  %v4849_v7 = vld [vmem:[#allocation5 + $0x40] ss:$2 sm:$0xff]  ;;  %v4865_v8 = vld [vmem:[#allocation5 + $0x41] ss:$2 sm:$0xff]  ;;  %v1001_v10 = vadd.f32 %v10394_v3, %v13266_v32  ;;  %v995_v11 = vpop.f32.mrb[61].mxu1 }
 0x1e0   : > { %4835 = vst.msk [vmem:[#allocation5 + $0x50] sm:$0xff] %vm4743_vm3, %v4819_v2  ;;  %10545 = vmatprep.mubr.msk.f32.mxu0 %vm1014_vm0, %v1890_v6  ;;  %v4876_v13 = vmax.f32 %v4849_v7, %v4865_v8  ;;  %v996_v14 = vadd.f32 %v13266_v32, %v995_v11  ;;  %11487 = vmatpush3.bf16.msra.mxu0 %v13280_v51  ;;  %v1892_v51 = vld [vmem:[#allocation2 + $0x32] sm:$0xff]  ;;  %v13490_v6 = vld [vmem:[#allocation3 + $0x11] sm:$0xff]  ;;  %v13492_v7 = vld [vmem:[#allocation2 + $0xca] sm:$0xff] }
 0x1e1   : > { %v13412_v15 = vld [vmem:[#allocation3 + $0x40] sm:$0xff]  ;;  %4773 = vst.msk [vmem:[#allocation4 + $0xe8] sm:$0xff] %vm4743_vm3, %v1001_v10  ;;  %11489 = vmatprep.subr.bf16.mxu0 %v11488_v1  ;;  %v4789_v22 = vld [vmem:[#allocation4 + $0xc8] sm:$0xff]  ;;  %v9325_v11 = vld [vmem:[%s14800_s7 + $0x60] sm:$0xff] }
 0x1e2   : > { %10988 = vmatprep.mubr.msk.f32.mxu1 %vm4743_vm3, %v13412_v15  ;;  %4912 = vst.msk [vmem:[#allocation3 + $0x51] sm:$0xff] %vm4743_vm3, %v4876_v13  ;;  %4772 = vst.msk [vmem:[#allocation4 + $0xe0] sm:$0xff] %vm4743_vm3, %v996_v14  ;;  %v10397_v18 = vpop.f32.mrb[62].mxu1  ;;  %v4788_v26 = vld [vmem:[#allocation4 + $0xc0] sm:$0xff]  ;;  %v9326_v13 = vld [vmem:[%s14800_s7 + $0x68] sm:$0xff] }
 0x1e3   : > { %10546 = vmatmul.mubr.msk.f32.gmra.mrb[2].mxu0 %vm1014_vm0, %v1891_v17  ;;  %v1011_v20 = vadd.f32 %v10397_v18, %v13266_v32  ;;  %v1005_v21 = vpop.f32.mrb[63].mxu1  ;;  %v5073_v62 = vld [vmem:[#allocation3 + $0x1] sm:$0xff]  ;;  %v13508_v14 = vld [vmem:[#allocation2 + $0xda] sm:$0xff]  ;;  %v11604_v17 = vpack.c.bf16 %v9326_v13, %v9325_v11  ;;  %v13517_v18 = vld [vmem:[#allocation2 + $0xe2] sm:$0xff] }
 0x1e4   : > { %v4806_v9 = vld [vmem:[#allocation4 + $0xd8] sm:$0xff]  ;;  %10548 = vmatprep.mubr.msk.f32.mxu0 %vm1014_vm0, %v1892_v51  ;;  %v1006_v23 = vadd.f32 %v13266_v32, %v1005_v21  ;;  %11491 = vmatpush3.bf16.msra.mxu0 %v11488_v1  ;;  %v13474_v2 = vld [vmem:[#allocation2 + $0xb2] sm:$0xff]  ;;  %v13533_v51 = vld [vmem:[#allocation2 + $0xfa] sm:$0xff] }
 0x1e5   : > { %v4822_v27 = vmax.f32 %v4789_v22, %v4806_v9  ;;  %v4805_v28 = vld [vmem:[#allocation4 + $0xd0] sm:$0xff]  ;;  %4775 = vst.msk [vmem:[#allocation4 + $0xf8] sm:$0xff] %vm4743_vm3, %v1011_v20  ;;  %11493 = vmatprep.subr.bf16.mxu0 %v11492_v16  ;;  %v9315_v3 = vld [vmem:[%s14800_s7 + $0x50] sm:$0xff] }
 0x1e6   : > { %v4821_v29 = vmax.f32 %v4788_v26, %v4805_v28  ;;  %4774 = vst.msk [vmem:[#allocation4 + $0xf0] sm:$0xff] %vm4743_vm3, %v1006_v23  ;;  %v11600_v8 = vpack.c.bf16 %v9316_v4, %v9315_v3  ;;  %v13496_v10 = vld [vmem:[#allocation3 + $0x21] sm:$0xff]  ;;  %v13559_v28 = vld [vmem:[#allocation2 + $0x122] sm:$0xff] }
 0x1e7   : > { %4838 = vst.msk [vmem:[#allocation5 + $0x68] sm:$0xff] %vm4743_vm3, %v4822_v27  ;;  %10549 = vmatmul.mubr.msk.f32.gmra.mrb[4].mxu0 %vm1014_vm0, %v1893_v30  ;;  %v4851_v32 = vld [vmem:[#allocation5 + $0x50] ss:$2 sm:$0xff]  ;;  %v4867_v34 = vld [vmem:[#allocation5 + $0x51] ss:$2 sm:$0xff]  ;;  %v13519_v24 = vld [vmem:[#allocation3 + $0x41] sm:$0xff] }
 0x1e8   : > { %4837 = vst.msk [vmem:[#allocation5 + $0x60] sm:$0xff] %vm4743_vm3, %v4821_v29  ;;  %10551 = vmatprep.mubr.msk.f32.mxu0 %vm1014_vm0, %v1894_v33  ;;  %v4877_v35 = vmax.f32 %v4851_v32, %v4867_v34  ;;  %11495 = vmatpush3.bf16.msra.mxu0 %v11492_v16  ;;  %v4791_v38 = vld [vmem:[#allocation4 + $0xe8] sm:$0xff]  ;;  %v13513_v16 = vld [vmem:[#allocation3 + $0x31] sm:$0xff]  ;;  %v13541_v21 = vld [vmem:[#allocation2 + $0x10a] sm:$0xff] }
 0x1e9   : > { %v13429_v49 = vld [vmem:[#allocation3 + $0x50] sm:$0xff]  ;;  %11497 = vmatprep.subr.bf16.mxu0 %v11496_v45  ;;  %v4790_v40 = vld [vmem:[#allocation4 + $0xe0] sm:$0xff]  ;;  %v9328_v27 = vld [vmem:[%s14800_s7 + $0x78] sm:$0xff] }
 0x1ea   : > { %10989 = vmatmul.mubr.msk.f32.gmra.mrb[76].mxu1 %vm4743_vm3, %v13429_v49  ;;  %4913 = vst.msk [vmem:[#allocation3 + $0x61] sm:$0xff] %vm4743_vm3, %v4877_v35  ;;  %v13529_v19 = vld [vmem:[#allocation3 + $0x51] sm:$0xff]  ;;  %v5223_v22 = vld [vmem:[#allocation3 + $0x2] sm:$0xff]  ;;  %v13566_v29 = vld [vmem:[#allocation2 + $0x12a] sm:$0xff] }
 0x1eb   : > { %10552 = vmatmul.mubr.msk.f32.gmra.mrb[6].mxu0 %vm1014_vm0, %v1895_v37  ;;  %v13549_v23 = vld [vmem:[#allocation2 + $0x112] sm:$0xff]  ;;  %v9338_v33 = vld [vmem:[%s14800_s7 + $0x88] sm:$0xff]  ;;  %v13582_v32 = vld [vmem:[#allocation2 + $0x13a] sm:$0xff] }
 0x1ec   : > { %10554 = vmatprep.mubr.msk.f32.mxu0 %vm1014_vm0, %v1896_v39  ;;  %v4808_v41 = vld [vmem:[#allocation4 + $0xf8] sm:$0xff]  ;;  %11499 = vmatpush3.bf16.msra.mxu0 %v11496_v45  ;;  %v9327_v26 = vld [vmem:[%s14800_s7 + $0x70] sm:$0xff]  ;;  %v11612_v35 = vpack.c.bf16 %v9338_v33, %v9337_v31  ;;  %v2283_v3 = vld [vmem:[#allocation2 + $0x20] sm:$0xff] }
 0x1ed   : > { %v4824_v42 = vmax.f32 %v4791_v38, %v4808_v41  ;;  %v4807_v43 = vld [vmem:[#allocation4 + $0xf0] sm:$0xff]  ;;  %11501 = vmatprep.subr.bf16.mxu0 %v13431_v36  ;;  %v11608_v30 = vpack.c.bf16 %v9328_v27, %v9327_v26  ;;  %v13592_v38 = vld [vmem:[#allocation3 + $0x42] sm:$0xff]  ;;  %v2716_v33 = vld [vmem:[#allocation9 + $0x138] sm:$0xff] }
 0x1ee   : > { %v4823_v47 = vmax.f32 %v4790_v40, %v4807_v43  ;;  %v13564_v45 = vld [vmem:[#allocation3 + $0x12] sm:$0xff]  ;;  %v13598_v39 = vld [vmem:[#allocation2 + $0x152] sm:$0xff]  ;;  %v13606_v41 = vld [vmem:[#allocation2 + $0x15a] sm:$0xff] }
 0x1ef   : > { %10555 = vmatmul.mubr.msk.f32.gmra.mrb[8].mxu0 %vm1014_vm0, %v13439_v44  ;;  %v4853_v52 = vld [vmem:[#allocation5 + $0x60] ss:$2 sm:$0xff]  ;;  %v4869_v53 = vld [vmem:[#allocation5 + $0x61] ss:$2 sm:$0xff]  ;;  %4840 = vst.msk [vmem:[#allocation5 + $0x78] sm:$0xff] %vm4743_vm3, %v4824_v42  ;;  %v13586_v34 = vld [vmem:[#allocation3 + $0x32] sm:$0xff] }
 0x1f0   : > { %10557 = vmatprep.mubr.msk.f32.mxu0 %vm1014_vm0, %v13443_v50  ;;  %v4878_v54 = vmax.f32 %v4853_v52, %v4869_v53  ;;  %4839 = vst.msk [vmem:[#allocation5 + $0x70] sm:$0xff] %vm4743_vm3, %v4823_v47  ;;  %v13590_v37 = vld [vmem:[#allocation2 + $0x142] sm:$0xff]  ;;  %v13614_v43 = vld [vmem:[#allocation2 + $0x16a] sm:$0xff]  ;;  %v13622_v52 = vld [vmem:[#allocation2 + $0x172] sm:$0xff] }
 0x1f1   : > { %v13449_v55 = vld [vmem:[#allocation3 + $0x60] sm:$0xff]  ;;  %v13602_v40 = vld [vmem:[#allocation3 + $0x52] sm:$0xff]  ;;  %v13653_v26 = vld [vmem:[#allocation2 + $0x38] sm:$0xff] }
 0x1f2   : > { %10991 = vmatprep.mubr.msk.f32.mxu1 %vm4743_vm3, %v13449_v55  ;;  %4914 = vst.msk [vmem:[#allocation3 + $0x71] sm:$0xff] %vm4743_vm3, %v4878_v54  ;;  %v13535_v20 = vld [vmem:[#allocation3 + $0x61] sm:$0xff]  ;;  %v9349_v4 = vld [vmem:[%s14800_s7 + $0xa0] sm:$0xff] }
 0x1f3   : > { %10558 = vmatmul.mubr.msk.f32.gmra.mrb[10].mxu0 %vm1014_vm0, %v13453_v56  ;;  %v13608_v42 = vld [vmem:[#allocation3 + $0x62] sm:$0xff]  ;;  %v2715_v31 = vld [vmem:[#allocation9 + $0x130] sm:$0xff] }
 0x1f4   : > { %10560 = vmatprep.mubr.msk.f32.mxu0 %vm1014_vm0, %v13458_v57  ;;  %v9339_v53 = vld [vmem:[%s14800_s7 + $0x90] sm:$0xff]  ;;  %v9340_v54 = vld [vmem:[%s14800_s7 + $0x98] sm:$0xff] }
 0x1f5   : > { %v2713_v13 = vld [vmem:[#allocation9 + $0x120] sm:$0xff] }
 0x1f7   : > { %10561 = vmatmul.mubr.msk.f32.gmra.mrb[12].mxu0 %vm1014_vm0, %v13462_v58  ;;  %v4855_v60 = vld [vmem:[#allocation5 + $0x70] ss:$2 sm:$0xff]  ;;  %v4871_v61 = vld [vmem:[#allocation5 + $0x71] ss:$2 sm:$0xff] }
 0x1f8   : > { %10563 = vmatprep.mubr.msk.f32.mxu0 %vm1014_vm0, %v13466_v59  ;;  %v4879_v63 = vmax.f32 %v4855_v60, %v4871_v61  ;;  %v2282_v60 = vld [vmem:[#allocation2 + $0x18] sm:$0xff]  ;;  %v2711_v61 = vld [vmem:[#allocation9 + $0x110] sm:$0xff] }
 0x1f9   : > { %v13470_v1 = vld [vmem:[#allocation3 + $0x70] sm:$0xff] }
 0x1fa   : > { %10992 = vmatmul.mubr.msk.f32.gmra.mrb[78].mxu1 %vm4743_vm3, %v13470_v1  ;;  %4915 = vst.msk [vmem:[#allocation3 + $0x81] sm:$0xff] %vm4743_vm3, %v4879_v63  ;;  %v13545_v9 = vld [vmem:[#allocation3 + $0x71] sm:$0xff]  ;;  %v11616_v63 = vpack.c.bf16 %v9340_v54, %v9339_v53  ;;  %v3103_v54 = vld [vmem:[#allocation9 + $0x140] sm:$0xff] }
 0x1fb   : > { %10564 = vmatmul.mubr.msk.f32.gmra.mrb[14].mxu0 %vm1014_vm0, %v13474_v2  ;;  %11002 = vmatprep.mubr.msk.f32.mxu1 %vm4743_vm3, %v5073_v62  ;;  %v13618_v47 = vld [vmem:[#allocation3 + $0x72] sm:$0xff] }
 0x1fc   : > { %10566 = vmatprep.mubr.msk.f32.mxu0 %vm1014_vm0, %v13485_v5  ;;  %v2712_v62 = vld [vmem:[#allocation9 + $0x118] sm:$0xff]  ;;  %v13671_v53 = vld [vmem:[#allocation2 + $0x60] sm:$0xff] }
 0x1fd   : > { %v11504_v11 = vpack.c.bf16 %v2712_v62, %v2711_v61  ;;  %v13679_v62 = vld [vmem:[#allocation2 + $0x68] sm:$0xff] }
 0x1fe   : > { %11003 = vmatmul.mubr.msk.f32.vlgmr.msra.gmra.mrb[72].mxu1 %vm4743_vm3, %v13490_v6 }
 0x1ff   : > { %10567 = vmatmul.mubr.msk.f32.gmra.mrb[16].mxu0 %vm1014_vm0, %v13492_v7  ;;  %11005 = vmatprep.mubr.msk.f32.mxu1 %vm4743_vm3, %v13496_v10 }
 0x200   : > { %11599 = vmatpush3.bf16.msra.mxu1 %v13362_v12  ;;  %10569 = vmatprep.mubr.msk.f32.mxu0 %vm1014_vm0, %v13508_v14  ;;  %v13525_v12 = vld [vmem:[#allocation2 + $0xf2] sm:$0xff] }
 0x201   : > { %11601 = vmatprep.subr.bf16.mxu1 %v11600_v8  ;;  %v13675_v61 = vld [vmem:[#allocation3 + $0x80] sm:$0xff] }
 0x202   : > { %11006 = vmatmul.mubr.msk.f32.gmra.mrb[74].mxu1 %vm4743_vm3, %v13513_v16 }
 0x203   : > { %10570 = vmatmul.mubr.msk.f32.gmra.mrb[18].mxu0 %vm1014_vm0, %v13517_v18  ;;  %11008 = vmatprep.mubr.msk.f32.mxu1 %vm4743_vm3, %v13519_v24 }
 0x204   : > { %10572 = vmatprep.mubr.msk.f32.mxu0 %vm1014_vm0, %v13525_v12  ;;  %11603 = vmatpush3.bf16.msra.mxu1 %v11600_v8  ;;  %v9350_v8 = vld [vmem:[%s14800_s7 + $0xa8] sm:$0xff] }
 0x205   : > { %11605 = vmatprep.subr.bf16.mxu1 %v11604_v17 }
 0x206   : > { %11009 = vmatmul.mubr.msk.f32.gmra.mrb[76].mxu1 %vm4743_vm3, %v13529_v19 }
 0x207   : > { %10573 = vmatmul.mubr.msk.f32.gmra.mrb[20].mxu0 %vm1014_vm0, %v13533_v51  ;;  %11011 = vmatprep.mubr.msk.f32.mxu1 %vm4743_vm3, %v13535_v20 }
 0x208   : > { %10575 = vmatprep.mubr.msk.f32.mxu0 %vm1014_vm0, %v13541_v21 }
 0x20a   : > { %11012 = vmatmul.mubr.msk.f32.gmra.mrb[78].mxu1 %vm4743_vm3, %v13545_v9 }
 0x20b   : > { %10576 = vmatmul.mubr.msk.f32.gmra.mrb[22].mxu0 %vm1014_vm0, %v13549_v23  ;;  %11022 = vmatprep.mubr.msk.f32.mxu1 %vm4743_vm3, %v5223_v22  ;;  %v11620_v22 = vpack.c.bf16 %v9350_v8, %v9349_v4  ;;  %v13693_v8 = vld [vmem:[#allocation2 + $0x78] sm:$0xff] }
 0x20c   : > { %10578 = vmatprep.mubr.msk.f32.mxu0 %vm1014_vm0, %v13559_v28 }
 0x20e   : > { %11023 = vmatmul.mubr.msk.f32.vlgmr.msra.gmra.mrb[72].mxu1 %vm4743_vm3, %v13564_v45 }
 0x20f   : > { %10579 = vmatmul.mubr.msk.f32.gmra.mrb[24].mxu0 %vm1014_vm0, %v13566_v29  ;;  %11025 = vmatprep.mubr.msk.f32.mxu1 %vm4743_vm3, %v13570_v48 }
 0x210   : > { %11607 = vmatpush3.bf16.msra.mxu1 %v11604_v17  ;;  %10581 = vmatprep.mubr.msk.f32.mxu0 %vm1014_vm0, %v13582_v32  ;;  %v2714_v17 = vld [vmem:[#allocation9 + $0x128] sm:$0xff] }
 0x211   : > { %11609 = vmatprep.subr.bf16.mxu1 %v11608_v30  ;;  %v11508_v27 = vpack.c.bf16 %v2714_v17, %v2713_v13  ;;  %v13699_v13 = vld [vmem:[#allocation2 + $0x80] sm:$0xff] }
 0x212   : > { %11026 = vmatmul.mubr.msk.f32.gmra.mrb[74].mxu1 %vm4743_vm3, %v13586_v34  ;;  %v9361_v17 = vld [vmem:[%s14800_s7 + $0xc0] sm:$0xff] }
 0x213   : > { %10582 = vmatmul.mubr.msk.f32.gmra.mrb[26].mxu0 %vm1014_vm0, %v13590_v37  ;;  %11028 = vmatprep.mubr.msk.f32.mxu1 %vm4743_vm3, %v13592_v38 }
 0x214   : > { %10584 = vmatprep.mubr.msk.f32.mxu0 %vm1014_vm0, %v13598_v39  ;;  %11611 = vmatpush3.bf16.msra.mxu1 %v11608_v30  ;;  %v13659_v30 = vld [vmem:[#allocation2 + $0x48] sm:$0xff] }
 0x215   : > { %11613 = vmatprep.subr.bf16.mxu1 %v11612_v35 }
 0x216   : > { %11029 = vmatmul.mubr.msk.f32.gmra.mrb[76].mxu1 %vm4743_vm3, %v13602_v40 }
 0x217   : > { %10585 = vmatmul.mubr.msk.f32.gmra.mrb[28].mxu0 %vm1014_vm0, %v13606_v41  ;;  %11031 = vmatprep.mubr.msk.f32.mxu1 %vm4743_vm3, %v13608_v42 }
 0x218   : > { %10587 = vmatprep.mubr.msk.f32.mxu0 %vm1014_vm0, %v13614_v43 }
 0x21a   : > { %11032 = vmatmul.mubr.msk.f32.gmra.mrb[78].mxu1 %vm4743_vm3, %v13618_v47 }
 0x21b   : > { %10588 = vmatmul.mubr.msk.f32.gmra.mrb[30].mxu0 %vm1014_vm0, %v13622_v52  ;;  %11042 = vmatprep.mubr.msk.f32.mxu1 %vm4743_vm3, %v13345_v0  ;;  %v13646_v0 = vld [vmem:[#allocation2 + $0x30] sm:$0xff] }
 0x21c   : > { %10606 = vmatprep.mubr.msk.f32.mxu0 %vm1014_vm0, %v2282_v60  ;;  %v3104_v60 = vld [vmem:[#allocation9 + $0x148] sm:$0xff] }
 0x21d   : > { %v13687_v4 = vpack.c.bf16 %v3104_v60, %v3103_v54  ;;  %v13736_v54 = vld [vmem:[#allocation2 + $0xc0] sm:$0xff]  ;;  %v13740_v60 = vld [vmem:[#allocation3 + $0x81] sm:$0xff] }
 0x21e   : > { %11043 = vmatmul.mubr.msk.f32.vlgmr.msra.gmra.mrb[72].mxu1 %vm4743_vm3, %v13374_v25  ;;  %14866 = vst [vmem:[#allocation19_spill] sm:$0xff] %v13736_v54 }
 0x21f   : > { %10607 = vmatmul.mubr.msk.f32.vlgmr.msra.gmra.mrb[0].mxu0 %vm1014_vm0, %v2283_v3  ;;  %11045 = vmatprep.mubr.msk.f32.mxu1 %vm4743_vm3, %v13393_v46  ;;  %v9352_v3 = vld [vmem:[%s14800_s7 + $0xb8] sm:$0xff] }
 0x220   : > { %11615 = vmatpush3.bf16.msra.mxu1 %v11612_v35  ;;  %10609 = vmatprep.mubr.msk.f32.mxu0 %vm1014_vm0, %v13646_v0  ;;  %v11512_v35 = vpack.c.bf16 %v2716_v33, %v2715_v31  ;;  %v13718_v33 = vld [vmem:[#allocation2 + $0x98] sm:$0xff] }
 0x221   : > { %11617 = vmatprep.subr.bf16.mxu1 %v11616_v63  ;;  %11503 = vmatpush3.bf16.msra.mxu0 %v13431_v36  ;;  %v13665_v36 = vld [vmem:[#allocation2 + $0x50] sm:$0xff] }
 0x222   : > { %11046 = vmatmul.mubr.msk.f32.gmra.mrb[74].mxu1 %vm4743_vm3, %v13412_v15  ;;  %11505 = vmatprep.subr.bf16.mxu0 %v11504_v11 }
 0x223   : > { %10610 = vmatmul.mubr.msk.f32.gmra.mrb[2].mxu0 %vm1014_vm0, %v13653_v26  ;;  %11048 = vmatprep.mubr.msk.f32.mxu1 %vm4743_vm3, %v13429_v49 }
 0x224   : > { %10612 = vmatprep.mubr.msk.f32.mxu0 %vm1014_vm0, %v13659_v30  ;;  %11619 = vmatpush3.bf16.msra.mxu1 %v11616_v63  ;;  %v9351_v63 = vld [vmem:[%s14800_s7 + $0xb0] sm:$0xff] }
 0x225   : > { %11621 = vmatprep.subr.bf16.mxu1 %v11620_v22  ;;  %11507 = vmatpush3.bf16.msra.mxu0 %v11504_v11  ;;  %v11624_v11 = vpack.c.bf16 %v9352_v3, %v9351_v63  ;;  %v13744_v63 = vld [vmem:[#allocation2 + $0xc8] sm:$0xff]  ;;  %v9363_v3 = vld [vmem:[%s14800_s7 + $0xd0] sm:$0xff] }
 0x226   : > { %11049 = vmatmul.mubr.msk.f32.gmra.mrb[76].mxu1 %vm4743_vm3, %v13449_v55  ;;  %11509 = vmatprep.subr.bf16.mxu0 %v11508_v27  ;;  %14867 = vst [vmem:[#allocation20_spill] sm:$0xff] %v13744_v63 }
 0x227   : > { %10613 = vmatmul.mubr.msk.f32.gmra.mrb[4].mxu0 %vm1014_vm0, %v13665_v36  ;;  %11051 = vmatprep.mubr.msk.f32.mxu1 %vm4743_vm3, %v13470_v1 }
 0x228   : > { %10615 = vmatprep.mubr.msk.f32.mxu0 %vm1014_vm0, %v13671_v53 }
 0x229   : > { %11511 = vmatpush3.bf16.msra.mxu0 %v11508_v27  ;;  %v13712_v27 = vld [vmem:[#allocation2 + $0x90] sm:$0xff] }
 0x22a   : > { %11052 = vmatmul.mubr.msk.f32.gmra.mrb[78].mxu1 %vm4743_vm3, %v13675_v61  ;;  %11513 = vmatprep.subr.bf16.mxu0 %v11512_v35 }
 0x22b   : > { %10616 = vmatmul.mubr.msk.f32.gmra.mrb[6].mxu0 %vm1014_vm0, %v13679_v62  ;;  %11062 = vmatprep.mubr.msk.f32.mxu1 %vm4743_vm3, %v13490_v6  ;;  %v9362_v6 = vld [vmem:[%s14800_s7 + $0xc8] sm:$0xff] }
 0x22c   : > { %10618 = vmatprep.mubr.msk.f32.mxu0 %vm1014_vm0, %v13693_v8  ;;  %v11628_v31 = vpack.c.bf16 %v9362_v6, %v9361_v17  ;;  %v13756_v17 = vld [vmem:[#allocation2 + $0xd8] sm:$0xff] }
 0x22d   : > { %11515 = vmatpush3.bf16.msra.mxu0 %v11512_v35  ;;  %v13724_v35 = vld [vmem:[#allocation2 + $0xa8] sm:$0xff]  ;;  %14868 = vst [vmem:[#allocation21_spill] sm:$0xff] %v13756_v17 }
 0x22e   : > { %11063 = vmatmul.mubr.msk.f32.vlgmr.msra.gmra.mrb[72].mxu1 %vm4743_vm3, %v13496_v10  ;;  %11517 = vmatprep.subr.bf16.mxu0 %v13687_v4 }
 0x22f   : > { %10619 = vmatmul.mubr.msk.f32.gmra.mrb[8].mxu0 %vm1014_vm0, %v13699_v13  ;;  %11065 = vmatprep.mubr.msk.f32.mxu1 %vm4743_vm3, %v13513_v16 }
 0x230   : > { %11623 = vmatpush3.bf16.msra.mxu1 %v11620_v22  ;;  %10621 = vmatprep.mubr.msk.f32.mxu0 %vm1014_vm0, %v13712_v27  ;;  %v13730_v22 = vld [vmem:[#allocation2 + $0xb0] sm:$0xff] }
 0x231   : > { %11625 = vmatprep.subr.bf16.mxu1 %v11624_v11  ;;  %14865 = vst [vmem:[#allocation18_spill] sm:$0xff] %v13730_v22 }
 0x232   : > { %11066 = vmatmul.mubr.msk.f32.gmra.mrb[74].mxu1 %vm4743_vm3, %v13519_v24 }
 0x233   : > { %10622 = vmatmul.mubr.msk.f32.gmra.mrb[10].mxu0 %vm1014_vm0, %v13718_v33  ;;  %11068 = vmatprep.mubr.msk.f32.mxu1 %vm4743_vm3, %v13529_v19 }
 0x234   : > { %10624 = vmatprep.mubr.msk.f32.mxu0 %vm1014_vm0, %v13724_v35  ;;  %11627 = vmatpush3.bf16.msra.mxu1 %v11624_v11  ;;  %v9364_v11 = vld [vmem:[%s14800_s7 + $0xd8] sm:$0xff] }
 0x235   : > { %11629 = vmatprep.subr.bf16.mxu1 %v11628_v31  ;;  %v11632_v6 = vpack.c.bf16 %v9364_v11, %v9363_v3  ;;  %v13780_v11 = vld [vmem:[#allocation2 + $0xf8] sm:$0xff] }
 0x236   : > { %11069 = vmatmul.mubr.msk.f32.gmra.mrb[76].mxu1 %vm4743_vm3, %v13535_v20  ;;  %14871 = vst [vmem:[#allocation24_spill] sm:$0xff] %v13780_v11 }
 0x237   : > { %10625 = vmatmul.mubr.msk.f32.gmra.mrb[12].mxu0 %vm1014_vm0, %v13730_v22  ;;  %11071 = vmatprep.mubr.msk.f32.mxu1 %vm4743_vm3, %v13545_v9  ;;  %v9373_v22 = vld [vmem:[%s14800_s7 + $0xe0] sm:$0xff] }
 0x238   : > { %10627 = vmatprep.mubr.msk.f32.mxu0 %vm1014_vm0, %v13736_v54  ;;  %v13762_v54 = vld [vmem:[#allocation2 + $0xe0] sm:$0xff] }
 0x239   : > { %14869 = vst [vmem:[#allocation22_spill] sm:$0xff] %v13762_v54 }
 0x23a   : > { %11072 = vmatmul.mubr.msk.f32.gmra.mrb[78].mxu1 %vm4743_vm3, %v13740_v60 }
 0x23b   : > { %10628 = vmatmul.mubr.msk.f32.gmra.mrb[14].mxu0 %vm1014_vm0, %v13744_v63  ;;  %11082 = vmatprep.mubr.msk.f32.mxu1 %vm4743_vm3, %v13564_v45  ;;  %v9374_v63 = vld [vmem:[%s14800_s7 + $0xe8] sm:$0xff]  ;;  %v13774_v45 = vld [vmem:[#allocation2 + $0xf0] sm:$0xff] }
 0x23c   : > { %10630 = vmatprep.mubr.msk.f32.mxu0 %vm1014_vm0, %v13756_v17  ;;  %14870 = vst [vmem:[#allocation23_spill] sm:$0xff] %v13774_v45  ;;  %v11636_v3 = vpack.c.bf16 %v9374_v63, %v9373_v22  ;;  %v13798_v22 = vld [vmem:[#allocation2 + $0x120] sm:$0xff]  ;;  %v13802_v63 = vld [vmem:[#allocation3 + $0x82] sm:$0xff] }
 0x23d   : > { %14874 = vst [vmem:[#allocation27_spill] sm:$0xff] %v13798_v22  ;;  %v9385_v17 = vld [vmem:[%s14800_s7 + $0x100] sm:$0xff] }
 0x23e   : > { %11083 = vmatmul.mubr.msk.f32.vlgmr.msra.gmra.mrb[72].mxu1 %vm4743_vm3, %v13570_v48 }
 0x23f   : > { %10631 = vmatmul.mubr.msk.f32.gmra.mrb[16].mxu0 %vm1014_vm0, %v13762_v54  ;;  %11085 = vmatprep.mubr.msk.f32.mxu1 %vm4743_vm3, %v13586_v34  ;;  %v13786_v54 = vld [vmem:[#allocation2 + $0x108] sm:$0xff] }
 0x240   : > { %11631 = vmatpush3.bf16.msra.mxu1 %v11628_v31  ;;  %10633 = vmatprep.mubr.msk.f32.mxu0 %vm1014_vm0, %v13774_v45  ;;  %14872 = vst [vmem:[#allocation25_spill] sm:$0xff] %v13786_v54  ;;  %v13792_v31 = vld [vmem:[#allocation2 + $0x110] sm:$0xff]  ;;  %v13824_v45 = vld [vmem:[#allocation2 + $0x140] sm:$0xff] }
 0x241   : > { %11633 = vmatprep.subr.bf16.mxu1 %v11632_v6  ;;  %14873 = vst [vmem:[#allocation26_spill] sm:$0xff] %v13792_v31 }
 0x242   : > { %11086 = vmatmul.mubr.msk.f32.gmra.mrb[74].mxu1 %vm4743_vm3, %v13592_v38 }
 0x243   : > { %10634 = vmatmul.mubr.msk.f32.gmra.mrb[18].mxu0 %vm1014_vm0, %v13780_v11  ;;  %11088 = vmatprep.mubr.msk.f32.mxu1 %vm4743_vm3, %v13602_v40 }
 0x244   : > { %10636 = vmatprep.mubr.msk.f32.mxu0 %vm1014_vm0, %v13786_v54  ;;  %11635 = vmatpush3.bf16.msra.mxu1 %v11632_v6  ;;  %v13806_v6 = vld [vmem:[#allocation2 + $0x128] sm:$0xff]  ;;  %v9375_v54 = vld [vmem:[%s14800_s7 + $0xf0] sm:$0xff] }
 0x245   : > { %11637 = vmatprep.subr.bf16.mxu1 %v11636_v3  ;;  %14875 = vst [vmem:[#allocation28_spill] sm:$0xff] %v13806_v6 }
 0x246   : > { %11089 = vmatmul.mubr.msk.f32.gmra.mrb[76].mxu1 %vm4743_vm3, %v13608_v42 }
 0x247   : > { %10637 = vmatmul.mubr.msk.f32.gmra.mrb[20].mxu0 %vm1014_vm0, %v13792_v31  ;;  %11091 = vmatprep.mubr.msk.f32.mxu1 %vm4743_vm3, %v13618_v47  ;;  %v9376_v31 = vld [vmem:[%s14800_s7 + $0xf8] sm:$0xff] }
 0x248   : > { %10639 = vmatprep.mubr.msk.f32.mxu0 %vm1014_vm0, %v13798_v22  ;;  %v13818_v22 = vld [vmem:[#allocation2 + $0x138] sm:$0xff]  ;;  %v11640_v11 = vpack.c.bf16 %v9376_v31, %v9375_v54  ;;  %v3105_v31 = vld [vmem:[#allocation9 + $0x150] sm:$0xff] }
 0x249   : > { %v13842_v54 = vld [vmem:[#allocation2 + $0x158] sm:$0xff] }
 0x24a   : > { %11092 = vmatmul.mubr.msk.f32.gmra.mrb[78].mxu1 %vm4743_vm3, %v13802_v63 }
 0x24b   : > { %10640 = vmatmul.mubr.msk.f32.gmra.mrb[22].mxu0 %vm1014_vm0, %v13806_v6  ;;  %11102 = vmatprep.mubr.msk.f32.mxu1 %vm4743_vm3, %v13374_v25  ;;  %v9386_v6 = vld [vmem:[%s14800_s7 + $0x108] sm:$0xff]  ;;  %v13836_v25 = vld [vmem:[#allocation2 + $0x150] sm:$0xff] }
 0x24c   : > { %10642 = vmatprep.mubr.msk.f32.mxu0 %vm1014_vm0, %v13818_v22 }
 0x24e   : > { %11103 = vmatmul.mubr.msk.f32.vlgmr.msra.gmra.mrb[72].mxu1 %vm4743_vm3, %v13393_v46  ;;  %v11644_v46 = vpack.c.bf16 %v9386_v6, %v9385_v17  ;;  %v13854_v17 = vld [vmem:[#allocation2 + $0x170] sm:$0xff]  ;;  %v3106_v6 = vld [vmem:[#allocation9 + $0x158] sm:$0xff] }
 0x24f   : > { %10643 = vmatmul.mubr.msk.f32.gmra.mrb[24].mxu0 %vm1014_vm0, %v13824_v45  ;;  %11105 = vmatprep.mubr.msk.f32.mxu1 %vm4743_vm3, %v13412_v15  ;;  %v13848_v15 = vld [vmem:[#allocation2 + $0x168] sm:$0xff]  ;;  %14877 = vst [vmem:[#allocation30_spill] sm:$0xff] %v13854_v17 }
 0x250   : > { %11639 = vmatpush3.bf16.msra.mxu1 %v11636_v3  ;;  %10645 = vmatprep.mubr.msk.f32.mxu0 %vm1014_vm0, %v13836_v25  ;;  %14876 = vst [vmem:[#allocation29_spill] sm:$0xff] %v13848_v15  ;;  %v13865_v3 = vld [vmem:[#allocation2 + $0x188] sm:$0xff] }
 0x251   : > { %11641 = vmatprep.subr.bf16.mxu1 %v11640_v11  ;;  %14879 = vst [vmem:[#allocation32_spill] sm:$0xff] %v13865_v3 }
 0x252   : > { %11106 = vmatmul.mubr.msk.f32.gmra.mrb[74].mxu1 %vm4743_vm3, %v13429_v49  ;;  %v13860_v49 = vld [vmem:[#allocation2 + $0x180] sm:$0xff] }
 0x253   : > { %10646 = vmatmul.mubr.msk.f32.gmra.mrb[26].mxu0 %vm1014_vm0, %v13842_v54  ;;  %11108 = vmatprep.mubr.msk.f32.mxu1 %vm4743_vm3, %v13449_v55  ;;  %14878 = vst [vmem:[#allocation31_spill] sm:$0xff] %v13860_v49  ;;  %v5831_v55 = vld [vmem:[#allocation3 + $0x90] sm:$0xff] }
 0x254   : > { %10648 = vmatprep.mubr.msk.f32.mxu0 %vm1014_vm0, %v13848_v15  ;;  %11643 = vmatpush3.bf16.msra.mxu1 %v11640_v11  ;;  %v9388_v11 = vld [vmem:[%s14800_s7 + $0x118] sm:$0xff]  ;;  %v3107_v15 = vld [vmem:[#allocation9 + $0x160] sm:$0xff] }
 0x255   : > { %11645 = vmatprep.subr.bf16.mxu1 %v11644_v46 }
 0x256   : > { %11109 = vmatmul.mubr.msk.f32.gmra.mrb[76].mxu1 %vm4743_vm3, %v13470_v1  ;;  %v9387_v1 = vld [vmem:[%s14800_s7 + $0x110] sm:$0xff] }
 0x257   : > { %10649 = vmatmul.mubr.msk.f32.gmra.mrb[28].mxu0 %vm1014_vm0, %v13854_v17  ;;  %11111 = vmatprep.mubr.msk.f32.mxu1 %vm4743_vm3, %v13675_v61  ;;  %v2676_v61 = vld [vmem:[#allocation2 + $0x19] sm:$0xff]  ;;  %v11520_v17 = vpack.c.bf16 %v3106_v6, %v3105_v31  ;;  %v13927_v31 = vld [vmem:[#allocation2 + $0x81] sm:$0xff] }
 0x258   : > { %10651 = vmatprep.mubr.msk.f32.mxu0 %vm1014_vm0, %v13860_v49  ;;  %v2677_v49 = vld [vmem:[#allocation2 + $0x21] sm:$0xff] }
 0x25a   : > { %11112 = vmatmul.mubr.msk.f32.gmra.mrb[78].mxu1 %vm4743_vm3, %v5831_v55  ;;  %v11648_v55 = vpack.c.bf16 %v9388_v11, %v9387_v1  ;;  %v3110_v1 = vld [vmem:[#allocation9 + $0x178] sm:$0xff]  ;;  %v3498_v11 = vld [vmem:[#allocation9 + $0x180] sm:$0xff] }
 0x25b   : > { %10652 = vmatmul.mubr.msk.f32.gmra.mrb[30].mxu0 %vm1014_vm0, %v13865_v3  ;;  %11122 = vmatprep.mubr.msk.f32.mxu1 %vm4743_vm3, %v13496_v10  ;;  %v13883_v3 = vld [vmem:[#allocation2 + $0x31] sm:$0xff] }
 0x25c   : > { %10670 = vmatprep.mubr.msk.f32.mxu0 %vm1014_vm0, %v2676_v61  ;;  %v3108_v10 = vld [vmem:[#allocation9 + $0x168] sm:$0xff] }
 0x25d   : > { %v3499_v61 = vld [vmem:[#allocation9 + $0x188] sm:$0xff] }
 0x25e   : > { %11123 = vmatmul.mubr.msk.f32.vlgmr.msra.gmra.mrb[72].mxu1 %vm4743_vm3, %v13513_v16  ;;  %v13890_v16 = vld [vmem:[#allocation2 + $0x39] sm:$0xff] }
 0x25f   : > { %10671 = vmatmul.mubr.msk.f32.vlgmr.msra.gmra.mrb[0].mxu0 %vm1014_vm0, %v2677_v49  ;;  %11125 = vmatprep.mubr.msk.f32.mxu1 %vm4743_vm3, %v13519_v24  ;;  %v11524_v49 = vpack.c.bf16 %v3108_v10, %v3107_v15  ;;  %v13896_v24 = vld [vmem:[#allocation2 + $0x49] sm:$0xff] }
 0x260   : > { %11647 = vmatpush3.bf16.msra.mxu1 %v11644_v46  ;;  %10673 = vmatprep.mubr.msk.f32.mxu0 %vm1014_vm0, %v13883_v3  ;;  %v3109_v46 = vld [vmem:[#allocation9 + $0x170] sm:$0xff] }
 0x261   : > { %11649 = vmatprep.subr.bf16.mxu1 %v11648_v55  ;;  %11519 = vmatpush3.bf16.msra.mxu0 %v13687_v4  ;;  %v13904_v4 = vld [vmem:[#allocation2 + $0x61] sm:$0xff]  ;;  %v11528_v15 = vpack.c.bf16 %v3110_v1, %v3109_v46 }
 0x262   : > { %11126 = vmatmul.mubr.msk.f32.gmra.mrb[74].mxu1 %vm4743_vm3, %v13529_v19  ;;  %11521 = vmatprep.subr.bf16.mxu0 %v11520_v17  ;;  %v13902_v19 = vld [vmem:[#allocation2 + $0x51] sm:$0xff]  ;;  %v6131_v46 = vld [vmem:[#allocation3 + $0x92] sm:$0xff] }
 0x263   : > { %10674 = vmatmul.mubr.msk.f32.gmra.mrb[2].mxu0 %vm1014_vm0, %v13890_v16  ;;  %11128 = vmatprep.mubr.msk.f32.mxu1 %vm4743_vm3, %v13535_v20  ;;  %v5981_v20 = vld [vmem:[#allocation3 + $0x91] sm:$0xff] }
 0x264   : > { %10676 = vmatprep.mubr.msk.f32.mxu0 %vm1014_vm0, %v13896_v24  ;;  %11651 = vmatpush3.bf16.msra.mxu1 %v11648_v55 }
 0x265   : > { %11523 = vmatpush3.bf16.msra.mxu0 %v11520_v17  ;;  %v13915_v17 = vpack.c.bf16 %v3499_v61, %v3498_v11  ;;  %v13985_v11 = vld [vmem:[#allocation2 + $0xe1] sm:$0xff] }
 0x266   : > { %11129 = vmatmul.mubr.msk.f32.gmra.mrb[76].mxu1 %vm4743_vm3, %v13545_v9  ;;  %11525 = vmatprep.subr.bf16.mxu0 %v11524_v49  ;;  %v13913_v9 = vld [vmem:[#allocation2 + $0x69] sm:$0xff]  ;;  %14889 = vst [vmem:[#allocation42_spill] sm:$0xff] %v13985_v11 }
 0x267   : > { %10677 = vmatmul.mubr.msk.f32.gmra.mrb[4].mxu0 %vm1014_vm0, %v13902_v19  ;;  %11131 = vmatprep.mubr.msk.f32.mxu1 %vm4743_vm3, %v13740_v60  ;;  %v13921_v60 = vld [vmem:[#allocation2 + $0x79] sm:$0xff] }
 0x268   : > { %10679 = vmatprep.mubr.msk.f32.mxu0 %vm1014_vm0, %v13904_v4 }
 0x269   : > { %11527 = vmatpush3.bf16.msra.mxu0 %v11524_v49 }
 0x26a   : > { %11132 = vmatmul.mubr.msk.f32.gmra.mrb[78].mxu1 %vm4743_vm3, %v5981_v20  ;;  %11529 = vmatprep.subr.bf16.mxu0 %v11528_v15  ;;  %v13979_v20 = vld [vmem:[#allocation2 + $0xd9] sm:$0xff] }
 0x26b   : > { %10680 = vmatmul.mubr.msk.f32.gmra.mrb[6].mxu0 %vm1014_vm0, %v13913_v9  ;;  %11142 = vmatprep.mubr.msk.f32.mxu1 %vm4743_vm3, %v13570_v48  ;;  %v13934_v48 = vld [vmem:[#allocation2 + $0x91] sm:$0xff]  ;;  %14887 = vst [vmem:[#allocation40_spill] sm:$0xff] %v13979_v20 }
 0x26c   : > { %10682 = vmatprep.mubr.msk.f32.mxu0 %vm1014_vm0, %v13921_v60 }
 0x26d   : > { %11531 = vmatpush3.bf16.msra.mxu0 %v11528_v15 }
 0x26e   : > { %11143 = vmatmul.mubr.msk.f32.vlgmr.msra.gmra.mrb[72].mxu1 %vm4743_vm3, %v13586_v34  ;;  %11533 = vmatprep.subr.bf16.mxu0 %v13915_v17  ;;  %v13942_v34 = vld [vmem:[#allocation2 + $0x99] sm:$0xff] }
 0x26f   : > { %10683 = vmatmul.mubr.msk.f32.gmra.mrb[8].mxu0 %vm1014_vm0, %v13927_v31  ;;  %11145 = vmatprep.mubr.msk.f32.mxu1 %vm4743_vm3, %v13592_v38  ;;  %v13950_v38 = vld [vmem:[#allocation2 + $0xa9] sm:$0xff] }
 0x270   : > { %10685 = vmatprep.mubr.msk.f32.mxu0 %vm1014_vm0, %v13934_v48 }
 0x272   : > { %v13938_v6 = vpop.f32.mrb[64].mxu1  ;;  %11146 = vmatmul.mubr.msk.f32.gmra.mrb[74].mxu1 %vm4743_vm3, %v13602_v40  ;;  %v13958_v40 = vld [vmem:[#allocation2 + $0xb1] sm:$0xff] }
 0x273   : > { %14880 = vst [vmem:[#allocation33_spill] sm:$0xff] %v13938_v6  ;;  %v13944_v55 = vpop.f32.mrb[65].mxu1  ;;  %10686 = vmatmul.mubr.msk.f32.gmra.mrb[10].mxu0 %vm1014_vm0, %v13942_v34  ;;  %11148 = vmatprep.mubr.msk.f32.mxu1 %vm4743_vm3, %v13608_v42  ;;  %v13966_v42 = vld [vmem:[#allocation2 + $0xc1] sm:$0xff]  ;;  %v14023_v6 = vld [vmem:[#allocation2 + $0x151] sm:$0xff] }
 0x274   : > { %14881 = vst [vmem:[#allocation34_spill] sm:$0xff] %v13944_v55  ;;  %10688 = vmatprep.mubr.msk.f32.mxu0 %vm1014_vm0, %v13950_v38  ;;  %v14019_v55 = vld [vmem:[#allocation2 + $0x141] sm:$0xff]  ;;  %14899 = vst [vmem:[#allocation52_spill] sm:$0xff] %v14023_v6 }
 0x275   : > { %14898 = vst [vmem:[#allocation51_spill] sm:$0xff] %v14019_v55 }
 0x276   : > { %v13954_v10 = vpop.f32.mrb[66].mxu1  ;;  %11149 = vmatmul.mubr.msk.f32.gmra.mrb[76].mxu1 %vm4743_vm3, %v13618_v47  ;;  %v13973_v47 = vld [vmem:[#allocation2 + $0xc9] sm:$0xff] }
 0x277   : > { %14882 = vst [vmem:[#allocation35_spill] sm:$0xff] %v13954_v10  ;;  %v13960_v49 = vpop.f32.mrb[67].mxu1  ;;  %10689 = vmatmul.mubr.msk.f32.gmra.mrb[12].mxu0 %vm1014_vm0, %v13958_v40  ;;  %11151 = vmatprep.mubr.msk.f32.mxu1 %vm4743_vm3, %v13802_v63  ;;  %14885 = vst [vmem:[#allocation38_spill] sm:$0xff] %v13973_v47  ;;  %v14015_v10 = vld [vmem:[#allocation2 + $0x139] sm:$0xff] }
 0x278   : > { %14883 = vst [vmem:[#allocation36_spill] sm:$0xff] %v13960_v49  ;;  %10691 = vmatprep.mubr.msk.f32.mxu0 %vm1014_vm0, %v13966_v42  ;;  %v14011_v49 = vld [vmem:[#allocation2 + $0x129] sm:$0xff]  ;;  %14897 = vst [vmem:[#allocation50_spill] sm:$0xff] %v14015_v10 }
 0x279   : > { %14896 = vst [vmem:[#allocation49_spill] sm:$0xff] %v14011_v49 }
 0x27a   : > { %v13970_v1 = vpop.f32.mrb[68].mxu1  ;;  %11152 = vmatmul.mubr.msk.f32.gmra.mrb[78].mxu1 %vm4743_vm3, %v6131_v46  ;;  %v13991_v46 = vld [vmem:[#allocation2 + $0xf1] sm:$0xff] }
 0x27b   : > { %14884 = vst [vmem:[#allocation37_spill] sm:$0xff] %v13970_v1  ;;  %v13975_v15 = vpop.f32.mrb[69].mxu1  ;;  %10692 = vmatmul.mubr.msk.f32.gmra.mrb[14].mxu0 %vm1014_vm0, %v13973_v47  ;;  %14891 = vst [vmem:[#allocation44_spill] sm:$0xff] %v13991_v46  ;;  %v13999_v1 = vld [vmem:[#allocation2 + $0x109] sm:$0xff] }
 0x27c   : > { %14886 = vst [vmem:[#allocation39_spill] sm:$0xff] %v13975_v15  ;;  %10694 = vmatprep.mubr.msk.f32.mxu0 %vm1014_vm0, %v13979_v20  ;;  %v13995_v15 = vld [vmem:[#allocation2 + $0xf9] sm:$0xff]  ;;  %14893 = vst [vmem:[#allocation46_spill] sm:$0xff] %v13999_v1  ;;  %v3505_v47 = vld [vmem:[#allocation9 + $0x1b8] sm:$0xff] }
 0x27d   : > { %14892 = vst [vmem:[#allocation45_spill] sm:$0xff] %v13995_v15  ;;  %v14054_v20 = vld [vmem:[#allocation2 + $0x3a] sm:$0xff] }
 0x27e   : > { %v13983_v63 = vpop.f32.mrb[70].mxu1 }
 0x27f   : > { %14888 = vst [vmem:[#allocation41_spill] sm:$0xff] %v13983_v63  ;;  %v13987_v61 = vpop.f32.mrb[71].mxu1  ;;  %10695 = vmatmul.mubr.msk.f32.gmra.mrb[16].mxu0 %vm1014_vm0, %v13985_v11  ;;  %v14003_v63 = vld [vmem:[#allocation2 + $0x111] sm:$0xff] }
 0x280   : > { %14890 = vst [vmem:[#allocation43_spill] sm:$0xff] %v13987_v61  ;;  %10697 = vmatprep.mubr.msk.f32.mxu0 %vm1014_vm0, %v13991_v46  ;;  %14894 = vst [vmem:[#allocation47_spill] sm:$0xff] %v14003_v63  ;;  %v14007_v61 = vld [vmem:[#allocation2 + $0x121] sm:$0xff]  ;;  %v3502_v46 = vld [vmem:[#allocation9 + $0x1a0] sm:$0xff] }
 0x281   : > { %14895 = vst [vmem:[#allocation48_spill] sm:$0xff] %v14007_v61  ;;  %v3503_v11 = vld [vmem:[#allocation9 + $0x1a8] sm:$0xff] }
 0x283   : > { %10698 = vmatmul.mubr.msk.f32.gmra.mrb[18].mxu0 %vm1014_vm0, %v13995_v15  ;;  %v3071_v15 = vld [vmem:[#allocation2 + $0x22] sm:$0xff] }
 0x284   : > { %10700 = vmatprep.mubr.msk.f32.mxu0 %vm1014_vm0, %v13999_v1  ;;  %v3501_v1 = vld [vmem:[#allocation9 + $0x198] sm:$0xff] }
 0x287   : > { %10701 = vmatmul.mubr.msk.f32.gmra.mrb[20].mxu0 %vm1014_vm0, %v14003_v63  ;;  %v3500_v63 = vld [vmem:[#allocation9 + $0x190] sm:$0xff] }
 0x288   : > { %10703 = vmatprep.mubr.msk.f32.mxu0 %vm1014_vm0, %v14007_v61  ;;  %v14027_v61 = vld [vmem:[#allocation2 + $0x159] sm:$0xff] }
 0x289   : > { %14900 = vst [vmem:[#allocation53_spill] sm:$0xff] %v14027_v61 }
 0x28b   : > { %10704 = vmatmul.mubr.msk.f32.gmra.mrb[22].mxu0 %vm1014_vm0, %v14011_v49  ;;  %v14031_v49 = vld [vmem:[#allocation2 + $0x169] sm:$0xff] }
 0x28c   : > { %10706 = vmatprep.mubr.msk.f32.mxu0 %vm1014_vm0, %v14015_v10  ;;  %14901 = vst [vmem:[#allocation54_spill] sm:$0xff] %v14031_v49  ;;  %v14035_v10 = vld [vmem:[#allocation2 + $0x171] sm:$0xff] }
 0x28d   : > { %14902 = vst [vmem:[#allocation55_spill] sm:$0xff] %v14035_v10 }
 0x28f   : > { %10707 = vmatmul.mubr.msk.f32.gmra.mrb[24].mxu0 %vm1014_vm0, %v14019_v55  ;;  %v14039_v55 = vld [vmem:[#allocation2 + $0x181] sm:$0xff] }
 0x290   : > { %10709 = vmatprep.mubr.msk.f32.mxu0 %vm1014_vm0, %v14023_v6  ;;  %14903 = vst [vmem:[#allocation56_spill] sm:$0xff] %v14039_v55  ;;  %v14043_v6 = vld [vmem:[#allocation2 + $0x189] sm:$0xff] }
 0x291   : > { %14904 = vst [vmem:[#allocation57_spill] sm:$0xff] %v14043_v6 }
 0x293   : > { %10710 = vmatmul.mubr.msk.f32.gmra.mrb[26].mxu0 %vm1014_vm0, %v14027_v61  ;;  %v3070_v61 = vld [vmem:[#allocation2 + $0x1a] sm:$0xff] }
 0x294   : > { %10712 = vmatprep.mubr.msk.f32.mxu0 %vm1014_vm0, %v14031_v49  ;;  %v11536_v49 = vpack.c.bf16 %v3501_v1, %v3500_v63  ;;  %v14058_v1 = vld [vmem:[#allocation2 + $0x4a] sm:$0xff]  ;;  %v14062_v63 = vld [vmem:[#allocation2 + $0x52] sm:$0xff] }
 0x297   : > { %10713 = vmatmul.mubr.msk.f32.gmra.mrb[28].mxu0 %vm1014_vm0, %v14035_v10  ;;  %v14049_v10 = vld [vmem:[#allocation2 + $0x32] sm:$0xff] }
 0x298   : > { %10715 = vmatprep.mubr.msk.f32.mxu0 %vm1014_vm0, %v14039_v55  ;;  %v11540_v55 = vpack.c.bf16 %v3503_v11, %v3502_v46  ;;  %v14066_v11 = vld [vmem:[#allocation2 + $0x62] sm:$0xff] }
 0x29b   : > { %10716 = vmatmul.mubr.msk.f32.gmra.mrb[30].mxu0 %vm1014_vm0, %v14043_v6  ;;  %v3504_v6 = vld [vmem:[#allocation9 + $0x1b0] sm:$0xff] }
 0x29c   : > { %10734 = vmatprep.mubr.msk.f32.mxu0 %vm1014_vm0, %v3070_v61  ;;  %v3893_v61 = vld [vmem:[#allocation9 + $0x1c8] sm:$0xff] }
 0x29f   : > { %10735 = vmatmul.mubr.msk.f32.vlgmr.msra.gmra.mrb[0].mxu0 %vm1014_vm0, %v3071_v15  ;;  %v11544_v15 = vpack.c.bf16 %v3505_v47, %v3504_v6  ;;  %v4293_v6 = vld [vmem:[#allocation9 + $0x238] sm:$0xff] }
 0x2a0   : > { %10737 = vmatprep.mubr.msk.f32.mxu0 %vm1014_vm0, %v14049_v10  ;;  %11535 = vmatpush3.bf16.msra.mxu0 %v13915_v17  ;;  %v3892_v17 = vld [vmem:[#allocation9 + $0x1c0] sm:$0xff] }
 0x2a1   : > { %11537 = vmatprep.subr.bf16.mxu0 %v11536_v49  ;;  %v11548_v46 = vpack.c.bf16 %v3893_v61, %v3892_v17 }
 0x2a3   : > { %10738 = vmatmul.mubr.msk.f32.gmra.mrb[2].mxu0 %vm1014_vm0, %v14054_v20 }
 0x2a4   : > { %10740 = vmatprep.mubr.msk.f32.mxu0 %vm1014_vm0, %v14058_v1  ;;  %11539 = vmatpush3.bf16.msra.mxu0 %v11536_v49 }
 0x2a5   : > { %11541 = vmatprep.subr.bf16.mxu0 %v11540_v55 }
 0x2a7   : > { %10741 = vmatmul.mubr.msk.f32.gmra.mrb[4].mxu0 %vm1014_vm0, %v14062_v63 }
 0x2a8   : > { %10743 = vmatprep.mubr.msk.f32.mxu0 %vm1014_vm0, %v14066_v11  ;;  %11543 = vmatpush3.bf16.msra.mxu0 %v11540_v55 }
 0x2a9   : > { %11545 = vmatprep.subr.bf16.mxu0 %v11544_v15 }
 0x2ab   : > { %10744 = vmatmul.mubr.msk.f32.gmra.mrb[6].mxu0 %vm1014_vm0, %v13439_v44  ;;  %v14116_v44 = vld [vmem:[#allocation2 + $0x182] sm:$0xff] }
 0x2ac   : > { %10746 = vmatprep.mubr.msk.f32.mxu0 %vm1014_vm0, %v13443_v50  ;;  %11547 = vmatpush3.bf16.msra.mxu0 %v11544_v15  ;;  %v14120_v50 = vld [vmem:[#allocation2 + $0x18a] sm:$0xff] }
 0x2ad   : > { %11549 = vmatprep.subr.bf16.mxu0 %v11548_v46 }
 0x2af   : > { %10747 = vmatmul.mubr.msk.f32.gmra.mrb[8].mxu0 %vm1014_vm0, %v13453_v56  ;;  %v3894_v56 = vld [vmem:[#allocation9 + $0x1d0] sm:$0xff] }
 0x2b0   : > { %10749 = vmatprep.mubr.msk.f32.mxu0 %vm1014_vm0, %v13458_v57  ;;  %v3895_v57 = vld [vmem:[#allocation9 + $0x1d8] sm:$0xff] }
 0x2b3   : > { %10750 = vmatmul.mubr.msk.f32.gmra.mrb[10].mxu0 %vm1014_vm0, %v13462_v58  ;;  %v11552_v58 = vpack.c.bf16 %v3895_v57, %v3894_v56  ;;  %v14928_v57 = vld [vmem:[#allocation49_spill] sm:$0xff] }
 0x2b4   : > { %10752 = vmatprep.mubr.msk.f32.mxu0 %vm1014_vm0, %v13466_v59  ;;  %v3896_v59 = vld [vmem:[#allocation9 + $0x1e0] sm:$0xff] }
 0x2b7   : > { %10753 = vmatmul.mubr.msk.f32.gmra.mrb[12].mxu0 %vm1014_vm0, %v13474_v2  ;;  %v3897_v2 = vld [vmem:[#allocation9 + $0x1e8] sm:$0xff] }
 0x2b8   : > { %10755 = vmatprep.mubr.msk.f32.mxu0 %vm1014_vm0, %v13485_v5  ;;  %v11556_v5 = vpack.c.bf16 %v3897_v2, %v3896_v59 }
 0x2bb   : > { %10756 = vmatmul.mubr.msk.f32.gmra.mrb[14].mxu0 %vm1014_vm0, %v13492_v7  ;;  %v3898_v7 = vld [vmem:[#allocation9 + $0x1f0] sm:$0xff] }
 0x2bc   : > { %10758 = vmatprep.mubr.msk.f32.mxu0 %vm1014_vm0, %v13508_v14  ;;  %v3899_v14 = vld [vmem:[#allocation9 + $0x1f8] sm:$0xff] }
 0x2bf   : > { %10759 = vmatmul.mubr.msk.f32.gmra.mrb[16].mxu0 %vm1014_vm0, %v13517_v18  ;;  %v11560_v18 = vpack.c.bf16 %v3899_v14, %v3898_v7  ;;  %v14929_v7 = vld [vmem:[#allocation50_spill] sm:$0xff] }
 0x2c0   : > { %10761 = vmatprep.mubr.msk.f32.mxu0 %vm1014_vm0, %v13525_v12  ;;  %v4286_v12 = vld [vmem:[#allocation9 + $0x200] sm:$0xff] }
 0x2c3   : > { %10762 = vmatmul.mubr.msk.f32.gmra.mrb[18].mxu0 %vm1014_vm0, %v13533_v51  ;;  %v4287_v51 = vld [vmem:[#allocation9 + $0x208] sm:$0xff] }
 0x2c4   : > { %10764 = vmatprep.mubr.msk.f32.mxu0 %vm1014_vm0, %v13541_v21  ;;  %v11564_v21 = vpack.c.bf16 %v4287_v51, %v4286_v12 }
 0x2c7   : > { %10765 = vmatmul.mubr.msk.f32.gmra.mrb[20].mxu0 %vm1014_vm0, %v13549_v23  ;;  %v14905_v23 = vld [vmem:[#allocation18_spill] sm:$0xff] }
 0x2c8   : > { %10767 = vmatprep.mubr.msk.f32.mxu0 %vm1014_vm0, %v13559_v28  ;;  %v14906_v28 = vld [vmem:[#allocation19_spill] sm:$0xff] }
 0x2cb   : > { %10768 = vmatmul.mubr.msk.f32.gmra.mrb[22].mxu0 %vm1014_vm0, %v13566_v29  ;;  %v14907_v29 = vld [vmem:[#allocation20_spill] sm:$0xff] }
 0x2cc   : > { %10770 = vmatprep.mubr.msk.f32.mxu0 %vm1014_vm0, %v13582_v32  ;;  %v14908_v32 = vld [vmem:[#allocation21_spill] sm:$0xff] }
 0x2cf   : > { %10771 = vmatmul.mubr.msk.f32.gmra.mrb[24].mxu0 %vm1014_vm0, %v13590_v37  ;;  %v14909_v37 = vld [vmem:[#allocation22_spill] sm:$0xff] }
 0x2d0   : > { %10773 = vmatprep.mubr.msk.f32.mxu0 %vm1014_vm0, %v13598_v39  ;;  %v14910_v39 = vld [vmem:[#allocation23_spill] sm:$0xff] }
 0x2d3   : > { %10774 = vmatmul.mubr.msk.f32.gmra.mrb[26].mxu0 %vm1014_vm0, %v13606_v41  ;;  %v14911_v41 = vld [vmem:[#allocation24_spill] sm:$0xff] }
 0x2d4   : > { %10776 = vmatprep.mubr.msk.f32.mxu0 %vm1014_vm0, %v13614_v43  ;;  %v14912_v43 = vld [vmem:[#allocation25_spill] sm:$0xff] }
 0x2d7   : > { %10777 = vmatmul.mubr.msk.f32.gmra.mrb[28].mxu0 %vm1014_vm0, %v13622_v52  ;;  %v14913_v52 = vld [vmem:[#allocation26_spill] sm:$0xff] }
 0x2d8   : > { %10779 = vmatprep.mubr.msk.f32.mxu0 %vm1014_vm0, %v14116_v44 }
 0x2db   : > { %10780 = vmatmul.mubr.msk.f32.gmra.mrb[30].mxu0 %vm1014_vm0, %v14120_v50 }
 0x2dc   : > { %10798 = vmatprep.mubr.msk.f32.mxu0 %vm1014_vm0, %v13646_v0  ;;  %v14914_v0 = vld [vmem:[#allocation27_spill] sm:$0xff] }
 0x2df   : > { %10799 = vmatmul.mubr.msk.f32.vlgmr.msra.gmra.mrb[0].mxu0 %vm1014_vm0, %v13653_v26  ;;  %v14915_v26 = vld [vmem:[#allocation28_spill] sm:$0xff] }
 0x2e0   : > { %10801 = vmatprep.mubr.msk.f32.mxu0 %vm1014_vm0, %v13659_v30  ;;  %11551 = vmatpush3.bf16.msra.mxu0 %v11548_v46  ;;  %v14916_v30 = vld [vmem:[#allocation29_spill] sm:$0xff] }
 0x2e1   : > { %11553 = vmatprep.subr.bf16.mxu0 %v11552_v58 }
 0x2e3   : > { %10802 = vmatmul.mubr.msk.f32.gmra.mrb[2].mxu0 %vm1014_vm0, %v13665_v36  ;;  %v14917_v36 = vld [vmem:[#allocation30_spill] sm:$0xff] }
 0x2e4   : > { %10804 = vmatprep.mubr.msk.f32.mxu0 %vm1014_vm0, %v13671_v53  ;;  %11555 = vmatpush3.bf16.msra.mxu0 %v11552_v58  ;;  %v14918_v53 = vld [vmem:[#allocation31_spill] sm:$0xff] }
 0x2e5   : > { %11557 = vmatprep.subr.bf16.mxu0 %v11556_v5 }
 0x2e7   : > { %10805 = vmatmul.mubr.msk.f32.gmra.mrb[4].mxu0 %vm1014_vm0, %v13679_v62  ;;  %v3495_v62 = vld [vmem:[#allocation2 + $0x198] sm:$0xff] }
 0x2e8   : > { %10807 = vmatprep.mubr.msk.f32.mxu0 %vm1014_vm0, %v13693_v8  ;;  %11559 = vmatpush3.bf16.msra.mxu0 %v11556_v5  ;;  %v14919_v8 = vld [vmem:[#allocation32_spill] sm:$0xff] }
 0x2e9   : > { %11561 = vmatprep.subr.bf16.mxu0 %v11560_v18 }
 0x2eb   : > { %10808 = vmatmul.mubr.msk.f32.gmra.mrb[6].mxu0 %vm1014_vm0, %v13699_v13  ;;  %v3496_v13 = vld [vmem:[#allocation2 + $0x1a0] sm:$0xff] }
 0x2ec   : > { %10810 = vmatprep.mubr.msk.f32.mxu0 %vm1014_vm0, %v13712_v27  ;;  %11563 = vmatpush3.bf16.msra.mxu0 %v11560_v18  ;;  %v4288_v27 = vld [vmem:[#allocation9 + $0x210] sm:$0xff] }
 0x2ed   : > { %11565 = vmatprep.subr.bf16.mxu0 %v11564_v21 }
 0x2ef   : > { %10811 = vmatmul.mubr.msk.f32.gmra.mrb[8].mxu0 %vm1014_vm0, %v13718_v33  ;;  %v4289_v33 = vld [vmem:[#allocation9 + $0x218] sm:$0xff] }
 0x2f0   : > { %10813 = vmatprep.mubr.msk.f32.mxu0 %vm1014_vm0, %v13724_v35  ;;  %v11568_v35 = vpack.c.bf16 %v4289_v33, %v4288_v27 }
 0x2f3   : > { %10814 = vmatmul.mubr.msk.f32.gmra.mrb[10].mxu0 %vm1014_vm0, %v14905_v23 }
 0x2f4   : > { %10816 = vmatprep.mubr.msk.f32.mxu0 %vm1014_vm0, %v14906_v28 }
 0x2f7   : > { %10817 = vmatmul.mubr.msk.f32.gmra.mrb[12].mxu0 %vm1014_vm0, %v14907_v29 }
 0x2f8   : > { %10819 = vmatprep.mubr.msk.f32.mxu0 %vm1014_vm0, %v14908_v32 }
 0x2fb   : > { %10820 = vmatmul.mubr.msk.f32.gmra.mrb[14].mxu0 %vm1014_vm0, %v14909_v37 }
 0x2fc   : > { %10822 = vmatprep.mubr.msk.f32.mxu0 %vm1014_vm0, %v14910_v39  ;;  %v14930_v39 = vld [vmem:[#allocation51_spill] sm:$0xff] }
 0x2ff   : > { %10823 = vmatmul.mubr.msk.f32.gmra.mrb[16].mxu0 %vm1014_vm0, %v14911_v41 }
 0x300   : > { %10825 = vmatprep.mubr.msk.f32.mxu0 %vm1014_vm0, %v14912_v43 }
 0x303   : > { %10826 = vmatmul.mubr.msk.f32.gmra.mrb[18].mxu0 %vm1014_vm0, %v14913_v52 }
 0x304   : > { %10828 = vmatprep.mubr.msk.f32.mxu0 %vm1014_vm0, %v14914_v0 }
 0x307   : > { %10829 = vmatmul.mubr.msk.f32.gmra.mrb[20].mxu0 %vm1014_vm0, %v14915_v26 }
 0x308   : > { %10831 = vmatprep.mubr.msk.f32.mxu0 %vm1014_vm0, %v13818_v22  ;;  %v4291_v22 = vld [vmem:[#allocation9 + $0x228] sm:$0xff] }
 0x30b   : > { %10832 = vmatmul.mubr.msk.f32.gmra.mrb[22].mxu0 %vm1014_vm0, %v13824_v45  ;;  %v4290_v45 = vld [vmem:[#allocation9 + $0x220] sm:$0xff] }
 0x30c   : > { %10834 = vmatprep.mubr.msk.f32.mxu0 %vm1014_vm0, %v13836_v25  ;;  %v11572_v25 = vpack.c.bf16 %v4291_v22, %v4290_v45  ;;  %v6842_v45 = vld [vmem:[#allocation11] sm:$0xff] }
 0x30d   : > { %11154 = vmatprep.subr.mxu1 %v6842_v45 }
 0x30e   : > { %11155 = vmatpush3.msra.mxu1 %v6842_v45 }
 0x30f   : > { %10835 = vmatmul.mubr.msk.f32.gmra.mrb[24].mxu0 %vm1014_vm0, %v13842_v54  ;;  %v4292_v54 = vld [vmem:[#allocation9 + $0x230] sm:$0xff] }
 0x310   : > { %10837 = vmatprep.mubr.msk.f32.mxu0 %vm1014_vm0, %v14916_v30  ;;  %v14931_v30 = vld [vmem:[#allocation52_spill] sm:$0xff] }
 0x313   : > { %10838 = vmatmul.mubr.msk.f32.gmra.mrb[26].mxu0 %vm1014_vm0, %v14917_v36 }
 0x314   : > { %10840 = vmatprep.mubr.msk.f32.mxu0 %vm1014_vm0, %v14918_v53 }
 0x317   : > { %10841 = vmatmul.mubr.msk.f32.gmra.mrb[28].mxu0 %vm1014_vm0, %v14919_v8 }
 0x318   : > { %10843 = vmatprep.mubr.msk.f32.mxu0 %vm1014_vm0, %v3495_v62 }
 0x31b   : > { %10844 = vmatmul.mubr.msk.f32.gmra.mrb[30].mxu0 %vm1014_vm0, %v3496_v13 }
 0x31c   : > { %10862 = vmatprep.mubr.msk.f32.mxu0 %vm1014_vm0, %v13883_v3  ;;  %v11576_v3 = vpack.c.bf16 %v4293_v6, %v4292_v54 }
 0x31f   : > { %10863 = vmatmul.mubr.msk.f32.vlgmr.msra.gmra.mrb[0].mxu0 %vm1014_vm0, %v13890_v16  ;;  %v14920_v16 = vld [vmem:[#allocation38_spill] sm:$0xff] }
 0x320   : > { %10865 = vmatprep.mubr.msk.f32.mxu0 %vm1014_vm0, %v13896_v24  ;;  %11567 = vmatpush3.bf16.msra.mxu0 %v11564_v21  ;;  %v14921_v24 = vld [vmem:[#allocation40_spill] sm:$0xff] }
 0x321   : > { %11569 = vmatprep.subr.bf16.mxu0 %v11568_v35 }
 0x323   : > { %10866 = vmatmul.mubr.msk.f32.gmra.mrb[2].mxu0 %vm1014_vm0, %v13902_v19  ;;  %v14922_v19 = vld [vmem:[#allocation42_spill] sm:$0xff] }
 0x324   : > { %10868 = vmatprep.mubr.msk.f32.mxu0 %vm1014_vm0, %v13904_v4  ;;  %11571 = vmatpush3.bf16.msra.mxu0 %v11568_v35  ;;  %v14923_v4 = vld [vmem:[#allocation44_spill] sm:$0xff] }
 0x325   : > { %11573 = vmatprep.subr.bf16.mxu0 %v11572_v25 }
 0x327   : > { %10869 = vmatmul.mubr.msk.f32.gmra.mrb[4].mxu0 %vm1014_vm0, %v13913_v9  ;;  %v14924_v9 = vld [vmem:[#allocation45_spill] sm:$0xff] }
 0x328   : > { %10871 = vmatprep.mubr.msk.f32.mxu0 %vm1014_vm0, %v13921_v60  ;;  %11575 = vmatpush3.bf16.msra.mxu0 %v11572_v25  ;;  %v9292_v60 = vld [vmem:[%s14801_s8] ss:$0 sm:$0xff]  ;;  %v14932_v25 = vld [vmem:[#allocation53_spill] sm:$0xff] }
 0x329   : > { %11577 = vmatprep.subr.bf16.mxu0 %v11576_v3 }
 0x32b   : > { %10872 = vmatmul.mubr.msk.f32.gmra.mrb[6].mxu0 %vm1014_vm0, %v13927_v31  ;;  %v14925_v31 = vld [vmem:[#allocation46_spill] sm:$0xff] }
 0x32c   : > { %10874 = vmatprep.mubr.msk.f32.mxu0 %vm1014_vm0, %v13934_v48  ;;  %11579 = vmatpush3.bf16.msra.mxu0 %v11576_v3 }
 0x32f   : > { %10875 = vmatmul.mubr.msk.f32.gmra.mrb[8].mxu0 %vm1014_vm0, %v13942_v34 }
 0x330   : > { %10877 = vmatprep.mubr.msk.f32.mxu0 %vm1014_vm0, %v13950_v38 }
 0x333   : > { %10878 = vmatmul.mubr.msk.f32.gmra.mrb[10].mxu0 %vm1014_vm0, %v13958_v40  ;;  %v14926_v40 = vld [vmem:[#allocation47_spill] sm:$0xff] }
 0x334   : > { %10880 = vmatprep.mubr.msk.f32.mxu0 %vm1014_vm0, %v13966_v42  ;;  %v14927_v42 = vld [vmem:[#allocation48_spill] sm:$0xff] }
 0x337   : > { %10881 = vmatmul.mubr.msk.f32.gmra.mrb[12].mxu0 %vm1014_vm0, %v14920_v16 }
 0x338   : > { %10883 = vmatprep.mubr.msk.f32.mxu0 %vm1014_vm0, %v14921_v24  ;;  %v14933_v24 = vld [vmem:[#allocation54_spill] sm:$0xff] }
 0x33b   : > { %10884 = vmatmul.mubr.msk.f32.gmra.mrb[14].mxu0 %vm1014_vm0, %v14922_v19 }
 0x33c   : > { %10886 = vmatprep.mubr.msk.f32.mxu0 %vm1014_vm0, %v14923_v4 }
 0x33f   : > { %10887 = vmatmul.mubr.msk.f32.gmra.mrb[16].mxu0 %vm1014_vm0, %v14924_v9 }
 0x340   : > { %10889 = vmatprep.mubr.msk.f32.mxu0 %vm1014_vm0, %v14925_v31 }
 0x341   : > { %v11144_v48 = vpop.f32.mrb[72].mxu1 }
 0x342   : > { %v11724_v34 = vadd.f32 %v11144_v48, %v9292_v60  ;;  %v6227_v55 = vpop.f32.mrb[73].mxu1 }
 0x343   : > { %v11725_v38 = vadd.f32 %v9292_v60, %v6227_v55  ;;  %10890 = vmatmul.mubr.msk.f32.gmra.mrb[18].mxu0 %vm1014_vm0, %v14926_v40 }
 0x344   : > { %vm6275_vm6 = vcmp.ge.f32.partialorder %v11724_v34, 0.0  ;;  %v6283_v49 = vmul.f32 0.01, %v11724_v34  ;;  %10892 = vmatprep.mubr.msk.f32.mxu0 %vm1014_vm0, %v14927_v42 }
 0x345   : > { %vm6274_vm7 = vcmp.ge.f32.partialorder %v11725_v38, 0.0  ;;  %v6282_v47 = vmul.f32 0.01, %v11725_v38  ;;  %v11147_v15 = vpop.f32.mrb[74].mxu1 }
 0x346   : > { %v11726_v17 = vadd.f32 %v11147_v15, %v9292_v60  ;;  %v6237_v61 = vpop.f32.mrb[75].mxu1  ;;  %v6291_v46 = vsel %vm6275_vm6, %v11724_v34, %v6283_v49  ;;  %v14935_v15 = vld [vmem:[#allocation56_spill] sm:$0xff] }
 0x347   : > { %v11727_v56 = vadd.f32 %v9292_v60, %v6237_v61  ;;  %10893 = vmatmul.mubr.msk.f32.gmra.mrb[20].mxu0 %vm1014_vm0, %v14928_v57  ;;  %v6290_v58 = vsel %vm6274_vm7, %v11725_v38, %v6282_v47  ;;  %v6299_v59 = vmul.f32 0.75, %v6291_v46  ;;  %v6307_v2 = vmul.f32 0.25, %v6291_v46  ;;  %v14934_v38 = vld [vmem:[#allocation55_spill] sm:$0xff] }
 0x348   : > { %vm6277_vm8 = vcmp.ge.f32.partialorder %v11726_v17, 0.0  ;;  %v6285_v5 = vmul.f32 0.01, %v11726_v17  ;;  %10895 = vmatprep.mubr.msk.f32.mxu0 %vm1014_vm0, %v14929_v7  ;;  %v6306_v14 = vmul.f32 0.25, %v6290_v58  ;;  %v6298_v18 = vmul.f32 0.75, %v6290_v58  ;;  %v3889_v57 = vld [vmem:[#allocation2 + $0x199] sm:$0xff] }
 0x349   : > { %vm6276_vm9 = vcmp.ge.f32.partialorder %v11727_v56, 0.0  ;;  %v6284_v12 = vmul.f32 0.01, %v11727_v56  ;;  %v11150_v51 = vpop.f32.mrb[76].mxu1 }
 0x34a   : > { %v11728_v21 = vadd.f32 %v11150_v51, %v9292_v60  ;;  %v6247_v23 = vpop.f32.mrb[77].mxu1  ;;  %v6314_v28 = vadd.f32 %v6306_v14, %v6299_v59  ;;  %v6313_v29 = vadd.f32 %v6306_v14, %v6298_v18  ;;  %v6322_v32 = vadd.f32 %v6307_v2, %v6298_v18  ;;  %v3890_v14 = vld [vmem:[#allocation2 + $0x1a1] sm:$0xff]  ;;  %v4258_v18 = vld [vmem:[#allocation2 + $0x6a] sm:$0xff] }
 0x34b   : > { %v11729_v37 = vadd.f32 %v9292_v60, %v6247_v23  ;;  %10896 = vmatmul.mubr.msk.f32.gmra.mrb[22].mxu0 %vm1014_vm0, %v14930_v39  ;;  %v6292_v41 = vsel %vm6276_vm9, %v11727_v56, %v6284_v12  ;;  %v6293_v43 = vsel %vm6277_vm8, %v11726_v17, %v6285_v5  ;;  %v14936_v5 = vld [vmem:[#allocation57_spill] sm:$0xff]  ;;  %v4259_v12 = vld [vmem:[#allocation2 + $0x7a] sm:$0xff]  ;;  %v4265_v51 = vld [vmem:[#allocation2 + $0xc2] sm:$0xff] }
 0x34c   : > { %vm6279_vm10 = vcmp.ge.f32.partialorder %v11728_v21, 0.0  ;;  %v6287_v52 = vmul.f32 0.01, %v11728_v21  ;;  %6394 = vxpose.xlu1.b32.start.end [1/1] (short) (narrow) %v6314_v28, 32  ;;  %6330 = vxpose.xlu0.b32.start.end [1/1] (short) (narrow) %v6313_v29, 32  ;;  %v6308_v0 = vmul.f32 0.25, %v6292_v41 }
 0x34d   : > { %vm6278_vm11 = vcmp.ge.f32.partialorder %v11729_v37, 0.0  ;;  %v6286_v26 = vmul.f32 0.01, %v11729_v37  ;;  %10898 = vmatprep.mubr.msk.f32.mxu0 %vm1014_vm0, %v14931_v30  ;;  %v11153_v36 = vpop.f32.mrb[78].mxu1  ;;  %v6300_v53 = vmul.f32 0.75, %v6292_v41  ;;  %v6309_v62 = vmul.f32 0.25, %v6293_v43 }
 0x34e   : > { %v11730_v8 = vadd.f32 %v11153_v36, %v9292_v60  ;;  %v6257_v13 = vpop.f32.mrb[79].mxu1  ;;  %v6323_v27 = vadd.f32 %v6308_v0, %v6299_v59  ;;  %v6301_v33 = vmul.f32 0.75, %v6293_v43  ;;  %v6295_v35 = vsel %vm6279_vm10, %v11728_v21, %v6287_v52  ;;  %v4266_v21 = vld [vmem:[#allocation2 + $0xca] sm:$0xff]  ;;  %v4267_v23 = vld [vmem:[#allocation2 + $0xda] sm:$0xff]  ;;  %v4268_v28 = vld [vmem:[#allocation2 + $0xe2] sm:$0xff] }
 0x34f   : > { %v11731_v22 = vadd.f32 %v9292_v60, %v6257_v13  ;;  %10899 = vmatmul.mubr.msk.f32.gmra.mrb[24].mxu0 %vm1014_vm0, %v14932_v25  ;;  %v6324_v54 = vadd.f32 %v6309_v62, %v6300_v53  ;;  %v6315_v6 = vadd.f32 %v6307_v2, %v6300_v53  ;;  %v6294_v3 = vsel %vm6278_vm11, %v11729_v37, %v6286_v26  ;;  %v4269_v29 = vld [vmem:[#allocation2 + $0xf2] sm:$0xff]  ;;  %v4271_v37 = vld [vmem:[#allocation2 + $0x10a] sm:$0xff]  ;;  %v4273_v41 = vld [vmem:[#allocation2 + $0x122] sm:$0xff] }
 0x350   : > { %vm6281_vm12 = vcmp.ge.f32.partialorder %v11730_v8, 0.0  ;;  %v6289_v16 = vmul.f32 0.01, %v11730_v8  ;;  %10901 = vmatprep.mubr.msk.f32.mxu0 %vm1014_vm0, %v14933_v24  ;;  %v6316_v19 = vadd.f32 %v6308_v0, %v6301_v33  ;;  %v6310_v4 = vmul.f32 0.25, %v6294_v3  ;;  %v4272_v39 = vld [vmem:[#allocation2 + $0x112] sm:$0xff]  ;;  %v4274_v43 = vld [vmem:[#allocation2 + $0x12a] sm:$0xff] }
 0x351   : > { %vm6280_vm13 = vcmp.ge.f32.partialorder %v11731_v22, 0.0  ;;  %v6288_v9 = vmul.f32 0.01, %v11731_v22  ;;  %v6302_v31 = vmul.f32 0.75, %v6294_v3  ;;  %v6311_v48 = vmul.f32 0.25, %v6295_v35  ;;  %v4275_v52 = vld [vmem:[#allocation2 + $0x13a] sm:$0xff] }
 0x352   : > { %v6325_v60 = vadd.f32 %v6310_v4, %v6301_v33  ;;  %v6303_v34 = vmul.f32 0.75, %v6295_v35  ;;  %v6297_v55 = vsel %vm6281_vm12, %v11730_v8, %v6289_v16  ;;  %v4276_v0 = vld [vmem:[#allocation2 + $0x142] sm:$0xff]  ;;  %v4277_v26 = vld [vmem:[#allocation2 + $0x152] sm:$0xff]  ;;  %v4278_v30 = vld [vmem:[#allocation2 + $0x15a] sm:$0xff] }
 0x353   : > { %10902 = vmatmul.mubr.msk.f32.gmra.mrb[26].mxu0 %vm1014_vm0, %v14934_v38  ;;  %v6326_v40 = vadd.f32 %v6311_v48, %v6302_v31  ;;  %v6317_v49 = vadd.f32 %v6309_v62, %v6302_v31  ;;  %v6296_v42 = vsel %vm6280_vm13, %v11731_v22, %v6288_v9  ;;  %v14247_v47 = vmul.f32 0.25, %v6297_v55  ;;  %v4279_v36 = vld [vmem:[#allocation2 + $0x16a] sm:$0xff]  ;;  %v4280_v53 = vld [vmem:[#allocation2 + $0x172] sm:$0xff]  ;;  %v4283_v62 = vld [vmem:[#allocation2 + $0x19a] sm:$0xff] }
 0x354   : > { %10904 = vmatprep.mubr.msk.f32.mxu0 %vm1014_vm0, %v14935_v15  ;;  %v14251_v17 = vadd.f32 %v6310_v4, %v6303_v34  ;;  %v6312_v61 = vmul.f32 0.25, %v6296_v42  ;;  %v6304_v46 = vmul.f32 0.75, %v6296_v42  ;;  %v14253_v56 = vmul.f32 0.75, %v6297_v55  ;;  %v4284_v8 = vld [vmem:[#allocation2 + $0x1a2] sm:$0xff] }
 0x356   : > { %v6327_v58 = vadd.f32 %v6312_v61, %v6303_v34  ;;  %v14256_v59 = vadd.f32 %v14247_v47, %v6304_v46  ;;  %v14258_v2 = vadd.f32 %v6311_v48, %v6304_v46  ;;  %v14263_v7 = vadd.f32 %v6312_v61, %v14253_v56 }
 0x357   : > { %10905 = vmatmul.mubr.msk.f32.gmra.mrb[28].mxu0 %vm1014_vm0, %v14936_v5  ;;  %v6329_v13 = vadd.f32 %v14247_v47, %v14253_v56 }
 0x358   : > { %10907 = vmatprep.mubr.msk.f32.mxu0 %vm1014_vm0, %v3889_v57 }
 0x359   : > { %6362 = vxpose.xlu0.b32.start.end [1/1] (short) (narrow) %v6322_v32, 32  ;;  %6426 = vxpose.xlu1.b32.start.end [1/1] (short) (narrow) %v6323_v27, 32  ;;  %v4270_v32 = vld [vmem:[#allocation2 + $0xfa] sm:$0xff] }
 0x35b   : > { %10908 = vmatmul.mubr.msk.f32.gmra.mrb[30].mxu0 %vm1014_vm0, %v3890_v14 }
 0x35c   : > { %10926 = vmatprep.mubr.msk.f32.mxu0 %vm1014_vm0, %v14049_v10  ;;  %v4260_v10 = vld [vmem:[#allocation2 + $0x82] sm:$0xff] }
 0x35f   : > { %10927 = vmatmul.mubr.msk.f32.vlgmr.msra.gmra.mrb[0].mxu0 %vm1014_vm0, %v14054_v20  ;;  %v4261_v20 = vld [vmem:[#allocation2 + $0x92] sm:$0xff] }
 0x360   : > { %10929 = vmatprep.mubr.msk.f32.mxu0 %vm1014_vm0, %v14058_v1  ;;  %v4262_v1 = vld [vmem:[#allocation2 + $0x9a] sm:$0xff] }
 0x363   : > { %10930 = vmatmul.mubr.msk.f32.gmra.mrb[2].mxu0 %vm1014_vm0, %v14062_v63  ;;  %v4263_v63 = vld [vmem:[#allocation2 + $0xaa] sm:$0xff] }
 0x364   : > { %10932 = vmatprep.mubr.msk.f32.mxu0 %vm1014_vm0, %v14066_v11  ;;  %v4264_v11 = vld [vmem:[#allocation2 + $0xb2] sm:$0xff] }
 0x366   : > { %6490 = vxpose.xlu1.b32.start.end [1/1] (short) (narrow) %v6324_v54, 32  ;;  %6458 = vxpose.xlu0.b32.start.end [1/1] (short) (narrow) %v6315_v6, 32 }
 0x367   : > { %10933 = vmatmul.mubr.msk.f32.gmra.mrb[4].mxu0 %vm1014_vm0, %v4258_v18 }
 0x368   : > { %10935 = vmatprep.mubr.msk.f32.mxu0 %vm1014_vm0, %v4259_v12 }
 0x36b   : > { %10936 = vmatmul.mubr.msk.f32.gmra.mrb[6].mxu0 %vm1014_vm0, %v4260_v10 }
 0x36c   : > { %10938 = vmatprep.mubr.msk.f32.mxu0 %vm1014_vm0, %v4261_v20 }
 0x36f   : > { %10939 = vmatmul.mubr.msk.f32.gmra.mrb[8].mxu0 %vm1014_vm0, %v4262_v1 }
 0x370   : > { %10941 = vmatprep.mubr.msk.f32.mxu0 %vm1014_vm0, %v4263_v63 }
 0x373   : > { %6522 = vxpose.xlu0.b32.start.end [1/1] (short) (narrow) %v6316_v19, 32  ;;  %6554 = vxpose.xlu1.b32.start.end [1/1] (short) (narrow) %v6325_v60, 32 }
 0x374   : > { %10942 = vmatmul.mubr.msk.f32.gmra.mrb[10].mxu0 %vm1014_vm0, %v4264_v11 }
 0x375   : > { %10944 = vmatprep.mubr.msk.f32.mxu0 %vm1014_vm0, %v4265_v51 }
 0x378   : > { %10945 = vmatmul.mubr.msk.f32.gmra.mrb[12].mxu0 %vm1014_vm0, %v4266_v21 }
 0x379   : > { %10947 = vmatprep.mubr.msk.f32.mxu0 %vm1014_vm0, %v4267_v23 }
 0x37c   : > { %10948 = vmatmul.mubr.msk.f32.gmra.mrb[14].mxu0 %vm1014_vm0, %v4268_v28 }
 0x37d   : > { %10950 = vmatprep.mubr.msk.f32.mxu0 %vm1014_vm0, %v4269_v29 }
 0x380   : > { %10951 = vmatmul.mubr.msk.f32.gmra.mrb[16].mxu0 %vm1014_vm0, %v4270_v32  ;;  %6618 = vxpose.xlu1.b32.start.end [1/1] (short) (narrow) %v6326_v40, 32 }
 0x381   : > { %6586 = vxpose.xlu0.b32.start.end [1/1] (short) (narrow) %v6317_v49, 32  ;;  %10953 = vmatprep.mubr.msk.f32.mxu0 %vm1014_vm0, %v4271_v37 }
 0x384   : > { %10954 = vmatmul.mubr.msk.f32.gmra.mrb[18].mxu0 %vm1014_vm0, %v4272_v39 }
 0x385   : > { %10956 = vmatprep.mubr.msk.f32.mxu0 %vm1014_vm0, %v4273_v41 }
 0x388   : > { %10957 = vmatmul.mubr.msk.f32.gmra.mrb[20].mxu0 %vm1014_vm0, %v4274_v43 }
 0x389   : > { %10959 = vmatprep.mubr.msk.f32.mxu0 %vm1014_vm0, %v4275_v52 }
 0x38c   : > { %10960 = vmatmul.mubr.msk.f32.gmra.mrb[22].mxu0 %vm1014_vm0, %v4276_v0 }
 0x38d   : > { %10962 = vmatprep.mubr.msk.f32.mxu0 %vm1014_vm0, %v4277_v26  ;;  %6682 = vxpose.xlu1.b32.start.end [1/1] (short) (narrow) %v6327_v58, 32 }
 0x38e   : > { %6650 = vxpose.xlu0.b32.start.end [1/1] (short) (narrow) %v14251_v17, 32 }
 0x390   : > { %10963 = vmatmul.mubr.msk.f32.gmra.mrb[24].mxu0 %vm1014_vm0, %v4278_v30 }
 0x391   : > { %10965 = vmatprep.mubr.msk.f32.mxu0 %vm1014_vm0, %v4279_v36 }
 0x394   : > { %10966 = vmatmul.mubr.msk.f32.gmra.mrb[26].mxu0 %vm1014_vm0, %v4280_v53 }
 0x395   : > { %10968 = vmatprep.mubr.msk.f32.mxu0 %vm1014_vm0, %v14116_v44 }
 0x398   : > { %10969 = vmatmul.mubr.msk.f32.gmra.mrb[28].mxu0 %vm1014_vm0, %v14120_v50 }
 0x399   : > { %10971 = vmatprep.mubr.msk.f32.mxu0 %vm1014_vm0, %v4283_v62 }
 0x39a   : > { %6746 = vxpose.xlu1.b32.start.end [1/1] (short) (narrow) %v14256_v59, 32 }
 0x39b   : > { %6714 = vxpose.xlu0.b32.start.end [1/1] (short) (narrow) %v14258_v2, 32 }
 0x39c   : > { %10972 = vmatmul.mubr.msk.f32.gmra.mrb[30].mxu0 %vm1014_vm0, %v4284_v8 }
 0x3a7   : > { %6810 = vxpose.xlu1.b32.start.end [1/1] (short) (narrow) %v6329_v13, 32 }
 0x3a8   : > { %6778 = vxpose.xlu0.b32.start.end [1/1] (short) (narrow) %v14263_v7, 32 }
 0x3cc   : > { %v6346_v44 = vpop.trf.xlu0  ;;  %v6410_v27 = vpop.trf.xlu1 }
 0x3cd   : > { %11156 = vmatprep.mubr.msk.f32.mxu1 %vm6843_vm14, %v6346_v44 }
 0x3d0   : > { %v6347_v50 = vpop.trf.xlu0  ;;  %v6411_v33 = vpop.trf.xlu1 }
 0x3d1   : > { %11157 = vmatmul.mubr.msk.f32.vlgmr.msra.gmra.mrb[80].mxu1 %vm6843_vm14, %v6347_v50 }
 0x3d4   : > { %v6348_v35 = vpop.trf.xlu0  ;;  %v6412_v45 = vpop.trf.xlu1 }
 0x3d5   : > { %11159 = vmatprep.mubr.msk.f32.mxu1 %vm6843_vm14, %v6348_v35 }
 0x3d8   : > { %v6349_v22 = vpop.trf.xlu0  ;;  %v6413_v25 = vpop.trf.xlu1 }
 0x3d9   : > { %11160 = vmatmul.mubr.msk.f32.gmra.mrb[82].mxu1 %vm6843_vm14, %v6349_v22 }
 0x3dc   : > { %v6378_v54 = vpop.trf.xlu0  ;;  %v6442_v6 = vpop.trf.xlu1 }
 0x3dd   : > { %11162 = vmatprep.mubr.msk.f32.mxu1 %vm6843_vm14, %v6378_v54 }
 0x3e0   : > { %v6379_v3 = vpop.trf.xlu0  ;;  %v6443_v16 = vpop.trf.xlu1 }
 0x3e1   : > { %11163 = vmatmul.mubr.msk.f32.gmra.mrb[84].mxu1 %vm6843_vm14, %v6379_v3 }
 0x3e4   : > { %v6380_v24 = vpop.trf.xlu0  ;;  %v6444_v19 = vpop.trf.xlu1 }
 0x3e5   : > { %11165 = vmatprep.mubr.msk.f32.mxu1 %vm6843_vm14, %v6380_v24 }
 0x3e8   : > { %v6381_v4 = vpop.trf.xlu0  ;;  %v6445_v9 = vpop.trf.xlu1 }
 0x3e9   : > { %11166 = vmatmul.mubr.msk.f32.gmra.mrb[86].mxu1 %vm6843_vm14, %v6381_v4 }
 0x3ea   : > { %11168 = vmatprep.mubr.msk.f32.mxu1 %vm6843_vm14, %v6410_v27 }
 0x3ec   : > { %v6474_v31 = vpop.trf.xlu0  ;;  %v6506_v48 = vpop.trf.xlu1 }
 0x3ed   : > { %11169 = vmatmul.mubr.msk.f32.gmra.mrb[88].mxu1 %vm6843_vm14, %v6411_v33 }
 0x3ee   : > { %11171 = vmatprep.mubr.msk.f32.mxu1 %vm6843_vm14, %v6412_v45 }
 0x3f0   : > { %v6475_v60 = vpop.trf.xlu0  ;;  %v6507_v34 = vpop.trf.xlu1 }
 0x3f1   : > { %11172 = vmatmul.mubr.msk.f32.gmra.mrb[90].mxu1 %vm6843_vm14, %v6413_v25 }
 0x3f2   : > { %11174 = vmatprep.mubr.msk.f32.mxu1 %vm6843_vm14, %v6442_v6 }
 0x3f4   : > { %v6476_v55 = vpop.trf.xlu0  ;;  %v6508_v38 = vpop.trf.xlu1 }
 0x3f5   : > { %11175 = vmatmul.mubr.msk.f32.gmra.mrb[92].mxu1 %vm6843_vm14, %v6443_v16 }
 0x3f6   : > { %11177 = vmatprep.mubr.msk.f32.mxu1 %vm6843_vm14, %v6444_v19 }
 0x3f8   : > { %v6477_v40 = vpop.trf.xlu0  ;;  %v6509_v49 = vpop.trf.xlu1 }
 0x3f9   : > { %11178 = vmatmul.mubr.msk.f32.gmra.mrb[94].mxu1 %vm6843_vm14, %v6445_v9 }
 0x3fa   : > { %11180 = vmatprep.mubr.msk.f32.mxu1 %vm6843_vm14, %v6474_v31 }
 0x3fc   : > { %v6538_v42 = vpop.trf.xlu0  ;;  %v6570_v47 = vpop.trf.xlu1 }
 0x3fd   : > { %11181 = vmatmul.mubr.msk.f32.gmra.mrb[96].mxu1 %vm6843_vm14, %v6475_v60 }
 0x3fe   : > { %11183 = vmatprep.mubr.msk.f32.mxu1 %vm6843_vm14, %v6476_v55 }
 0x400   : > { %v6539_v15 = vpop.trf.xlu0  ;;  %v6571_v17 = vpop.trf.xlu1 }
 0x401   : > { %11184 = vmatmul.mubr.msk.f32.gmra.mrb[98].mxu1 %vm6843_vm14, %v6477_v40  ;;  %v14423_v40 = vld [vmem:[%s14799_s6] ss:$0 sm:$0xff] }
 0x402   : > { %11186 = vmatprep.mubr.msk.f32.mxu1 %vm6843_vm14, %v6506_v48 }
 0x404   : > { %v6540_v61 = vpop.trf.xlu0  ;;  %v6572_v46 = vpop.trf.xlu1 }
 0x405   : > { %11187 = vmatmul.mubr.msk.f32.gmra.mrb[100].mxu1 %vm6843_vm14, %v6507_v34 }
 0x406   : > { %11189 = vmatprep.mubr.msk.f32.mxu1 %vm6843_vm14, %v6508_v38 }
 0x408   : > { %v6541_v56 = vpop.trf.xlu0  ;;  %v6573_v57 = vpop.trf.xlu1 }
 0x409   : > { %11190 = vmatmul.mubr.msk.f32.gmra.mrb[102].mxu1 %vm6843_vm14, %v6509_v49 }
 0x40a   : > { %11192 = vmatprep.mubr.msk.f32.mxu1 %vm6843_vm14, %v6538_v42 }
 0x40c   : > { %v6602_v58 = vpop.trf.xlu0  ;;  %v6634_v59 = vpop.trf.xlu1 }
 0x40d   : > { %11193 = vmatmul.mubr.msk.f32.gmra.mrb[104].mxu1 %vm6843_vm14, %v6539_v15 }
 0x40e   : > { %11195 = vmatprep.mubr.msk.f32.mxu1 %vm6843_vm14, %v6540_v61 }
 0x410   : > { %v6603_v2 = vpop.trf.xlu0  ;;  %v6635_v5 = vpop.trf.xlu1 }
 0x411   : > { %11196 = vmatmul.mubr.msk.f32.gmra.mrb[106].mxu1 %vm6843_vm14, %v6541_v56 }
 0x412   : > { %11198 = vmatprep.mubr.msk.f32.mxu1 %vm6843_vm14, %v6570_v47  ;;  %v14937_v47 = vld [vmem:[#allocation33_spill] sm:$0xff] }
 0x413   : > { %v1487_v15 = vadd.f32 %v14937_v47, %v14423_v40  ;;  %v7943_v47 = vld [vmem:[%s14804_s11 + $0x10] sm:$0xff] }
 0x414   : > { %v6604_v7 = vpop.trf.xlu0  ;;  %v6636_v14 = vpop.trf.xlu1 }
 0x415   : > { %11199 = vmatmul.mubr.msk.f32.gmra.mrb[108].mxu1 %vm6843_vm14, %v6571_v17  ;;  %v14938_v17 = vld [vmem:[#allocation34_spill] sm:$0xff] }
 0x416   : > { %11201 = vmatprep.mubr.msk.f32.mxu1 %vm6843_vm14, %v6572_v46  ;;  %v1486_v61 = vadd.f32 %v14423_v40, %v14938_v17 }
 0x418   : > { %v6605_v18 = vpop.trf.xlu0  ;;  %v6637_v12 = vpop.trf.xlu1 }
 0x419   : > { %11202 = vmatmul.mubr.msk.f32.gmra.mrb[110].mxu1 %vm6843_vm14, %v6573_v57 }
 0x41a   : > { %11204 = vmatprep.mubr.msk.f32.mxu1 %vm6843_vm14, %v6602_v58 }
 0x41c   : > { %v6666_v10 = vpop.trf.xlu0  ;;  %v6698_v20 = vpop.trf.xlu1 }
 0x41d   : > { %11205 = vmatmul.mubr.msk.f32.gmra.mrb[112].mxu1 %vm6843_vm14, %v6603_v2 }
 0x41e   : > { %11207 = vmatprep.mubr.msk.f32.mxu1 %vm6843_vm14, %v6604_v7 }
 0x420   : > { %v6667_v1 = vpop.trf.xlu0  ;;  %v6699_v63 = vpop.trf.xlu1 }
 0x421   : > { %11208 = vmatmul.mubr.msk.f32.gmra.mrb[114].mxu1 %vm6843_vm14, %v6605_v18 }
 0x422   : > { %11210 = vmatprep.mubr.msk.f32.mxu1 %vm6843_vm14, %v6634_v59  ;;  %v14939_v59 = vld [vmem:[#allocation35_spill] sm:$0xff] }
 0x423   : > { %v1489_v2 = vadd.f32 %v14939_v59, %v14423_v40  ;;  %v7934_v59 = vld [vmem:[%s14945_s21 + $0x8] sm:$0xff] }
 0x424   : > { %v6668_v11 = vpop.trf.xlu0  ;;  %v6700_v51 = vpop.trf.xlu1 }
 0x425   : > { %11211 = vmatmul.mubr.msk.f32.gmra.mrb[116].mxu1 %vm6843_vm14, %v6635_v5  ;;  %v14940_v5 = vld [vmem:[#allocation36_spill] sm:$0xff] }
 0x426   : > { %11213 = vmatprep.mubr.msk.f32.mxu1 %vm6843_vm14, %v6636_v14  ;;  %v1488_v7 = vadd.f32 %v14423_v40, %v14940_v5 }
 0x428   : > { %v6669_v21 = vpop.trf.xlu0  ;;  %v6701_v23 = vpop.trf.xlu1 }
 0x429   : > { %11214 = vmatmul.mubr.msk.f32.gmra.mrb[118].mxu1 %vm6843_vm14, %v6637_v12 }
 0x42a   : > { %11216 = vmatprep.mubr.msk.f32.mxu1 %vm6843_vm14, %v6666_v10 }
 0x42c   : > { %v6730_v28 = vpop.trf.xlu0  ;;  %v6762_v29 = vpop.trf.xlu1 }
 0x42d   : > { %11217 = vmatmul.mubr.msk.f32.gmra.mrb[120].mxu1 %vm6843_vm14, %v6667_v1 }
 0x42e   : > { %11219 = vmatprep.mubr.msk.f32.mxu1 %vm6843_vm14, %v6668_v11 }
 0x430   : > { %v6731_v32 = vpop.trf.xlu0  ;;  %v6763_v43 = vpop.trf.xlu1 }
 0x431   : > { %11220 = vmatmul.mubr.msk.f32.gmra.mrb[122].mxu1 %vm6843_vm14, %v6669_v21 }
 0x432   : > { %v14356_v37 = vpop.f32.mrb[0].mxu0  ;;  %11222 = vmatprep.mubr.msk.f32.mxu1 %vm6843_vm14, %v6698_v20  ;;  %v14941_v20 = vld [vmem:[#allocation37_spill] sm:$0xff] }
 0x433   : > { %v14359_v39 = vpop.f32.mrb[1].mxu0  ;;  %v1491_v1 = vadd.f32 %v14941_v20, %v14423_v40 }
 0x434   : > { %v6732_v41 = vpop.trf.xlu0  ;;  %v6764_v36 = vpop.trf.xlu1 }
 0x435   : > { %11223 = vmatmul.mubr.msk.f32.gmra.mrb[124].mxu1 %vm6843_vm14, %v6699_v63  ;;  %v14942_v63 = vld [vmem:[#allocation39_spill] sm:$0xff] }
 0x436   : > { %v14362_v52 = vpop.f32.mrb[2].mxu0  ;;  %11225 = vmatprep.mubr.msk.f32.mxu1 %vm6843_vm14, %v6700_v51  ;;  %v1490_v11 = vadd.f32 %v14423_v40, %v14942_v63 }
 0x437   : > { %v14365_v0 = vpop.f32.mrb[3].mxu0 }
 0x438   : > { %v6733_v26 = vpop.trf.xlu0  ;;  %v6765_v44 = vpop.trf.xlu1 }
 0x439   : > { %11226 = vmatmul.mubr.msk.f32.gmra.mrb[126].mxu1 %vm6843_vm14, %v6701_v23 }
 0x43a   : > { %v14368_v30 = vpop.f32.mrb[4].mxu0  ;;  %11228 = vmatprep.mubr.msk.f32.mxu1 %vm6843_vm14, %v6730_v28 }
 0x43b   : > { %v14371_v53 = vpop.f32.mrb[5].mxu0 }
 0x43c   : > { %v6794_v62 = vpop.trf.xlu0  ;;  %v6826_v35 = vpop.trf.xlu1 }
 0x43d   : > { %11229 = vmatmul.mubr.msk.f32.gmra.mrb[128].mxu1 %vm6843_vm14, %v6731_v32 }
 0x43e   : > { %v14374_v8 = vpop.f32.mrb[6].mxu0  ;;  %11231 = vmatprep.mubr.msk.f32.mxu1 %vm6843_vm14, %v6732_v41  ;;  %v14944_v41 = vld [vmem:[#allocation43_spill] sm:$0xff] }
 0x43f   : > { %v14377_v13 = vpop.f32.mrb[7].mxu0 }
 0x440   : > { %v6795_v50 = vpop.trf.xlu0  ;;  %v6827_v54 = vpop.trf.xlu1 }
 0x441   : > { %11232 = vmatmul.mubr.msk.f32.gmra.mrb[130].mxu1 %vm6843_vm14, %v6733_v26 }
 0x442   : > { %v14380_v27 = vpop.f32.mrb[8].mxu0  ;;  %11234 = vmatprep.mubr.msk.f32.mxu1 %vm6843_vm14, %v6762_v29  ;;  %v14943_v29 = vld [vmem:[#allocation41_spill] sm:$0xff] }
 0x443   : > { %v14383_v33 = vpop.f32.mrb[9].mxu0  ;;  %v1493_v32 = vadd.f32 %v14943_v29, %v14423_v40 }
 0x444   : > { %v6796_v25 = vpop.trf.xlu0  ;;  %v6828_v4 = vpop.trf.xlu1 }
 0x445   : > { %11235 = vmatmul.mubr.msk.f32.gmra.mrb[132].mxu1 %vm6843_vm14, %v6763_v43  ;;  %v1492_v43 = vadd.f32 %v14423_v40, %v14944_v41 }
 0x446   : > { %11237 = vmatprep.mubr.msk.f32.mxu1 %vm6843_vm14, %v6764_v36 }
 0x447   : > { %v14387_v45 = vpop.f32.mrb[10].mxu0 }
 0x448   : > { %v14389_v22 = vpop.f32.mrb[11].mxu0  ;;  %v6797_v16 = vpop.trf.xlu0 }
 0x449   : > { %11238 = vmatmul.mubr.msk.f32.gmra.mrb[134].mxu1 %vm6843_vm14, %v6765_v44  ;;  %v6829_v48 = vpop.trf.xlu1 }
 0x44a   : > { %11240 = vmatprep.mubr.msk.f32.mxu1 %vm6843_vm14, %v6794_v62 }
 0x44b   : > { %v14393_v6 = vpop.f32.mrb[12].mxu0 }
 0x44c   : > { %v14395_v3 = vpop.f32.mrb[13].mxu0 }
 0x44d   : > { %11241 = vmatmul.mubr.msk.f32.gmra.mrb[136].mxu1 %vm6843_vm14, %v6795_v50  ;;  %v7941_v50 = vld [vmem:[%s14804_s11] sm:$0xff] }
 0x44e   : > { %11243 = vmatprep.mubr.msk.f32.mxu1 %vm6843_vm14, %v6796_v25 }
 0x44f   : > { %v14399_v24 = vpop.f32.mrb[14].mxu0 }
 0x450   : > { %v14401_v19 = vpop.f32.mrb[15].mxu0 }
 0x451   : > { %11244 = vmatmul.mubr.msk.f32.gmra.mrb[138].mxu1 %vm6843_vm14, %v6797_v16 }
 0x452   : > { %11246 = vmatprep.mubr.msk.f32.mxu1 %vm6843_vm14, %v6826_v35  ;;  %v7942_v35 = vld [vmem:[%s14804_s11 + $0x8] sm:$0xff] }
 0x453   : > { %v14405_v9 = vpop.f32.mrb[16].mxu0  ;;  %v11652_v25 = vpack.c.bf16 %v7942_v35, %v7941_v50 }
 0x454   : > { %v14407_v31 = vpop.f32.mrb[17].mxu0 }
 0x455   : > { %11247 = vmatmul.mubr.msk.f32.gmra.mrb[140].mxu1 %vm6843_vm14, %v6827_v54  ;;  %11653 = vmatprep.subr.bf16.mxu1 %v11652_v25 }
 0x456   : > { %11249 = vmatprep.mubr.msk.f32.mxu1 %vm6843_vm14, %v6828_v4  ;;  %11655 = vmatpush3.bf16.msra.mxu1 %v11652_v25 }
 0x457   : > { %v14411_v60 = vpop.f32.mrb[18].mxu0 }
 0x458   : > { %v14413_v34 = vpop.f32.mrb[19].mxu0 }
 0x459   : > { %11250 = vmatmul.mubr.msk.f32.gmra.mrb[142].mxu1 %vm6843_vm14, %v6829_v48 }
 0x45b   : > { %v14416_v55 = vpop.f32.mrb[20].mxu0 }
 0x45c   : > { %v14418_v38 = vpop.f32.mrb[21].mxu0 }
 0x45f   : > { %v14425_v49 = vpop.f32.mrb[22].mxu0 }
 0x460   : > { %v14427_v42 = vpop.f32.mrb[23].mxu0 }
 0x463   : > { %v10964_v46 = vpop.f32.mrb[24].mxu0 }
 0x464   : > { %v14433_v56 = vadd.f32 %v10964_v46, %v1487_v15  ;;  %v4576_v57 = vpop.f32.mrb[25].mxu0  ;;  %v7944_v15 = vld [vmem:[%s14804_s11 + $0x18] sm:$0xff] }
 0x465   : > { %v14435_v58 = vadd.f32 %v4576_v57, %v1486_v61  ;;  %v11656_v17 = vpack.c.bf16 %v7944_v15, %v7943_v47  ;;  %v7933_v57 = vld [vmem:[%s14945_s21] sm:$0xff] }
 0x467   : > { %v10967_v14 = vpop.f32.mrb[26].mxu0  ;;  %11657 = vmatprep.subr.bf16.mxu1 %v11656_v17 }
 0x468   : > { %v14441_v18 = vadd.f32 %v10967_v14, %v1489_v2  ;;  %v4586_v12 = vpop.f32.mrb[27].mxu0  ;;  %11659 = vmatpush3.bf16.msra.mxu1 %v11656_v17  ;;  %v14479_v2 = vpack.c.bf16 %v7934_v59, %v7933_v57 }
 0x469   : > { %v14443_v10 = vadd.f32 %v4586_v12, %v1488_v7 }
 0x46a   : > { %11661 = vmatprep.subr.bf16.mxu1 %v14479_v2 }
 0x46b   : > { %v10970_v51 = vpop.f32.mrb[28].mxu0 }
 0x46c   : > { %v14449_v21 = vadd.f32 %v10970_v51, %v1491_v1  ;;  %v4596_v23 = vpop.f32.mrb[29].mxu0 }
 0x46d   : > { %v14451_v28 = vadd.f32 %v4596_v23, %v1490_v11 }
 0x46f   : > { %v10973_v26 = vpop.f32.mrb[30].mxu0 }
 0x470   : > { %v14457_v36 = vadd.f32 %v10973_v26, %v1493_v32  ;;  %v4606_v62 = vpop.f32.mrb[31].mxu0 }
 0x471   : > { %v14459_v44 = vadd.f32 %v4606_v62, %v1492_v43 }
 0x4a4   : > { %v11158_v54 = vpop.f32.mrb[80].mxu1 }
 0x4a5   : > { %v7102_v16 = vpop.f32.mrb[81].mxu1 }
 0x4a6   : > { %7421 = vxpose.xlu0.b32.start [1/4] (short) (narrow) %v7102_v16, 16 }
 0x4aa   : > { %7422 = vxpose.xlu0.b32.cont [2/4] (short) (narrow) %v11158_v54, 16 }
 0x4ac   : > { %v11161_v4 = vpop.f32.mrb[82].mxu1 }
 0x4ad   : > { %v7112_v48 = vpop.f32.mrb[83].mxu1 }
 0x4ae   : > { %7423 = vxpose.xlu0.b32.cont [3/4] (short) (narrow) %v7112_v48, 16 }
 0x4b2   : > { %7424 = vxpose.xlu0.b32.end [4/4] (short) (narrow) %v11161_v4, 16 }
 0x4b4   : > { %v11164_v61 = vpop.f32.mrb[84].mxu1 }
 0x4b5   : > { %v7122_v46 = vpop.f32.mrb[85].mxu1 }
 0x4b6   : > { %7453 = vxpose.xlu1.b32.start [1/4] (short) (narrow) %v7122_v46, 16 }
 0x4ba   : > { %7454 = vxpose.xlu1.b32.cont [2/4] (short) (narrow) %v11164_v61, 16 }
 0x4bc   : > { %v11167_v5 = vpop.f32.mrb[86].mxu1 }
 0x4bd   : > { %v7132_v7 = vpop.f32.mrb[87].mxu1 }
 0x4be   : > { %7455 = vxpose.xlu1.b32.cont [3/4] (short) (narrow) %v7132_v7, 16 }
 0x4c0   : > { %v11170_v14 = vpop.f32.mrb[88].mxu1 }
 0x4c1   : > { %v7142_v12 = vpop.f32.mrb[89].mxu1 }
 0x4c2   : > { %7456 = vxpose.xlu1.b32.end [4/4] (short) (narrow) %v11167_v5, 16  ;;  %7485 = vxpose.xlu0.b32.start [1/4] (short) (narrow) %v7142_v12, 16 }
 0x4c4   : > { %v11173_v20 = vpop.f32.mrb[90].mxu1 }
 0x4c5   : > { %v7152_v1 = vpop.f32.mrb[91].mxu1 }
 0x4c6   : > { %7486 = vxpose.xlu0.b32.cont [2/4] (short) (narrow) %v11170_v14, 16 }
 0x4c8   : > { %v11176_v63 = vpop.f32.mrb[92].mxu1 }
 0x4c9   : > { %v7162_v11 = vpop.f32.mrb[93].mxu1 }
 0x4ca   : > { %7517 = vxpose.xlu1.b32.start [1/4] (short) (narrow) %v7162_v11, 16  ;;  %7487 = vxpose.xlu0.b32.cont [3/4] (short) (narrow) %v7152_v1, 16 }
 0x4cc   : > { %v11179_v51 = vpop.f32.mrb[94].mxu1 }
 0x4cd   : > { %v7172_v23 = vpop.f32.mrb[95].mxu1 }
 0x4ce   : > { %7518 = vxpose.xlu1.b32.cont [2/4] (short) (narrow) %v11176_v63, 16  ;;  %7488 = vxpose.xlu0.b32.end [4/4] (short) (narrow) %v11173_v20, 16 }
 0x4d0   : > { %v11182_v29 = vpop.f32.mrb[96].mxu1 }
 0x4d1   : > { %v7182_v32 = vpop.f32.mrb[97].mxu1 }
 0x4d2   : > { %7519 = vxpose.xlu1.b32.cont [3/4] (short) (narrow) %v7172_v23, 16  ;;  %7549 = vxpose.xlu0.b32.start [1/4] (short) (narrow) %v7182_v32, 16 }
 0x4d4   : > { %v11185_v41 = vpop.f32.mrb[98].mxu1 }
 0x4d5   : > { %v7192_v43 = vpop.f32.mrb[99].mxu1 }
 0x4d6   : > { %7520 = vxpose.xlu1.b32.end [4/4] (short) (narrow) %v11179_v51, 16  ;;  %7550 = vxpose.xlu0.b32.cont [2/4] (short) (narrow) %v11182_v29, 16 }
 0x4d8   : > { %v11188_v26 = vpop.f32.mrb[100].mxu1 }
 0x4d9   : > { %v7202_v62 = vpop.f32.mrb[101].mxu1 }
 0x4da   : > { %7581 = vxpose.xlu1.b32.start [1/4] (short) (narrow) %v7202_v62, 16  ;;  %7551 = vxpose.xlu0.b32.cont [3/4] (short) (narrow) %v7192_v43, 16 }
 0x4dc   : > { %v11191_v50 = vpop.f32.mrb[102].mxu1 }
 0x4dd   : > { %v7212_v35 = vpop.f32.mrb[103].mxu1 }
 0x4de   : > { %7582 = vxpose.xlu1.b32.cont [2/4] (short) (narrow) %v11188_v26, 16  ;;  %7552 = vxpose.xlu0.b32.end [4/4] (short) (narrow) %v11185_v41, 16 }
 0x4e0   : > { %v11194_v25 = vpop.f32.mrb[104].mxu1 }
 0x4e1   : > { %v7222_v54 = vpop.f32.mrb[105].mxu1 }
 0x4e2   : > { %7583 = vxpose.xlu1.b32.cont [3/4] (short) (narrow) %v7212_v35, 16  ;;  %7613 = vxpose.xlu0.b32.start [1/4] (short) (narrow) %v7222_v54, 16 }
 0x4e4   : > { %v11197_v16 = vpop.f32.mrb[106].mxu1 }
 0x4e5   : > { %v7232_v4 = vpop.f32.mrb[107].mxu1 }
 0x4e6   : > { %7584 = vxpose.xlu1.b32.end [4/4] (short) (narrow) %v11191_v50, 16  ;;  %7614 = vxpose.xlu0.b32.cont [2/4] (short) (narrow) %v11194_v25, 16 }
 0x4e8   : > { %v11200_v48 = vpop.f32.mrb[108].mxu1 }
 0x4e9   : > { %v7242_v47 = vpop.f32.mrb[109].mxu1 }
 0x4ea   : > { %7645 = vxpose.xlu1.b32.start [1/4] (short) (narrow) %v7242_v47, 16  ;;  %7615 = vxpose.xlu0.b32.cont [3/4] (short) (narrow) %v7232_v4, 16 }
 0x4ec   : > { %v11203_v15 = vpop.f32.mrb[110].mxu1 }
 0x4ed   : > { %v7252_v17 = vpop.f32.mrb[111].mxu1 }
 0x4ee   : > { %7646 = vxpose.xlu1.b32.cont [2/4] (short) (narrow) %v11200_v48, 16  ;;  %7616 = vxpose.xlu0.b32.end [4/4] (short) (narrow) %v11197_v16, 16 }
 0x4f0   : > { %v11206_v61 = vpop.f32.mrb[112].mxu1 }
 0x4f1   : > { %v7262_v46 = vpop.f32.mrb[113].mxu1 }
 0x4f2   : > { %7647 = vxpose.xlu1.b32.cont [3/4] (short) (narrow) %v7252_v17, 16  ;;  %7677 = vxpose.xlu0.b32.start [1/4] (short) (narrow) %v7262_v46, 16  ;;  %v7935_v17 = vld [vmem:[%s14945_s21 + $0x10] sm:$0xff] }
 0x4f4   : > { %v11209_v57 = vpop.f32.mrb[114].mxu1 }
 0x4f5   : > { %v7272_v59 = vpop.f32.mrb[115].mxu1 }
 0x4f6   : > { %7648 = vxpose.xlu1.b32.end [4/4] (short) (narrow) %v11203_v15, 16  ;;  %7678 = vxpose.xlu0.b32.cont [2/4] (short) (narrow) %v11206_v61, 16  ;;  %v7936_v61 = vld [vmem:[%s14945_s21 + $0x18] sm:$0xff] }
 0x4f8   : > { %v11212_v5 = vpop.f32.mrb[116].mxu1 }
 0x4f9   : > { %v7282_v7 = vpop.f32.mrb[117].mxu1 }
 0x4fa   : > { %7709 = vxpose.xlu1.b32.start [1/4] (short) (narrow) %v7282_v7, 16  ;;  %7679 = vxpose.xlu0.b32.cont [3/4] (short) (narrow) %v7272_v59, 16  ;;  %v11664_v59 = vpack.c.bf16 %v7936_v61, %v7935_v17  ;;  %v7937_v7 = vld [vmem:[%s14945_s21 + $0x20] sm:$0xff] }
 0x4fc   : > { %v11215_v14 = vpop.f32.mrb[118].mxu1 }
 0x4fd   : > { %v7292_v12 = vpop.f32.mrb[119].mxu1 }
 0x4fe   : > { %7710 = vxpose.xlu1.b32.cont [2/4] (short) (narrow) %v11212_v5, 16  ;;  %7680 = vxpose.xlu0.b32.end [4/4] (short) (narrow) %v11209_v57, 16 }
 0x500   : > { %v11218_v20 = vpop.f32.mrb[120].mxu1 }
 0x501   : > { %v7302_v1 = vpop.f32.mrb[121].mxu1 }
 0x502   : > { %7711 = vxpose.xlu1.b32.cont [3/4] (short) (narrow) %v7292_v12, 16  ;;  %7741 = vxpose.xlu0.b32.start [1/4] (short) (narrow) %v7302_v1, 16 }
 0x504   : > { %v11221_v63 = vpop.f32.mrb[122].mxu1 }
 0x505   : > { %v7312_v11 = vpop.f32.mrb[123].mxu1 }
 0x506   : > { %7712 = vxpose.xlu1.b32.end [4/4] (short) (narrow) %v11215_v14, 16  ;;  %7742 = vxpose.xlu0.b32.cont [2/4] (short) (narrow) %v11218_v20, 16  ;;  %v7938_v14 = vld [vmem:[%s14945_s21 + $0x28] sm:$0xff] }
 0x507   : > { %v11668_v1 = vpack.c.bf16 %v7938_v14, %v7937_v7 }
 0x508   : > { %v11224_v51 = vpop.f32.mrb[124].mxu1 }
 0x509   : > { %v7322_v23 = vpop.f32.mrb[125].mxu1 }
 0x50a   : > { %7773 = vxpose.xlu1.b32.start [1/4] (short) (narrow) %v7322_v23, 16  ;;  %7743 = vxpose.xlu0.b32.cont [3/4] (short) (narrow) %v7312_v11, 16  ;;  %v7940_v11 = vld [vmem:[%s14945_s21 + $0x38] sm:$0xff] }
 0x50c   : > { %v11227_v29 = vpop.f32.mrb[126].mxu1 }
 0x50d   : > { %v7332_v32 = vpop.f32.mrb[127].mxu1 }
 0x50e   : > { %7774 = vxpose.xlu1.b32.cont [2/4] (short) (narrow) %v11224_v51, 16  ;;  %7744 = vxpose.xlu0.b32.end [4/4] (short) (narrow) %v11221_v63, 16  ;;  %v7939_v63 = vld [vmem:[%s14945_s21 + $0x30] sm:$0xff] }
 0x50f   : > { %v11672_v51 = vpack.c.bf16 %v7940_v11, %v7939_v63  ;;  %v11685_v63 = vadd.f32 %v14423_v40, %v14359_v39  ;;  %v11684_v11 = vadd.f32 %v14356_v37, %v14423_v40 }
 0x510   : > { %v11230_v41 = vpop.f32.mrb[128].mxu1 }
 0x511   : > { %v7342_v43 = vpop.f32.mrb[129].mxu1  ;;  %vm4647_vm15 = vcmp.ge.f32.partialorder %v11685_v63, 0.0  ;;  %vm4648_vm1 = vcmp.ge.f32.partialorder %v11684_v11, 0.0 }
 0x512   : > { %7775 = vxpose.xlu1.b32.cont [3/4] (short) (narrow) %v7332_v32, 16  ;;  %7805 = vxpose.xlu0.b32.start [1/4] (short) (narrow) %v7342_v43, 16 }
 0x514   : > { %v11233_v26 = vpop.f32.mrb[130].mxu1 }
 0x515   : > { %v7352_v62 = vpop.f32.mrb[131].mxu1 }
 0x516   : > { %7776 = vxpose.xlu1.b32.end [4/4] (short) (narrow) %v11227_v29, 16  ;;  %7806 = vxpose.xlu0.b32.cont [2/4] (short) (narrow) %v11230_v41, 16 }
 0x518   : > { %v11236_v50 = vpop.f32.mrb[132].mxu1 }
 0x519   : > { %v7362_v35 = vpop.f32.mrb[133].mxu1 }
 0x51a   : > { %7807 = vxpose.xlu0.b32.cont [3/4] (short) (narrow) %v7352_v62, 16  ;;  %7837 = vxpose.xlu1.b32.start [1/4] (short) (narrow) %v7362_v35, 16 }
 0x51c   : > { %v11239_v25 = vpop.f32.mrb[134].mxu1 }
 0x51d   : > { %v7372_v54 = vpop.f32.mrb[135].mxu1 }
 0x51e   : > { %7808 = vxpose.xlu0.b32.end [4/4] (short) (narrow) %v11233_v26, 16  ;;  %7838 = vxpose.xlu1.b32.cont [2/4] (short) (narrow) %v11236_v50, 16 }
 0x520   : > { %v11242_v16 = vpop.f32.mrb[136].mxu1 }
 0x521   : > { %v7382_v4 = vpop.f32.mrb[137].mxu1 }
 0x522   : > { %7839 = vxpose.xlu1.b32.cont [3/4] (short) (narrow) %v7372_v54, 16  ;;  %7869 = vxpose.xlu0.b32.start [1/4] (short) (narrow) %v7382_v4, 16 }
 0x524   : > { %v11245_v48 = vpop.f32.mrb[138].mxu1 }
 0x525   : > { %v7392_v47 = vpop.f32.mrb[139].mxu1 }
 0x526   : > { %7840 = vxpose.xlu1.b32.end [4/4] (short) (narrow) %v11239_v25, 16  ;;  %7870 = vxpose.xlu0.b32.cont [2/4] (short) (narrow) %v11242_v16, 16  ;;  %v7437_v15 = vpop.trf.xlu0 }
 0x527   : > { %11260 = vmatprep.mubr.msk.f32.mxu1 %vm4743_vm3, %v7437_v15 }
 0x528   : > { %v11248_v46 = vpop.f32.mrb[140].mxu1 }
 0x529   : > { %v7402_v57 = vpop.f32.mrb[141].mxu1 }
 0x52a   : > { %7871 = vxpose.xlu0.b32.cont [3/4] (short) (narrow) %v7392_v47, 16  ;;  %7901 = vxpose.xlu1.b32.start [1/4] (short) (narrow) %v7402_v57, 16  ;;  %v7438_v5 = vpop.trf.xlu0 }
 0x52b   : > { %11261 = vmatmul.mubr.msk.f32.vlgmr.msra.gmra.mrb[144].mxu1 %vm4743_vm3, %v7438_v5 }
 0x52c   : > { %v11251_v12 = vpop.f32.mrb[142].mxu1  ;;  %11663 = vmatpush3.bf16.msra.mxu1 %v14479_v2 }
 0x52d   : > { %v7412_v20 = vpop.f32.mrb[143].mxu1  ;;  %11665 = vmatprep.subr.bf16.mxu1 %v11664_v59 }
 0x52e   : > { %7872 = vxpose.xlu0.b32.end [4/4] (short) (narrow) %v11245_v48, 16  ;;  %7902 = vxpose.xlu1.b32.cont [2/4] (short) (narrow) %v11248_v46, 16 }
 0x530   : > { %11667 = vmatpush3.bf16.msra.mxu1 %v11664_v59 }
 0x531   : > { %11669 = vmatprep.subr.bf16.mxu1 %v11668_v1 }
 0x532   : > { %7903 = vxpose.xlu1.b32.cont [3/4] (short) (narrow) %v7412_v20, 16 }
 0x534   : > { %11671 = vmatpush3.bf16.msra.mxu1 %v11668_v1 }
 0x535   : > { %11673 = vmatprep.subr.bf16.mxu1 %v11672_v51 }
 0x536   : > { %7904 = vxpose.xlu1.b32.end [4/4] (short) (narrow) %v11251_v12, 16  ;;  %v7469_v2 = vpop.trf.xlu1 }
 0x537   : > { %11263 = vmatprep.mubr.msk.f32.mxu1 %vm4743_vm3, %v7469_v2  ;;  %v4679_v2 = vmul.f32 0.01, %v11685_v63 }
 0x538   : > { %11675 = vmatpush3.bf16.msra.mxu1 %v11672_v51 }
 0x539   : > { %v4711_v37 = vsel %vm4647_vm15, %v11685_v63, %v4679_v2 }
 0x53a   : > { %v7470_v23 = vpop.trf.xlu1 }
 0x53b   : > { %11264 = vmatmul.mubr.msk.f32.gmra.mrb[146].mxu1 %vm4743_vm3, %v7470_v23  ;;  %v11687_v23 = vadd.f32 %v14423_v40, %v14365_v0 }
 0x53d   : > { %v4681_v39 = vmul.f32 0.01, %v11687_v23  ;;  %vm4649_vm2 = vcmp.ge.f32.partialorder %v11687_v23, 0.0 }
 0x542   : > { %v7501_v29 = vpop.trf.xlu0 }
 0x543   : > { %11266 = vmatprep.mubr.msk.f32.mxu1 %vm4743_vm3, %v7501_v29  ;;  %v4680_v29 = vmul.f32 0.01, %v11684_v11 }
 0x545   : > { %v4712_v0 = vsel %vm4648_vm1, %v11684_v11, %v4680_v29 }
 0x546   : > { %v7502_v32 = vpop.trf.xlu0 }
 0x547   : > { %11267 = vmatmul.mubr.msk.f32.gmra.mrb[148].mxu1 %vm4743_vm3, %v7502_v32  ;;  %v11686_v32 = vadd.f32 %v14362_v52, %v14423_v40  ;;  %v11691_v52 = vadd.f32 %v14423_v40, %v14377_v13 }
 0x549   : > { %vm4650_vm4 = vcmp.ge.f32.partialorder %v11686_v32, 0.0  ;;  %vm4653_vm6 = vcmp.ge.f32.partialorder %v11691_v52, 0.0 }
 0x54a   : > { %v7533_v41 = vpop.trf.xlu1 }
 0x54b   : > { %11269 = vmatprep.mubr.msk.f32.mxu1 %vm4743_vm3, %v7533_v41 }
 0x54e   : > { %v7534_v43 = vpop.trf.xlu1 }
 0x54f   : > { %11270 = vmatmul.mubr.msk.f32.gmra.mrb[150].mxu1 %vm4743_vm3, %v7534_v43  ;;  %v11689_v43 = vadd.f32 %v14423_v40, %v14371_v53 }
 0x551   : > { %vm4651_vm5 = vcmp.ge.f32.partialorder %v11689_v43, 0.0 }
 0x552   : > { %v7565_v26 = vpop.trf.xlu0 }
 0x553   : > { %11272 = vmatprep.mubr.msk.f32.mxu1 %vm4743_vm3, %v7565_v26  ;;  %v4682_v26 = vmul.f32 0.01, %v11686_v32 }
 0x556   : > { %v7566_v62 = vpop.trf.xlu0 }
 0x557   : > { %11273 = vmatmul.mubr.msk.f32.gmra.mrb[152].mxu1 %vm4743_vm3, %v7566_v62  ;;  %v11688_v62 = vadd.f32 %v14368_v30, %v14423_v40  ;;  %v11693_v30 = vadd.f32 %v14423_v40, %v14383_v33 }
 0x559   : > { %v4684_v53 = vmul.f32 0.01, %v11688_v62  ;;  %vm4655_vm8 = vcmp.ge.f32.partialorder %v11693_v30, 0.0 }
 0x55a   : > { %v7597_v50 = vpop.trf.xlu1 }
 0x55b   : > { %11275 = vmatprep.mubr.msk.f32.mxu1 %vm4743_vm3, %v7597_v50  ;;  %v4683_v50 = vmul.f32 0.01, %v11689_v43 }
 0x55e   : > { %v7598_v35 = vpop.trf.xlu1 }
 0x55f   : > { %11276 = vmatmul.mubr.msk.f32.gmra.mrb[154].mxu1 %vm4743_vm3, %v7598_v35  ;;  %v4713_v35 = vsel %vm4649_vm2, %v11687_v23, %v4681_v39 }
 0x562   : > { %v7629_v25 = vpop.trf.xlu0 }
 0x563   : > { %11278 = vmatprep.mubr.msk.f32.mxu1 %vm4743_vm3, %v7629_v25  ;;  %v11690_v25 = vadd.f32 %v14374_v8, %v14423_v40  ;;  %v11695_v8 = vadd.f32 %v14423_v40, %v14389_v22 }
 0x565   : > { %v4686_v13 = vmul.f32 0.01, %v11690_v25  ;;  %vm4654_vm7 = vcmp.ge.f32.partialorder %v11690_v25, 0.0  ;;  %vm4657_vm10 = vcmp.ge.f32.partialorder %v11695_v8, 0.0 }
 0x566   : > { %v7630_v54 = vpop.trf.xlu0 }
 0x567   : > { %11279 = vmatmul.mubr.msk.f32.gmra.mrb[156].mxu1 %vm4743_vm3, %v7630_v54  ;;  %v4714_v54 = vsel %vm4650_vm4, %v11686_v32, %v4682_v26  ;;  %v11702_v32 = vadd.f32 %v14411_v60, %v14423_v40  ;;  %v11707_v60 = vadd.f32 %v14423_v40, %v14427_v42 }
 0x56a   : > { %v7661_v16 = vpop.trf.xlu1 }
 0x56b   : > { %11281 = vmatprep.mubr.msk.f32.mxu1 %vm4743_vm3, %v7661_v16  ;;  %v4685_v16 = vmul.f32 0.01, %v11691_v52 }
 0x56e   : > { %v7662_v4 = vpop.trf.xlu1 }
 0x56f   : > { %11282 = vmatmul.mubr.msk.f32.gmra.mrb[158].mxu1 %vm4743_vm3, %v7662_v4  ;;  %v4715_v4 = vsel %vm4651_vm5, %v11689_v43, %v4683_v50  ;;  %vm4666_vm5 = vcmp.ge.f32.partialorder %v11702_v32, 0.0  ;;  %v11706_v50 = vadd.f32 %v14425_v49, %v14423_v40 }
 0x571   : > { %v4702_v42 = vmul.f32 0.01, %v11706_v50 }
 0x572   : > { %v7693_v48 = vpop.trf.xlu0 }
 0x573   : > { %11284 = vmatprep.mubr.msk.f32.mxu1 %vm4743_vm3, %v7693_v48  ;;  %v11692_v48 = vadd.f32 %v14380_v27, %v14423_v40  ;;  %v11697_v27 = vadd.f32 %v14423_v40, %v14395_v3 }
 0x575   : > { %v4688_v33 = vmul.f32 0.01, %v11692_v48  ;;  %vm4656_vm9 = vcmp.ge.f32.partialorder %v11692_v48, 0.0  ;;  %vm4659_vm12 = vcmp.ge.f32.partialorder %v11697_v27, 0.0 }
 0x576   : > { %v7694_v47 = vpop.trf.xlu0 }
 0x577   : > { %11285 = vmatmul.mubr.msk.f32.gmra.mrb[160].mxu1 %vm4743_vm3, %v7694_v47 }
 0x57a   : > { %v7725_v15 = vpop.trf.xlu1 }
 0x57b   : > { %11287 = vmatprep.mubr.msk.f32.mxu1 %vm4743_vm3, %v7725_v15  ;;  %v4687_v15 = vmul.f32 0.01, %v11693_v30 }
 0x57e   : > { %v7726_v17 = vpop.trf.xlu1 }
 0x57f   : > { %11288 = vmatmul.mubr.msk.f32.gmra.mrb[162].mxu1 %vm4743_vm3, %v7726_v17  ;;  %v4717_v17 = vsel %vm4653_vm6, %v11691_v52, %v4685_v16  ;;  %v4705_v16 = vmul.f32 0.01, %v14443_v10 }
 0x582   : > { %v7757_v61 = vpop.trf.xlu0 }
 0x583   : > { %11290 = vmatprep.mubr.msk.f32.mxu1 %vm4743_vm3, %v7757_v61  ;;  %v11694_v61 = vadd.f32 %v14387_v45, %v14423_v40  ;;  %v11699_v45 = vadd.f32 %v14423_v40, %v14401_v19 }
 0x585   : > { %v4690_v22 = vmul.f32 0.01, %v11694_v61  ;;  %vm4658_vm11 = vcmp.ge.f32.partialorder %v11694_v61, 0.0  ;;  %v4693_v63 = vmul.f32 0.01, %v11699_v45  ;;  %vm4661_vm14 = vcmp.ge.f32.partialorder %v11699_v45, 0.0 }
 0x586   : > { %v7758_v46 = vpop.trf.xlu0 }
 0x587   : > { %11291 = vmatmul.mubr.msk.f32.gmra.mrb[164].mxu1 %vm4743_vm3, %v7758_v46  ;;  %v4718_v46 = vsel %vm4654_vm7, %v11690_v25, %v4686_v13  ;;  %v4725_v29 = vsel %vm4661_vm14, %v11699_v45, %v4693_v63  ;;  %vm4669_vm7 = vcmp.ge.f32.partialorder %v11707_v60, 0.0  ;;  %v4703_v25 = vmul.f32 0.01, %v14435_v58 }
 0x588   : > { %vm4676_vm14 = vcmp.ge.f32.partialorder %v14449_v21, 0.0 }
 0x58a   : > { %v7789_v57 = vpop.trf.xlu1 }
 0x58b   : > { %11293 = vmatprep.mubr.msk.f32.mxu1 %vm4743_vm3, %v7789_v57  ;;  %v4689_v57 = vmul.f32 0.01, %v11695_v8 }
 0x58e   : > { %v7790_v59 = vpop.trf.xlu1 }
 0x58f   : > { %11294 = vmatmul.mubr.msk.f32.gmra.mrb[166].mxu1 %vm4743_vm3, %v7790_v59  ;;  %v4719_v59 = vsel %vm4655_vm8, %v11693_v30, %v4687_v15  ;;  %vm4670_vm8 = vcmp.ge.f32.partialorder %v11706_v50, 0.0 }
 0x590   : > { %v4734_v49 = vsel %vm4670_vm8, %v11706_v50, %v4702_v42 }
 0x592   : > { %v7821_v5 = vpop.trf.xlu0 }
 0x593   : > { %11296 = vmatprep.mubr.msk.f32.mxu1 %vm4743_vm3, %v7821_v5  ;;  %v11696_v5 = vadd.f32 %v14393_v6, %v14423_v40  ;;  %v11701_v6 = vadd.f32 %v14423_v40, %v14407_v31 }
 0x595   : > { %v4692_v3 = vmul.f32 0.01, %v11696_v5  ;;  %vm4660_vm13 = vcmp.ge.f32.partialorder %v11696_v5, 0.0  ;;  %v4695_v23 = vmul.f32 0.01, %v11701_v6  ;;  %vm4663_vm1 = vcmp.ge.f32.partialorder %v11701_v6, 0.0 }
 0x596   : > { %v7822_v7 = vpop.trf.xlu0 }
 0x597   : > { %11297 = vmatmul.mubr.msk.f32.gmra.mrb[168].mxu1 %vm4743_vm3, %v7822_v7  ;;  %v4720_v7 = vsel %vm4656_vm9, %v11692_v48, %v4688_v33  ;;  %v4724_v2 = vsel %vm4660_vm13, %v11696_v5, %v4692_v3  ;;  %v4727_v43 = vsel %vm4663_vm1, %v11701_v6, %v4695_v23  ;;  %vm4671_vm9 = vcmp.ge.f32.partialorder %v14435_v58, 0.0 }
 0x598   : > { %v4735_v30 = vsel %vm4671_vm9, %v14435_v58, %v4703_v25  ;;  %v4707_v48 = vmul.f32 0.01, %v14451_v28  ;;  %vm4675_vm13 = vcmp.ge.f32.partialorder %v14451_v28, 0.0  ;;  %v4708_v58 = vmul.f32 0.01, %v14449_v21 }
 0x599   : > { %vm4678_vm1 = vcmp.ge.f32.partialorder %v14457_v36, 0.0 }
 0x59a   : > { %v7853_v14 = vpop.trf.xlu1 }
 0x59b   : > { %11299 = vmatprep.mubr.msk.f32.mxu1 %vm4743_vm3, %v7853_v14  ;;  %v4691_v14 = vmul.f32 0.01, %v11697_v27 }
 0x59d   : > { %v4723_v11 = vsel %vm4659_vm12, %v11697_v27, %v4691_v14  ;;  %vm4674_vm12 = vcmp.ge.f32.partialorder %v14441_v18, 0.0 }
 0x59e   : > { %v7854_v12 = vpop.trf.xlu1 }
 0x59f   : > { %11300 = vmatmul.mubr.msk.f32.gmra.mrb[170].mxu1 %vm4743_vm3, %v7854_v12  ;;  %v4721_v12 = vsel %vm4657_vm10, %v11695_v8, %v4689_v57  ;;  %vm4672_vm10 = vcmp.ge.f32.partialorder %v14433_v56, 0.0  ;;  %v4739_v8 = vsel %vm4675_vm13, %v14451_v28, %v4707_v48  ;;  %v14640_v28 = vld [vmem:[%s14946_s10] ss:$0 sm:$0xff]  ;;  %s12398_s10 = sshll.u32 %s12472_s25, 4  ;;  %s12399_s10 = int_to_ptr.vmem [resolvable:$false] %s12398_s10 }
 0x5a0   : > { %s12400_s14 = scalar_lea.vmem %s12399_s10, 8192  ;;  %p12401_p7 = scmp.lt.s32.totalorder %s14747_s18, %s12399_s10 }
 0x5a1   : > { %p12402_p9 = scmp.lt.s32.totalorder %s12400_s14, %s12394_s16 }
 0x5a2   : > { %v7885_v20 = vpop.trf.xlu0 }
 0x5a3   : > { %11302 = vmatprep.mubr.msk.f32.mxu1 %vm4743_vm3, %v7885_v20  ;;  %v11698_v20 = vadd.f32 %v14399_v24, %v14423_v40  ;;  %v11703_v24 = vadd.f32 %v14423_v40, %v14413_v34  ;;  %v4698_v34 = vmul.f32 0.01, %v11702_v32  ;;  %p12403_p12 = por %p12402_p9, %p12401_p7 }
 0x5a5   : > { %v4694_v19 = vmul.f32 0.01, %v11698_v20  ;;  %vm4662_vm15 = vcmp.ge.f32.partialorder %v11698_v20, 0.0  ;;  %v4697_v39 = vmul.f32 0.01, %v11703_v24  ;;  %vm4665_vm4 = vcmp.ge.f32.partialorder %v11703_v24, 0.0  ;;  %p12404_p1 = pnand %p12403_p12, %p12397_p3 }
 0x5a6   : > { %v7886_v1 = vpop.trf.xlu0  ;;  %v4730_v52 = vsel %vm4666_vm5, %v11702_v32, %v4698_v34 }
 0x5a7   : > { %11303 = vmatmul.mubr.msk.f32.gmra.mrb[172].mxu1 %vm4743_vm3, %v7886_v1  ;;  %v4722_v1 = vsel %vm4658_vm11, %v11694_v61, %v4690_v22  ;;  %vm4673_vm11 = vcmp.ge.f32.partialorder %v14443_v10, 0.0 }
 0x5aa   : > { %v7917_v51 = vpop.trf.xlu1 }
 0x5ab   : > { %11305 = vmatprep.mubr.msk.f32.mxu1 %vm4743_vm3, %v7917_v51  ;;  %v11700_v51 = vadd.f32 %v14405_v9, %v14423_v40  ;;  %v11705_v9 = vadd.f32 %v14423_v40, %v14418_v38 }
 0x5ad   : > { %v4696_v31 = vmul.f32 0.01, %v11700_v51  ;;  %vm4664_vm2 = vcmp.ge.f32.partialorder %v11700_v51, 0.0  ;;  %v4699_v26 = vmul.f32 0.01, %v11705_v9 }
 0x5ae   : > { %v7918_v41 = vpop.trf.xlu1 }
 0x5af   : > { %11306 = vmatmul.mubr.msk.f32.gmra.mrb[174].mxu1 %vm4743_vm3, %v7918_v41  ;;  %vm4652_vm3 = vcmp.ge.f32.partialorder %v11688_v62, 0.0  ;;  %v4726_v41 = vsel %vm4662_vm15, %v11698_v20, %v4694_v19  ;;  %vm4677_vm15 = vcmp.ge.f32.partialorder %v14459_v44, 0.0 }
 0x5b0   : > { %11324 = vmatprep.mubr.msk.f32.mxu1 %vm1014_vm0, %v4711_v37  ;;  %v4716_v47 = vsel %vm4652_vm3, %v11688_v62, %v4684_v53  ;;  %v11704_v37 = vadd.f32 %v14416_v55, %v14423_v40  ;;  %v4729_v62 = vsel %vm4665_vm4, %v11703_v24, %v4697_v39  ;;  %vm4667_vm3 = vcmp.ge.f32.partialorder %v11705_v9, 0.0 }
 0x5b1   : > { %v4731_v55 = vsel %vm4667_vm3, %v11705_v9, %v4699_v26  ;;  %v4704_v40 = vmul.f32 0.01, %v14433_v56 }
 0x5b2   : > { %v4700_v38 = vmul.f32 0.01, %v11704_v37  ;;  %vm4668_vm6 = vcmp.ge.f32.partialorder %v11704_v37, 0.0 }
 0x5b3   : > { %11325 = vmatmul.mubr.msk.f32.vlgmr.msra.gmra.mrb[144].mxu1 %vm1014_vm0, %v4712_v0  ;;  %v4728_v0 = vsel %vm4664_vm2, %v11700_v51, %v4696_v31  ;;  %v4736_v13 = vsel %vm4672_vm10, %v14433_v56, %v4704_v40  ;;  %v4709_v56 = vmul.f32 0.01, %v14459_v44 }
 0x5b4   : > { %11327 = vmatprep.mubr.msk.f32.mxu1 %vm1014_vm0, %v4713_v35  ;;  %v4701_v35 = vmul.f32 0.01, %v11707_v60  ;;  %v4732_v53 = vsel %vm4668_vm6, %v11704_v37, %v4700_v38 }
 0x5b7   : > { %11328 = vmatmul.mubr.msk.f32.gmra.mrb[146].mxu1 %vm1014_vm0, %v4714_v54  ;;  %v4733_v54 = vsel %vm4669_vm7, %v11707_v60, %v4701_v35 }
 0x5b8   : > { %11330 = vmatprep.mubr.msk.f32.mxu1 %vm1014_vm0, %v4715_v4  ;;  %v4706_v4 = vmul.f32 0.01, %v14441_v18 }
 0x5ba   : > { %v4738_v15 = vsel %vm4674_vm12, %v14441_v18, %v4706_v4  ;;  %v4741_v18 = vsel %vm4677_vm15, %v14459_v44, %v4709_v56 }
 0x5bb   : > { %11331 = vmatmul.mubr.msk.f32.gmra.mrb[148].mxu1 %vm1014_vm0, %v4716_v47  ;;  %v4737_v47 = vsel %vm4673_vm11, %v14443_v10, %v4705_v16  ;;  %v4710_v10 = vmul.f32 0.01, %v14457_v36 }
 0x5bc   : > { %11333 = vmatprep.mubr.msk.f32.mxu1 %vm1014_vm0, %v4717_v17  ;;  %v4740_v17 = vsel %vm4676_vm14, %v14449_v21, %v4708_v58 }
 0x5bd   : > { %v4742_v33 = vsel %vm4678_vm1, %v14457_v36, %v4710_v10 }
 0x5bf   : > { %11334 = vmatmul.mubr.msk.f32.gmra.mrb[150].mxu1 %vm1014_vm0, %v4718_v46 }
 0x5c0   : > { %11336 = vmatprep.mubr.msk.f32.mxu1 %vm1014_vm0, %v4719_v59 }
 0x5c3   : > { %11337 = vmatmul.mubr.msk.f32.gmra.mrb[152].mxu1 %vm1014_vm0, %v4720_v7 }
 0x5c4   : > { %11339 = vmatprep.mubr.msk.f32.mxu1 %vm1014_vm0, %v4721_v12 }
 0x5c7   : > { %11340 = vmatmul.mubr.msk.f32.gmra.mrb[154].mxu1 %vm1014_vm0, %v4722_v1 }
 0x5c8   : > { %11342 = vmatprep.mubr.msk.f32.mxu1 %vm1014_vm0, %v4723_v11 }
 0x5cb   : > { %11343 = vmatmul.mubr.msk.f32.gmra.mrb[156].mxu1 %vm1014_vm0, %v4724_v2 }
 0x5cc   : > { %11345 = vmatprep.mubr.msk.f32.mxu1 %vm1014_vm0, %v4725_v29 }
 0x5cf   : > { %11346 = vmatmul.mubr.msk.f32.gmra.mrb[158].mxu1 %vm1014_vm0, %v4726_v41 }
 0x5d0   : > { %11348 = vmatprep.mubr.msk.f32.mxu1 %vm1014_vm0, %v4727_v43 }
 0x5d3   : > { %11349 = vmatmul.mubr.msk.f32.gmra.mrb[160].mxu1 %vm1014_vm0, %v4728_v0 }
 0x5d4   : > { %11351 = vmatprep.mubr.msk.f32.mxu1 %vm1014_vm0, %v4729_v62 }
 0x5d7   : > { %11352 = vmatmul.mubr.msk.f32.gmra.mrb[162].mxu1 %vm1014_vm0, %v4730_v52 }
 0x5d8   : > { %11354 = vmatprep.mubr.msk.f32.mxu1 %vm1014_vm0, %v4731_v55 }
 0x5db   : > { %11355 = vmatmul.mubr.msk.f32.gmra.mrb[164].mxu1 %vm1014_vm0, %v4732_v53 }
 0x5dc   : > { %11357 = vmatprep.mubr.msk.f32.mxu1 %vm1014_vm0, %v4733_v54 }
 0x5df   : > { %11358 = vmatmul.mubr.msk.f32.gmra.mrb[166].mxu1 %vm1014_vm0, %v4734_v49 }
 0x5e0   : > { %11360 = vmatprep.mubr.msk.f32.mxu1 %vm1014_vm0, %v4735_v30 }
 0x5e3   : > { %11361 = vmatmul.mubr.msk.f32.gmra.mrb[168].mxu1 %vm1014_vm0, %v4736_v13 }
 0x5e4   : > { %11363 = vmatprep.mubr.msk.f32.mxu1 %vm1014_vm0, %v4737_v47 }
 0x5e7   : > { %11364 = vmatmul.mubr.msk.f32.gmra.mrb[170].mxu1 %vm1014_vm0, %v4738_v15 }
 0x5e8   : > { %11366 = vmatprep.mubr.msk.f32.mxu1 %vm1014_vm0, %v4739_v8 }
 0x5eb   : > { %11367 = vmatmul.mubr.msk.f32.gmra.mrb[172].mxu1 %vm1014_vm0, %v4740_v17 }
 0x5ec   : > { %11369 = vmatprep.mubr.msk.f32.mxu1 %vm1014_vm0, %v4741_v18 }
 0x5ef   : > { %11370 = vmatmul.mubr.msk.f32.gmra.mrb[174].mxu1 %vm1014_vm0, %v4742_v33 }
 0x686   : > { %v11326_v61 = vpop.f32.mrb[144].mxu1 }
 0x687   : > { %v8595_v21 = vadd.f32 %v11326_v61, %v14640_v28  ;;  %v8428_v46 = vpop.f32.mrb[145].mxu1 }
 0x688   : > { %v8594_v57 = vadd.f32 %v14640_v28, %v8428_v46 }
 0x689   : > { %v8627_v27 = vsub.f32 0.0, %v8595_v21 }
 0x68a   : > { %v8626_v59 = vsub.f32 0.0, %v8594_v57  ;;  %v11329_v44 = vpop.f32.mrb[146].mxu1 }
 0x68b   : > { %v8660_v22 = vmul.f32 1.442695, %v8627_v27  ;;  %v8597_v5 = vadd.f32 %v11329_v44, %v14640_v28  ;;  %v8438_v36 = vpop.f32.mrb[147].mxu1 }
 0x68c   : > { %v8658_v7 = vmul.f32 1.442695, %v8626_v59  ;;  %v8596_v14 = vadd.f32 %v14640_v28, %v8438_v36 }
 0x68d   : > { %12148 = vpow2.f32 %v8660_v22  ;;  %v8629_v45 = vsub.f32 0.0, %v8597_v5 }
 0x68e   : > { %12150 = vpow2.f32 %v8658_v7  ;;  %v8628_v12 = vsub.f32 0.0, %v8596_v14  ;;  %v11332_v3 = vpop.f32.mrb[148].mxu1 }
 0x68f   : > { %v8664_v20 = vmul.f32 1.442695, %v8629_v45  ;;  %v8599_v1 = vadd.f32 %v11332_v3, %v14640_v28  ;;  %v8448_v63 = vpop.f32.mrb[149].mxu1 }
 0x690   : > { %v8662_v6 = vmul.f32 1.442695, %v8628_v12  ;;  %v8598_v11 = vadd.f32 %v14640_v28, %v8448_v63  ;;  %v12276_v12 = vld [vmem:[%s12729_s19 + $0x8] sm:$0xff]  ;;  %v12277_v63 = vld [vmem:[%s12729_s19] sm:$0xff] }
 0x691   : > { %12152 = vpow2.f32 %v8664_v20  ;;  %v8631_v19 = vsub.f32 0.0, %v8599_v1 }
 0x692   : > { %12154 = vpow2.f32 %v8662_v6  ;;  %v8630_v51 = vsub.f32 0.0, %v8598_v11  ;;  %v11335_v2 = vpop.f32.mrb[150].mxu1 }
 0x693   : > { %v8668_v23 = vmul.f32 1.442695, %v8631_v19  ;;  %v8601_v24 = vadd.f32 %v11335_v2, %v14640_v28  ;;  %v8458_v29 = vpop.f32.mrb[151].mxu1 }
 0x694   : > { %v8666_v31 = vmul.f32 1.442695, %v8630_v51  ;;  %v8600_v32 = vadd.f32 %v14640_v28, %v8458_v29 }
 0x695   : > { %12156 = vpow2.f32 %v8668_v23  ;;  %v8633_v41 = vsub.f32 0.0, %v8601_v24 }
 0x696   : > { %12158 = vpow2.f32 %v8666_v31  ;;  %v8632_v39 = vsub.f32 0.0, %v8600_v32  ;;  %v11338_v9 = vpop.f32.mrb[152].mxu1 }
 0x697   : > { %v12149_v43 = vpop.eup %12148  ;;  %v8672_v34 = vmul.f32 1.442695, %v8633_v41  ;;  %v8603_v37 = vadd.f32 %v11338_v9, %v14640_v28  ;;  %v8468_v0 = vpop.f32.mrb[153].mxu1 }
 0x698   : > { %v12151_v26 = vpop.eup %12150  ;;  %v8723_v60 = vadd.f32 1.0, %v12149_v43  ;;  %v8670_v62 = vmul.f32 1.442695, %v8632_v39  ;;  %v8602_v38 = vadd.f32 %v14640_v28, %v8468_v0  ;;  %v12278_v43 = vld [vmem:[%s12729_s19 + $0x18] sm:$0xff] }
 0x699   : > { %v8722_v50 = vadd.f32 1.0, %v12151_v26  ;;  %12160 = vpow2.f32 %v8672_v34  ;;  %v8635_v52 = vsub.f32 0.0, %v8603_v37  ;;  %v12279_v26 = vld [vmem:[%s12729_s19 + $0x10] sm:$0xff] }
 0x69a   : > { %12162 = vrcp.f32 %v8723_v60  ;;  %v8634_v35 = vsub.f32 0.0, %v8602_v38  ;;  %v11341_v55 = vpop.f32.mrb[154].mxu1 }
 0x69b   : > { %v12153_v42 = vpop.eup %12152  ;;  %12164 = vrcp.f32 %v8722_v50  ;;  %v8676_v53 = vmul.f32 1.442695, %v8635_v52  ;;  %v8605_v25 = vadd.f32 %v11341_v55, %v14640_v28  ;;  %v8478_v54 = vpop.f32.mrb[155].mxu1 }
 0x69c   : > { %v12155_v40 = vpop.eup %12154  ;;  %v8725_v49 = vadd.f32 1.0, %v12153_v42  ;;  %12166 = vpow2.f32 %v8670_v62  ;;  %v8674_v16 = vmul.f32 1.442695, %v8634_v35  ;;  %v8604_v30 = vadd.f32 %v14640_v28, %v8478_v54 }
 0x69d   : > { %v8724_v4 = vadd.f32 1.0, %v12155_v40  ;;  %12168 = vpow2.f32 %v8676_v53  ;;  %v8637_v13 = vsub.f32 0.0, %v8605_v25 }
 0x69e   : > { %12170 = vrcp.f32 %v8725_v49  ;;  %v8636_v48 = vsub.f32 0.0, %v8604_v30  ;;  %v11344_v47 = vpop.f32.mrb[156].mxu1 }
 0x69f   : > { %v12157_v58 = vpop.eup %12156  ;;  %12172 = vrcp.f32 %v8724_v4  ;;  %v8680_v15 = vmul.f32 1.442695, %v8637_v13  ;;  %v8607_v56 = vadd.f32 %v11344_v47, %v14640_v28  ;;  %v8488_v8 = vpop.f32.mrb[157].mxu1 }
 0x6a0   : > { %v12159_v10 = vpop.eup %12158  ;;  %v8727_v17 = vadd.f32 1.0, %v12157_v58  ;;  %12174 = vpow2.f32 %v8674_v16  ;;  %v8678_v18 = vmul.f32 1.442695, %v8636_v48  ;;  %v8606_v33 = vadd.f32 %v14640_v28, %v8488_v8  ;;  %v12280_v16 = vld [vmem:[%s12729_s19 + $0x28] sm:$0xff]  ;;  %v12281_v48 = vld [vmem:[%s12729_s19 + $0x20] sm:$0xff] }
 0x6a1   : > { %v8726_v61 = vadd.f32 1.0, %v12159_v10  ;;  %12176 = vpow2.f32 %v8680_v15  ;;  %v8639_v21 = vsub.f32 0.0, %v8607_v56 }
 0x6a2   : > { %12178 = vrcp.f32 %v8727_v17  ;;  %v8638_v46 = vsub.f32 0.0, %v8606_v33  ;;  %v11347_v57 = vpop.f32.mrb[158].mxu1 }
 0x6a3   : > { %v12161_v27 = vpop.eup %12160  ;;  %12180 = vrcp.f32 %v8726_v61  ;;  %v8684_v59 = vmul.f32 1.442695, %v8639_v21  ;;  %v8609_v44 = vadd.f32 %v11347_v57, %v14640_v28  ;;  %v8498_v22 = vpop.f32.mrb[159].mxu1  ;;  %v12282_v57 = vld [vmem:[%s12729_s19 + $0x38] sm:$0xff] }
 0x6a4   : > { %v12163_v5 = vpop.eup %12162  ;;  %v8729_v36 = vadd.f32 1.0, %v12161_v27  ;;  %12182 = vpow2.f32 %v8678_v18  ;;  %v8682_v7 = vmul.f32 1.442695, %v8638_v46  ;;  %v8608_v14 = vadd.f32 %v14640_v28, %v8498_v22 }
 0x6a5   : > { %v12165_v45 = vpop.eup %12164  ;;  %v8819_v3 = vmul.f32 %v12276_v12, %v12163_v5  ;;  %12184 = vpow2.f32 %v8684_v59  ;;  %v8641_v20 = vsub.f32 0.0, %v8609_v44 }
 0x6a6   : > { %v12167_v1 = vpop.eup %12166  ;;  %v8818_v6 = vmul.f32 %v12277_v63, %v12165_v45  ;;  %12186 = vrcp.f32 %v8729_v36  ;;  %v8640_v11 = vsub.f32 0.0, %v8608_v14  ;;  %v11350_v19 = vpop.f32.mrb[160].mxu1 }
 0x6a7   : > { %v12169_v51 = vpop.eup %12168  ;;  %8851 = vst [vmem:[%s14662_s22 + $0x8] sm:$0xff] %v8819_v3  ;;  %v8728_v2 = vadd.f32 1.0, %v12167_v1  ;;  %12188 = vpow2.f32 %v8682_v7  ;;  %v8688_v23 = vmul.f32 1.442695, %v8641_v20  ;;  %v8611_v24 = vadd.f32 %v11350_v19, %v14640_v28  ;;  %v8508_v29 = vpop.f32.mrb[161].mxu1  ;;  %v12283_v20 = vld [vmem:[%s12729_s19 + $0x30] sm:$0xff] }
 0x6a8   : > { %v12171_v31 = vpop.eup %12170  ;;  %8850 = vst [vmem:[%s14662_s22] sm:$0xff] %v8818_v6  ;;  %v8731_v32 = vadd.f32 1.0, %v12169_v51  ;;  %v8686_v41 = vmul.f32 1.442695, %v8640_v11  ;;  %v8610_v39 = vadd.f32 %v14640_v28, %v8508_v29  ;;  %v12284_v19 = vld [vmem:[%s12729_s19 + $0x48] sm:$0xff] }
 0x6a9   : > { %v12173_v9 = vpop.eup %12172  ;;  %v8821_v34 = vmul.f32 %v12278_v43, %v12171_v31  ;;  %12190 = vrcp.f32 %v8728_v2  ;;  %v8643_v37 = vsub.f32 0.0, %v8611_v24 }
 0x6aa   : > { %v12175_v0 = vpop.eup %12174  ;;  %v8820_v60 = vmul.f32 %v12279_v26, %v12173_v9  ;;  %12192 = vrcp.f32 %v8731_v32  ;;  %v8642_v62 = vsub.f32 0.0, %v8610_v39  ;;  %v11353_v38 = vpop.f32.mrb[162].mxu1 }
 0x6ab   : > { %v12177_v50 = vpop.eup %12176  ;;  %8853 = vst [vmem:[%s14662_s22 + $0x18] sm:$0xff] %v8821_v34  ;;  %v8730_v52 = vadd.f32 1.0, %v12175_v0  ;;  %12194 = vpow2.f32 %v8688_v23  ;;  %v8692_v35 = vmul.f32 1.442695, %v8643_v37  ;;  %v8613_v55 = vadd.f32 %v11353_v38, %v14640_v28  ;;  %v8518_v42 = vpop.f32.mrb[163].mxu1  ;;  %v12285_v37 = vld [vmem:[%s12729_s19 + $0x40] sm:$0xff] }
 0x6ac   : > { %v12179_v53 = vpop.eup %12178  ;;  %8852 = vst [vmem:[%s14662_s22 + $0x10] sm:$0xff] %v8820_v60  ;;  %v8733_v25 = vadd.f32 1.0, %v12177_v50  ;;  %12196 = vpow2.f32 %v8686_v41  ;;  %v8690_v54 = vmul.f32 1.442695, %v8642_v62  ;;  %v8612_v40 = vadd.f32 %v14640_v28, %v8518_v42  ;;  %v12286_v38 = vld [vmem:[%s12729_s19 + $0x58] sm:$0xff] }
 0x6ad   : > { %v12181_v49 = vpop.eup %12180  ;;  %v8823_v30 = vmul.f32 %v12280_v16, %v12179_v53  ;;  %12198 = vrcp.f32 %v8730_v52  ;;  %v8645_v4 = vsub.f32 0.0, %v8613_v55 }
 0x6ae   : > { %v12183_v13 = vpop.eup %12182  ;;  %v8822_v47 = vmul.f32 %v12281_v48, %v12181_v49  ;;  %12200 = vrcp.f32 %v8733_v25  ;;  %v8644_v58 = vsub.f32 0.0, %v8612_v40  ;;  %v11356_v15 = vpop.f32.mrb[164].mxu1 }
 0x6af   : > { %v12185_v56 = vpop.eup %12184  ;;  %8855 = vst [vmem:[%s14662_s22 + $0x28] sm:$0xff] %v8823_v30  ;;  %v8732_v8 = vadd.f32 1.0, %v12183_v13  ;;  %12202 = vpow2.f32 %v8692_v35  ;;  %v8696_v10 = vmul.f32 1.442695, %v8645_v4  ;;  %v8615_v17 = vadd.f32 %v11356_v15, %v14640_v28  ;;  %v8528_v18 = vpop.f32.mrb[165].mxu1  ;;  %v12287_v4 = vld [vmem:[%s12729_s19 + $0x50] sm:$0xff] }
 0x6b0   : > { %v12187_v33 = vpop.eup %12186  ;;  %8854 = vst [vmem:[%s14662_s22 + $0x20] sm:$0xff] %v8822_v47  ;;  %v8735_v61 = vadd.f32 1.0, %v12185_v56  ;;  %12204 = vpow2.f32 %v8690_v54  ;;  %v8614_v21 = vadd.f32 %v14640_v28, %v8528_v18  ;;  %v8694_v59 = vmul.f32 1.442695, %v8644_v58  ;;  %v12288_v15 = vld [vmem:[%s12729_s19 + $0x68] sm:$0xff] }
 0x6b1   : > { %v12189_v46 = vpop.eup %12188  ;;  %v8825_v27 = vmul.f32 %v12282_v57, %v12187_v33  ;;  %12206 = vrcp.f32 %v8732_v8  ;;  %v8647_v44 = vsub.f32 0.0, %v8615_v17 }
 0x6b2   : > { %12208 = vrcp.f32 %v8735_v61  ;;  %v8734_v22 = vadd.f32 1.0, %v12189_v46  ;;  %v8646_v5 = vsub.f32 0.0, %v8614_v21  ;;  %v11359_v36 = vpop.f32.mrb[166].mxu1  ;;  %v12289_v21 = vld [vmem:[%s12729_s19 + $0x60] sm:$0xff] }
 0x6b3   : > { %v12191_v7 = vpop.eup %12190  ;;  %8857 = vst [vmem:[%s14662_s22 + $0x38] sm:$0xff] %v8825_v27  ;;  %12210 = vpow2.f32 %v8696_v10  ;;  %v8700_v14 = vmul.f32 1.442695, %v8647_v44  ;;  %v8617_v45 = vadd.f32 %v11359_v36, %v14640_v28  ;;  %v8538_v12 = vpop.f32.mrb[167].mxu1 }
 0x6b4   : > { %v12193_v3 = vpop.eup %12192  ;;  %v8824_v1 = vmul.f32 %v12283_v20, %v12191_v7  ;;  %12212 = vrcp.f32 %v8734_v22  ;;  %v8698_v63 = vmul.f32 1.442695, %v8646_v5  ;;  %v8616_v6 = vadd.f32 %v14640_v28, %v8538_v12 }
 0x6b5   : > { %v12195_v11 = vpop.eup %12194  ;;  %v8827_v51 = vmul.f32 %v12284_v19, %v12193_v3  ;;  %12214 = vpow2.f32 %v8694_v59  ;;  %v8649_v2 = vsub.f32 0.0, %v8617_v45 }
 0x6b6   : > { %v12197_v23 = vpop.eup %12196  ;;  %8856 = vst [vmem:[%s14662_s22 + $0x30] sm:$0xff] %v8824_v1  ;;  %v8737_v24 = vadd.f32 1.0, %v12195_v11  ;;  %12216 = vpow2.f32 %v8700_v14  ;;  %v8648_v29 = vsub.f32 0.0, %v8616_v6  ;;  %v11362_v31 = vpop.f32.mrb[168].mxu1  ;;  %v12290_v6 = vld [vmem:[%s12729_s19 + $0x78] sm:$0xff] }
 0x6b7   : > { %v12199_v32 = vpop.eup %12198  ;;  %8859 = vst [vmem:[%s14662_s22 + $0x48] sm:$0xff] %v8827_v51  ;;  %v8736_v41 = vadd.f32 1.0, %v12197_v23  ;;  %12218 = vpow2.f32 %v8698_v63  ;;  %v8704_v39 = vmul.f32 1.442695, %v8649_v2  ;;  %v8619_v9 = vadd.f32 %v11362_v31, %v14640_v28  ;;  %v8548_v43 = vpop.f32.mrb[169].mxu1 }
 0x6b8   : > { %v12201_v34 = vpop.eup %12200  ;;  %v8826_v0 = vmul.f32 %v12285_v37, %v12199_v32  ;;  %12220 = vrcp.f32 %v8737_v24  ;;  %v8702_v26 = vmul.f32 1.442695, %v8648_v29  ;;  %v8618_v60 = vadd.f32 %v14640_v28, %v8548_v43  ;;  %v12291_v24 = vld [vmem:[%s12729_s19 + $0x70] sm:$0xff] }
 0x6b9   : > { %v12203_v62 = vpop.eup %12202  ;;  %v8829_v50 = vmul.f32 %v12286_v38, %v12201_v34  ;;  %12222 = vrcp.f32 %v8736_v41  ;;  %v8651_v52 = vsub.f32 0.0, %v8619_v9  ;;  %v12293_v38 = vld [vmem:[%s12729_s19 + $0x80] sm:$0xff] }
 0x6ba   : > { %v12205_v35 = vpop.eup %12204  ;;  %8858 = vst [vmem:[%s14662_s22 + $0x40] sm:$0xff] %v8826_v0  ;;  %v8739_v55 = vadd.f32 1.0, %v12203_v62  ;;  %12224 = vpow2.f32 %v8704_v39  ;;  %v8650_v42 = vsub.f32 0.0, %v8618_v60  ;;  %v11365_v53 = vpop.f32.mrb[170].mxu1 }
 0x6bb   : > { %v12207_v25 = vpop.eup %12206  ;;  %8861 = vst [vmem:[%s14662_s22 + $0x58] sm:$0xff] %v8829_v50  ;;  %v8738_v54 = vadd.f32 1.0, %v12205_v35  ;;  %12226 = vpow2.f32 %v8702_v26  ;;  %v8708_v40 = vmul.f32 1.442695, %v8651_v52  ;;  %v8621_v49 = vadd.f32 %v11365_v53, %v14640_v28  ;;  %v8558_v16 = vpop.f32.mrb[171].mxu1  ;;  %v12292_v26 = vld [vmem:[%s12729_s19 + $0x88] sm:$0xff] }
 0x6bc   : > { %v12209_v30 = vpop.eup %12208  ;;  %v8828_v13 = vmul.f32 %v12287_v4, %v12207_v25  ;;  %12228 = vrcp.f32 %v8739_v55  ;;  %v8706_v48 = vmul.f32 1.442695, %v8650_v42  ;;  %v8620_v47 = vadd.f32 %v14640_v28, %v8558_v16  ;;  %v12295_v4 = vld [vmem:[%s12729_s19 + $0x90] sm:$0xff] }
 0x6bd   : > { %v12211_v58 = vpop.eup %12210  ;;  %v8831_v56 = vmul.f32 %v12288_v15, %v12209_v30  ;;  %12230 = vrcp.f32 %v8738_v54  ;;  %v8653_v8 = vsub.f32 0.0, %v8621_v49  ;;  %v12294_v54 = vld [vmem:[%s12729_s19 + $0x98] sm:$0xff] }
 0x6be   : > { %v12213_v10 = vpop.eup %12212  ;;  %8860 = vst [vmem:[%s14662_s22 + $0x50] sm:$0xff] %v8828_v13  ;;  %v8741_v17 = vadd.f32 1.0, %v12211_v58  ;;  %12232 = vpow2.f32 %v8708_v40  ;;  %v8652_v18 = vsub.f32 0.0, %v8620_v47  ;;  %v11368_v33 = vpop.f32.mrb[172].mxu1  ;;  %v12296_v47 = vld [vmem:[%s12729_s19 + $0xa8] sm:$0xff] }
 0x6bf   : > { %v12215_v61 = vpop.eup %12214  ;;  %8863 = vst [vmem:[%s14662_s22 + $0x68] sm:$0xff] %v8831_v56  ;;  %v8830_v46 = vmul.f32 %v12289_v21, %v12213_v10  ;;  %12234 = vpow2.f32 %v8706_v48  ;;  %v8712_v57 = vmul.f32 1.442695, %v8653_v8  ;;  %v8623_v27 = vadd.f32 %v11368_v33, %v14640_v28  ;;  %v8568_v59 = vpop.f32.mrb[173].mxu1  ;;  %v12297_v56 = vld [vmem:[%s12729_s19 + $0xa0] sm:$0xff]  ;;  %v12298_v21 = vld [vmem:[%s12729_s19 + $0xb8] sm:$0xff] }
 0x6c0   : > { %v12217_v44 = vpop.eup %12216  ;;  %12236 = vrcp.f32 %v8741_v17  ;;  %v8740_v22 = vadd.f32 1.0, %v12215_v61  ;;  %v8622_v5 = vadd.f32 %v14640_v28, %v8568_v59  ;;  %v8710_v14 = vmul.f32 1.442695, %v8652_v18 }
 0x6c1   : > { %v12219_v36 = vpop.eup %12218  ;;  %8862 = vst [vmem:[%s14662_s22 + $0x60] sm:$0xff] %v8830_v46  ;;  %v8743_v7 = vadd.f32 1.0, %v12217_v44  ;;  %12238 = vpow2.f32 %v8712_v57  ;;  %v8655_v45 = vsub.f32 0.0, %v8623_v27  ;;  %v12299_v27 = vld [vmem:[%s12729_s19 + $0xb0] sm:$0xff] }
 0x6c2   : > { %v12221_v12 = vpop.eup %12220  ;;  %12240 = vrcp.f32 %v8740_v22  ;;  %v8742_v3 = vadd.f32 1.0, %v12219_v36  ;;  %v8654_v20 = vsub.f32 0.0, %v8622_v5  ;;  %v11371_v1 = vpop.f32.mrb[174].mxu1 }
 0x6c3   : > { %v12223_v63 = vpop.eup %12222  ;;  %v8833_v11 = vmul.f32 %v12290_v6, %v12221_v12  ;;  %12242 = vrcp.f32 %v8743_v7  ;;  %v8716_v19 = vmul.f32 1.442695, %v8655_v45  ;;  %v8625_v51 = vadd.f32 %v11371_v1, %v14640_v28  ;;  %v8578_v2 = vpop.f32.mrb[175].mxu1  ;;  %v12302_v6 = vld [vmem:[%s12729_s19 + $0xd8] sm:$0xff] }
 0x6c4   : > { %v12225_v23 = vpop.eup %12224  ;;  %v8832_v29 = vmul.f32 %v12291_v24, %v12223_v63  ;;  %12244 = vrcp.f32 %v8742_v3  ;;  %v8624_v31 = vadd.f32 %v14640_v28, %v8578_v2  ;;  %v8714_v39 = vmul.f32 1.442695, %v8654_v20  ;;  %v12301_v3 = vld [vmem:[%s12729_s19 + $0xc0] sm:$0xff]  ;;  %v12303_v2 = vld [vmem:[%s12729_s19 + $0xd0] sm:$0xff]  ;;  %v12304_v24 = vld [vmem:[%s12729_s19 + $0xe8] sm:$0xff] }
 0x6c5   : > { %v12227_v32 = vpop.eup %12226  ;;  %8865 = vst [vmem:[%s14662_s22 + $0x78] sm:$0xff] %v8833_v11  ;;  %v8745_v41 = vadd.f32 1.0, %v12225_v23  ;;  %12246 = vpow2.f32 %v8710_v14  ;;  %v8657_v9 = vsub.f32 0.0, %v8625_v51  ;;  %v12300_v14 = vld [vmem:[%s12729_s19 + $0xc8] sm:$0xff] }
 0x6c6   : > { %v12229_v43 = vpop.eup %12228  ;;  %8864 = vst [vmem:[%s14662_s22 + $0x70] sm:$0xff] %v8832_v29  ;;  %v8744_v34 = vadd.f32 1.0, %v12227_v32  ;;  %12248 = vpow2.f32 %v8716_v19  ;;  %v8656_v37 = vsub.f32 0.0, %v8624_v31 }
 0x6c7   : > { %v12231_v0 = vpop.eup %12230  ;;  %v8835_v60 = vmul.f32 %v12292_v26, %v12229_v43  ;;  %12250 = vrcp.f32 %v8745_v41  ;;  %v8720_v28 = vmul.f32 1.442695, %v8657_v9  ;;  %v12305_v41 = vld [vmem:[%s12729_s19 + $0xe0] sm:$0xff]  ;;  %v12306_v9 = vld [vmem:[%s12729_s19 + $0xf8] sm:$0xff] }
 0x6c8   : > { %v12233_v62 = vpop.eup %12232  ;;  %v8834_v50 = vmul.f32 %v12293_v38, %v12231_v0  ;;  %12252 = vrcp.f32 %v8744_v34  ;;  %v8718_v55 = vmul.f32 1.442695, %v8656_v37  ;;  %v12307_v37 = vld [vmem:[%s12729_s19 + $0xf0] sm:$0xff] }
 0x6c9   : > { %v12235_v52 = vpop.eup %12234  ;;  %8867 = vst [vmem:[%s14662_s22 + $0x88] sm:$0xff] %v8835_v60  ;;  %v8747_v35 = vadd.f32 1.0, %v12233_v62  ;;  %12254 = vpow2.f32 %v8714_v39 }
 0x6ca   : > { %v12237_v42 = vpop.eup %12236  ;;  %8866 = vst [vmem:[%s14662_s22 + $0x80] sm:$0xff] %v8834_v50  ;;  %v8746_v53 = vadd.f32 1.0, %v12235_v52  ;;  %12256 = vpow2.f32 %v8720_v28 }
 0x6cb   : > { %v12239_v25 = vpop.eup %12238  ;;  %v8837_v40 = vmul.f32 %v12294_v54, %v12237_v42  ;;  %12258 = vrcp.f32 %v8747_v35 }
 0x6cc   : > { %v12241_v49 = vpop.eup %12240  ;;  %12260 = vrcp.f32 %v8746_v53  ;;  %v8749_v16 = vadd.f32 1.0, %v12239_v25 }
 0x6cd   : > { %v12243_v30 = vpop.eup %12242  ;;  %8869 = vst [vmem:[%s14662_s22 + $0x98] sm:$0xff] %v8837_v40  ;;  %v8836_v13 = vmul.f32 %v12295_v4, %v12241_v49  ;;  %12262 = vpow2.f32 %v8718_v55 }
 0x6ce   : > { %v12245_v48 = vpop.eup %12244  ;;  %v8839_v58 = vmul.f32 %v12296_v47, %v12243_v30  ;;  %12264 = vrcp.f32 %v8749_v16 }
 0x6cf   : > { %v12247_v15 = vpop.eup %12246  ;;  %8868 = vst [vmem:[%s14662_s22 + $0x90] sm:$0xff] %v8836_v13  ;;  %v8838_v8 = vmul.f32 %v12297_v56, %v12245_v48 }
 0x6d0   : > { %v12249_v10 = vpop.eup %12248  ;;  %8871 = vst [vmem:[%s14662_s22 + $0xa8] sm:$0xff] %v8839_v58  ;;  %v8748_v17 = vadd.f32 1.0, %v12247_v15 }
 0x6d1   : > { %v12251_v18 = vpop.eup %12250  ;;  %8870 = vst [vmem:[%s14662_s22 + $0xa0] sm:$0xff] %v8838_v8  ;;  %v8751_v33 = vadd.f32 1.0, %v12249_v10 }
 0x6d2   : > { %v12253_v61 = vpop.eup %12252  ;;  %v8841_v46 = vmul.f32 %v12298_v21, %v12251_v18  ;;  %12266 = vrcp.f32 %v8748_v17 }
 0x6d3   : > { %v12255_v57 = vpop.eup %12254  ;;  %v8840_v59 = vmul.f32 %v12299_v27, %v12253_v61  ;;  %12268 = vrcp.f32 %v8751_v33 }
 0x6d4   : > { %v12257_v44 = vpop.eup %12256  ;;  %8873 = vst [vmem:[%s14662_s22 + $0xb8] sm:$0xff] %v8841_v46  ;;  %v8750_v22 = vadd.f32 1.0, %v12255_v57 }
 0x6d5   : > { %v12259_v5 = vpop.eup %12258  ;;  %8872 = vst [vmem:[%s14662_s22 + $0xb0] sm:$0xff] %v8840_v59  ;;  %v8753_v36 = vadd.f32 1.0, %v12257_v44 }
 0x6d6   : > { %v12261_v7 = vpop.eup %12260  ;;  %v8843_v45 = vmul.f32 %v12300_v14, %v12259_v5  ;;  %12270 = vrcp.f32 %v8750_v22 }
 0x6d7   : > { %v12263_v12 = vpop.eup %12262  ;;  %v8842_v20 = vmul.f32 %v12301_v3, %v12261_v7  ;;  %12272 = vrcp.f32 %v8753_v36 }
 0x6d8   : > { %v12265_v1 = vpop.eup %12264  ;;  %8875 = vst [vmem:[%s14662_s22 + $0xc8] sm:$0xff] %v8843_v45  ;;  %v8752_v63 = vadd.f32 1.0, %v12263_v12 }
 0x6d9   : > { %8874 = vst [vmem:[%s14662_s22 + $0xc0] sm:$0xff] %v8842_v20  ;;  %v8845_v11 = vmul.f32 %v12302_v6, %v12265_v1 }
 0x6da   : > { %12274 = vrcp.f32 %v8752_v63 }
 0x6db   : > { %8877 = vst [vmem:[%s14662_s22 + $0xd8] sm:$0xff] %v8845_v11 }
 0x6dc   : > { %v12267_v19 = vpop.eup %12266 }
 0x6dd   : > { %v12269_v51 = vpop.eup %12268  ;;  %v8844_v23 = vmul.f32 %v12303_v2, %v12267_v19 }
 0x6de   : > { %v8847_v29 = vmul.f32 %v12304_v24, %v12269_v51 }
 0x6df   : > { %8876 = vst [vmem:[%s14662_s22 + $0xd0] sm:$0xff] %v8844_v23 }
 0x6e0   : > { %v12271_v31 = vpop.eup %12270  ;;  %8879 = vst [vmem:[%s14662_s22 + $0xe8] sm:$0xff] %v8847_v29 }
 0x6e1   : > { %v12273_v32 = vpop.eup %12272  ;;  %v8846_v39 = vmul.f32 %v12305_v41, %v12271_v31 }
 0x6e2   : > { %v8849_v43 = vmul.f32 %v12306_v9, %v12273_v32 }
 0x6e3   : > { %8878 = vst [vmem:[%s14662_s22 + $0xe0] sm:$0xff] %v8846_v39 }
 0x6e4   : > { %v12275_v34 = vpop.eup %12274  ;;  %8881 = vst [vmem:[%s14662_s22 + $0xf8] sm:$0xff] %v8849_v43 }
 0x6e5   : > { %v8848_v0 = vmul.f32 %v12307_v37, %v12275_v34 }
 0x6e7   : > { %8880 = vst [vmem:[%s14662_s22 + $0xf0] sm:$0xff] %v8848_v0 }
 0x6e8   : > { %12407 = shalt.err (!%p12404_p1)
}
 0x6e9   : > { %s12408_s19 = scalar_lea.hbm %s14745_s17, 4096  ;;  %s12412_s15 = scalar_lea.hbm %s14947_s20, 8192 }
 0x6ea   : > { %p12409_p13 = scmp.ne.s32.totalorder %s14745_s17, %s12408_s19  ;;  %p12413_p4 = scmp.lt.u32.totalorder %s14745_s17, %s14947_s20 }
 0x6eb   : > { %p12414_p5 = scmp.lt.u32.totalorder %s12412_s15, %s12408_s19  ;;  %p12416_p11 = scmp.lt.u32.totalorder %s12408_s19, %s14745_s17 }
 0x6ec   : > { %p12410_p6 = pnand %p12409_p13, %p14948_p0 }
 0x6ed   : > { %p12415_p8 = por %p12414_p5, %p12413_p4 }
 0x6ee   : > { %p12411_p10 = pneg %p12410_p6 }
 0x6ef   : > { %p12417_p2 = por %p12416_p11, %p12415_p8 }
 0x6f1   : > { %p12418_p3 = pnand %p12417_p2, %p12411_p10 }
 0x6f3   : > { %12421 = shalt.err (!%p12418_p3)
}
 0x6f4   : > { %s12473_s16 = smov 128   ;;  %s12474_s14 = smov 8  }
 0x6f5   : > { %12086 = dma.vmem_to_hbm [thread:$0]  (%p14948_p0), %s14747_s18, 4096, %s14745_s17, %s8883_s29, %s12473_s16, %s12473_s16, %s12474_s14  }
 0x6f6 PF: > { %s14949_s22 = sld [smem:[#allocation16_spill]]  ;;  %s14950_s30 = sld [smem:[#allocation17_spill]] }
 0x6f7   : > { %p14952_p9 = scmp.ge.s32.totalorder %s12464_s28, 2 }
 0x6fc   : > { %s8911_s25 = sand.u32 1, %s14949_s22   ;;  %p14951_p7 = scmp.ne.s32.totalorder %s14950_s30, 0 }
 0x6fd   : > { %s8912_s19 = scalar_lea.sflag [#allocation8], %s8911_s25 }
 0x6fe   : > { %p12100_p12 = pnand %p14952_p9, %p14951_p7 }
 0x700   : > { %12447 = dma.done.wait (!%p12100_p12), %s8912_s19, 4096  }
 0x701   : > { %12449 = vsyncadd (!%p12100_p12), %s8912_s19, 4294963200  ;;  %p27_p1 = scmp.ge.s32.totalorder %s12658_s13, 4   ;;  %s14953_s25 = smov %s12456_s26 }
 0x702   : > { %s14954_s26 = smov %s12460_s27  ;;  %s14955_s27 = smov %s12674_s24 }
 0x703   : > { %s14956_s28 = smov %s12658_s13  ;;  %29 = sbr.rel (!%p27_p1) target bundleno = 10 (0xa), region = 163 }
 0x70a   :  { %8917 = vsyncpa [#allocation7], 1 }
 0x70b   :  { %8919 = vsyncpa [#allocation7 + $0x1], 1 }
 0x70c   :  { %8920 = vsyncpa [#allocation10], 1 }
 0x70d   :  { %8921 = vsyncpa [#allocation8], 1 }
 0x70e   :  { %8923 = vsyncpa [#allocation8 + $0x1], 1 }

</bundles_post_ra>
